<compile_context>
chip_gen: v7x
topology: tpu7x:2x2x1
jax: 0.10.0
libtpu: 0.0.40
codegen_flags: <defaults>
</compile_context>

<pallas_src>
import functools

import jax
import jax.numpy as jnp
from jax.experimental import pallas as pl
from jax.experimental.pallas import tpu as pltpu


# --------------------------------------------------------------------------
# Helpers
# --------------------------------------------------------------------------
def _full_spec(shape):
    """BlockSpec covering the whole (small) array as a single VMEM block."""
    return pl.BlockSpec(shape, lambda i: (0,) * len(shape))


_COMPILER_PARAMS = pltpu.CompilerParams(
    dimension_semantics=("arbitrary",),
    vmem_limit_bytes=48 * 1024 * 1024,   # leave headroom on v7x (64 MiB per TC)
)

_BN_EPS = 1e-5


def _bn(h, gamma=None, beta=None):
    """Train-mode BatchNorm1d over the (per-view) batch axis, f32 math."""
    mean = jnp.mean(h, axis=0, keepdims=True)
    var = jnp.mean(jnp.square(h - mean), axis=0, keepdims=True)
    h = (h - mean) * jax.lax.rsqrt(var + _BN_EPS)
    if gamma is not None:
        h = h * gamma + beta
    return h


def _l2norm(v):
    ss = jnp.maximum(jnp.sum(v * v, axis=1, keepdims=True), 1e-24)
    return v * jax.lax.rsqrt(ss)


def _encode(x_f32, w0_bf, w1_bf, g1, b1, w2_bf):
    """Stem(Linear) -> projector(Linear->BN->ReLU->Linear->BN(no affine))."""
    # TODO(synk): the real conv backbone is unspecified in builder.py; it is
    # modeled as a linear stem producing mlp_dim features.
    h = jnp.dot(x_f32.astype(jnp.bfloat16), w0_bf,
                preferred_element_type=jnp.float32)
    h = jnp.dot(h.astype(jnp.bfloat16), w1_bf, preferred_element_type=jnp.float32)
    h = jnp.maximum(_bn(h, g1, b1), 0.0)
    z = _bn(jnp.dot(h.astype(jnp.bfloat16), w2_bf,
                    preferred_element_type=jnp.float32))
    return z


# --------------------------------------------------------------------------
# q path: base encoder (+projector) + predictor, 2 views, one fused kernel
# --------------------------------------------------------------------------
def _q_kernel(x1_ref, x2_ref, w0_ref, w1_ref, g1_ref, b1_ref, w2_ref,
              wp1_ref, gp1_ref, bp1_ref, wp2_ref, q1_ref, q2_ref):
    bz = x1_ref.shape[0]
    mlp = g1_ref.shape[1]
    w0 = w0_ref[...]
    w1 = w1_ref[...]
    w2 = w2_ref[...]
    wp1 = wp1_ref[...]
    wp2 = wp2_ref[...]
    # Hoist the affine broadcasts out of the per-view loop (no broadcast CSE).
    g1 = jnp.broadcast_to(g1_ref[...], (bz, mlp))
    b1 = jnp.broadcast_to(b1_ref[...], (bz, mlp))
    gp1 = jnp.broadcast_to(gp1_ref[...], (bz, mlp))
    bp1 = jnp.broadcast_to(bp1_ref[...], (bz, mlp))
    for x_ref, o_ref in ((x1_ref, q1_ref), (x2_ref, q2_ref)):   # per-view BN
        z = _encode(x_ref[...], w0, w1, g1, b1, w2)
        p = jnp.dot(z.astype(jnp.bfloat16), wp1, preferred_element_type=jnp.float32)
        p = jnp.maximum(_bn(p, gp1, bp1), 0.0)
        q = jnp.dot(p.astype(jnp.bfloat16), wp2, preferred_element_type=jnp.float32)
        o_ref[...] = _l2norm(q)   # L2 norm fused; output lane-dense (bz, 128)


def base_and_predictor(q_w, x1_flat, x2m_flat):
    bz, feat = x1_flat.shape
    mlp = q_w["w1"].shape[1]
    out_w = q_w["w2"].shape[1]
    q_sd = jax.ShapeDtypeStruct((bz, out_w), jnp.float32)
    return pl.pallas_call(
        _q_kernel,
        out_shape=(q_sd, q_sd),
        grid=(1,),
        in_specs=[
            _full_spec((bz, feat)), _full_spec((bz, feat)),
            _full_spec((feat, mlp)), _full_spec((mlp, mlp)),
            _full_spec((1, mlp)), _full_spec((1, mlp)),
            _full_spec((mlp, out_w)),
            _full_spec((out_w, mlp)),
            _full_spec((1, mlp)), _full_spec((1, mlp)),
            _full_spec((mlp, out_w)),
        ],
        out_specs=(_full_spec((bz, out_w)), _full_spec((bz, out_w))),
        compiler_params=_COMPILER_PARAMS,
    )(x1_flat, x2m_flat, q_w["w0"], q_w["w1"], q_w["g1"], q_w["b1"], q_w["w2"],
      q_w["wp1"], q_w["gp1"], q_w["bp1"], q_w["wp2"])


# --------------------------------------------------------------------------
# k path: momentum EMA update (in place) + momentum encoder on 3 views,
#         one fused kernel
# --------------------------------------------------------------------------
def _make_k_kernel(m):
    m = float(m)
    one_m = 1.0 - m

    def kernel(x1_ref, x1m_ref, x2_ref,
               mw0_ref, mw1_ref, mg1_ref, mb1_ref, mw2_ref,
               bw0_ref, bw1_ref, bg1_ref, bb1_ref, bw2_ref,
               k1_ref, k1m_ref, k2_ref,
               nw0_ref, nw1_ref, ng1_ref, nb1_ref, nw2_ref):
        bz = x1_ref.shape[0]
        mlp = mg1_ref.shape[1]
        # ---- fused momentum EMA update (f32), written back in place ----
        w0 = mw0_ref[...] * m + bw0_ref[...] * one_m
        w1 = mw1_ref[...] * m + bw1_ref[...] * one_m
        g1 = mg1_ref[...] * m + bg1_ref[...] * one_m
        b1 = mb1_ref[...] * m + bb1_ref[...] * one_m
        w2 = mw2_ref[...] * m + bw2_ref[...] * one_m
        nw0_ref[...] = w0
        nw1_ref[...] = w1
        ng1_ref[...] = g1
        nb1_ref[...] = b1
        nw2_ref[...] = w2
        # ---- momentum-encoder forward with the freshly updated weights ----
        w0b = w0.astype(jnp.bfloat16)
        w1b = w1.astype(jnp.bfloat16)
        w2b = w2.astype(jnp.bfloat16)
        g1b = jnp.broadcast_to(g1, (bz, mlp))
        b1b = jnp.broadcast_to(b1, (bz, mlp))
        for x_ref, o_ref in ((x1_ref, k1_ref), (x1m_ref, k1m_ref), (x2_ref, k2_ref)):
            z = _encode(x_ref[...], w0b, w1b, g1b, b1b, w2b)
            o_ref[...] = _l2norm(z)   # L2 norm fused; lane-dense (bz, 128)

    return kernel


def momentum_forward_and_update(mom_p, base_p, x1f, x1mf, x2f, *, m):
    bz, feat = x1f.shape
    out_w = mom_p["w2"].shape[1]
    k_sd = jax.ShapeDtypeStruct((bz, out_w), jnp.float32)
    w_sd = lambda a: jax.ShapeDtypeStruct(a.shape, a.dtype)
    p_specs = [_full_spec(mom_p["w0"].shape), _full_spec(mom_p["w1"].shape),
               _full_spec(mom_p["g1"].shape), _full_spec(mom_p["b1"].shape),
               _full_spec(mom_p["w2"].shape)]
    res = pl.pallas_call(
        _make_k_kernel(m),
        out_shape=(k_sd, k_sd, k_sd,
                   w_sd(mom_p["w0"]), w_sd(mom_p["w1"]), w_sd(mom_p["g1"]),
                   w_sd(mom_p["b1"]), w_sd(mom_p["w2"])),
        grid=(1,),
        in_specs=[_full_spec((bz, feat))] * 3 + p_specs + p_specs,
        out_specs=(_full_spec((bz, out_w)),) * 3 + tuple(p_specs),
        # momentum params (inputs 3..7) are updated in place (aliased to
        # outputs 3..7) -> no second parameter slab and no extra HBM pass.
        input_output_aliases={3: 3, 4: 4, 5: 5, 6: 6, 7: 7},
        compiler_params=_COMPILER_PARAMS,
    )(x1f, x1mf, x2f,
      mom_p["w0"], mom_p["w1"], mom_p["g1"], mom_p["b1"], mom_p["w2"],
      base_p["w0"], base_p["w1"], base_p["g1"], base_p["b1"], base_p["w2"])
    k1, k1m, k2, nw0, nw1, ng1, nb1, nw2 = res
    new_mom = {"w0": nw0, "w1": nw1, "g1": ng1, "b1": nb1, "w2": nw2}
    return k1, k1m, k2, new_mom


# --------------------------------------------------------------------------
# Fused contrastive-loss kernel: all 5 CE terms + weighted reductions in ONE
# launch; output is a lane-dense (1,128) slab, lanes 0..2 = the three losses.
#   lane 0: mean CE(q1,  k2,  flip=F)                                (source)
#   lane 1: (mean(CE(q2m,k1 ,F)*lam) + mean(CE(q2m,k1 ,T)*(1-lam)))/2
#   lane 2: (mean(CE(q2m,k1m,F)/(1+c)) + mean(CE(q2m,k1m,T)*c/(1+c)))/2
# q / k arrive already L2-normalized from the encoder kernels.
# --------------------------------------------------------------------------
def _make_loss_kernel(T, n):
    inv_T = 1.0 / float(T)
    scale = 2.0 * float(T)
    inv_n = 1.0 / float(n)

    def kernel(q1_ref, q2_ref, k1_ref, k1m_ref, k2_ref, lam_ref, com_ref,
               loss_ref):
        q1 = q1_ref[...]
        q2 = q2_ref[...]
        k1 = k1_ref[...]
        k1m = k1m_ref[...]
        k2 = k2_ref[...]
        row = jax.lax.broadcasted_iota(jnp.int32, (n, n), 0)
        col = jax.lax.broadcasted_iota(jnp.int32, (n, n), 1)

        def ce(q, k, both_flips):
            # einsum('nc,mc->nm') / T  (pad columns are zero -> logits exact)
            logits = jax.lax.dot_general(
                q, k, (((1,), (1,)), ((), ())),
                preferred_element_type=jnp.float32) * inv_T
            mx = jnp.max(logits, axis=1, keepdims=True)
            lse = mx + jnp.log(jnp.sum(jnp.exp(logits - mx), axis=1, keepdims=True))
            p0 = jnp.sum(jnp.where(col == row, logits, 0.0), axis=1, keepdims=True)
            l0 = (lse - p0) * scale
            if not both_flips:
                return l0, None
            p1 = jnp.sum(jnp.where(col == (n - 1 - row), logits, 0.0),
                         axis=1, keepdims=True)
            return l0, (lse - p1) * scale

        lam = lam_ref[...]      # (n, 1)
        com = com_ref[...]      # (n, 1)

        l_src, _ = ce(q1, k2, False)
        l_a, l_b = ce(q2, k1, True)
        l_c, l_d = ce(q2, k1m, True)

        s0 = jnp.sum(l_src, axis=0, keepdims=True) * inv_n
        s1 = jnp.sum(l_a * lam + l_b * (1.0 - lam),
                     axis=0, keepdims=True) * (inv_n * 0.5)
        inv1c = 1.0 / (1.0 + com)
        s2 = jnp.sum(l_c * inv1c + l_d * (com * inv1c),
                     axis=0, keepdims=True) * (inv_n * 0.5)

        lane = jax.lax.broadcasted_iota(jnp.int32, (1, 128), 1)
        loss_ref[...] = jnp.where(lane == 0, s0,
                        jnp.where(lane == 1, s1,
                        jnp.where(lane == 2, s2, 0.0)))

    return kernel


def fused_contrastive_losses(q1, q2_mix, k1, k1_mix, k2, lam_col, common_col, T):
    n, d = q1.shape
    return pl.pallas_call(
        _make_loss_kernel(T, n),
        out_shape=jax.ShapeDtypeStruct((1, 128), jnp.float32),
        grid=(1,),
        in_specs=[_full_spec((n, d))] * 5 + [_full_spec((n, 1))] * 2,
        out_specs=_full_spec((1, 128)),
        compiler_params=_COMPILER_PARAMS,
    )(q1, q2_mix, k1, k1_mix, k2, lam_col, common_col)


# --------------------------------------------------------------------------
# datamixing (plain-JAX glue)
# --------------------------------------------------------------------------
def datamixing(x, lam, key):
    bz, _, H, W = x.shape
    if lam is None:
        lam = jax.random.beta(key, 1.0, 1.0, (bz, 1, 1, 1)).astype(jnp.float32)
    new_lams = lam * 0.8 + 0.1
    x_flip = jnp.flip(x, axis=0)
    half = bz // 2
    lam_h = lam[:half, 0, 0, 0]
    h_crop = jnp.floor(H * jnp.sqrt(jnp.maximum(1.0 - lam_h, 0.0)))
    w_crop = jnp.floor(W * jnp.sqrt(jnp.maximum(1.0 - lam_h, 0.0)))
    new_first = 1.0 - (h_crop * w_crop) / float(H * W)
    new_lams = new_lams.at[:half, 0, 0, 0].set(new_first)
    # TODO(synk): `mix.*_spectrum_*` (FFT amplitude/phase mixing) module is not
    # available; use pixel-space mixup of each sample with its batch-flip pair.
    mixed_first = (new_lams[:half] * x[:half]
                   + (1.0 - new_lams[:half]) * x_flip[:half])
    x_mixed = x.at[:half].set(mixed_first)
    return x_mixed, lam, new_lams


# --------------------------------------------------------------------------
# MoCo forward (world_size = 1, rank = 0)
# --------------------------------------------------------------------------
@functools.partial(jax.jit, static_argnames=("m", "T"), donate_argnames=("mom_p",))
def moco_forward(q_w, base_p, mom_p, x1, x2, key, *, m, T):
    bz = x1.shape[0]
    # concat_all_gather == identity with world_size 1; rank*bz slice == batch.
    x1_mix, lam, new_lam = datamixing(x1, None, key)
    # NOTE: matching builder.py, the lambdas used by the losses are the
    # `new_lam` returned by the SECOND datamixing call (x2).
    x2_mix, lam, new_lam = datamixing(x2, lam, key)

    flat = lambda t: t.reshape(t.shape[0], -1)

    # q path: base encoder + projector + predictor (2 views, 1 kernel).
    q1, q2_mix = base_and_predictor(q_w, flat(x1), flat(x2_mix))

    # k path: momentum EMA update fused with the momentum-encoder forward
    # (3 views, 1 kernel, params updated in place).
    k1, k1_mix, k2, new_mom_p = momentum_forward_and_update(
        mom_p, base_p, flat(x1), flat(x1_mix), flat(x2), m=m)

    lam_v = new_lam.reshape(bz, 1)                     # lam = new_lam; squeeze()
    lam_f = jnp.flip(lam_v, axis=0)
    common = jnp.minimum(lam_v, 1.0 - lam_f) + jnp.minimum(1.0 - lam_v, lam_f)

    losses = fused_contrastive_losses(q1, q2_mix, k1, k1_mix, k2,
                                      lam_v, common, T)
    source_loss = losses[0, 0]
    mixloss_source = losses[0, 1]   # already divided by 2 in-kernel
    mixloss_mix = losses[0, 2]      # already divided by 2 in-kernel
    return (source_loss, mixloss_source, mixloss_mix), new_mom_p


# --------------------------------------------------------------------------
# Deterministic parameter init (shapes implied by __init__ / _build_mlp)
# --------------------------------------------------------------------------
def init_params(key, feat_dim, mlp_dim, dim, out_w):
    ks = jax.random.split(key, 5)

    def lin(k, din, dout):
        return jax.random.normal(k, (din, dout), jnp.float32) / jnp.sqrt(float(din))

    # Final projection / prediction matrices are stored zero-padded to a
    # lane-dense width out_w = round_up(dim, 128).  The zero columns/rows are
    # exact no-ops through BN, L2-norm and the q@k^T logits, and they make the
    # q/k HBM outputs full-lane (unmasked) stores.
    w2 = jnp.pad(lin(ks[2], mlp_dim, dim), ((0, 0), (0, out_w - dim)))
    wp1 = jnp.pad(lin(ks[3], dim, mlp_dim), ((0, out_w - dim), (0, 0)))
    wp2 = jnp.pad(lin(ks[4], mlp_dim, dim), ((0, 0), (0, out_w - dim)))

    base = {
        "w0": lin(ks[0], feat_dim, mlp_dim),          # backbone stem
        "w1": lin(ks[1], mlp_dim, mlp_dim),           # projector layer 1 (bias=False)
        "g1": jnp.ones((1, mlp_dim), jnp.float32),    # BN gamma
        "b1": jnp.zeros((1, mlp_dim), jnp.float32),   # BN beta
        "w2": w2,                                     # projector layer 2 (+BN no affine)
    }
    # param_m.data.copy_(param_b.data)  (distinct buffers -> safe to donate)
    momentum = {k: jnp.array(v) for k, v in base.items()}
    pred = {
        "wp1": wp1,                                   # predictor layer 1
        "gp1": jnp.ones((1, mlp_dim), jnp.float32),
        "bp1": jnp.zeros((1, mlp_dim), jnp.float32),
        "wp2": wp2,                                   # predictor layer 2
    }
    return base, momentum, pred


def precast_q_weights(base_p, pred_p):
    """bf16 copies of the matmul weights used by the q path (cast once at init)."""
    bf = lambda a: a.astype(jnp.bfloat16)
    return {"w0": bf(base_p["w0"]), "w1": bf(base_p["w1"]), "w2": bf(base_p["w2"]),
            "g1": base_p["g1"], "b1": base_p["b1"],
            "wp1": bf(pred_p["wp1"]), "wp2": bf(pred_p["wp2"]),
            "gp1": pred_p["gp1"], "bp1": pred_p["bp1"]}


# --------------------------------------------------------------------------
if __name__ == "__main__":
    bz, C, H, W = 8, 4, 16, 16
    mlp_dim, dim = 128, 32
    out_w = ((dim + 127) // 128) * 128          # lane-dense q/k width
    T, m = 1.0, 0.99

    root = jax.random.PRNGKey(0)
    k_param, k_x1, k_x2, k_mix = jax.random.split(root, 4)

    base_p, mom_p, pred_p = init_params(k_param, C * H * W, mlp_dim, dim, out_w)
    q_w = precast_q_weights(base_p, pred_p)
    x1 = jax.random.normal(k_x1, (bz, C, H, W), jnp.float32)
    x2 = jax.random.normal(k_x2, (bz, C, H, W), jnp.float32)

    (source_loss, mixloss_source, mixloss_mix), mom_p = moco_forward(
        q_w, base_p, mom_p, x1, x2, k_mix, m=m, T=T)

    jax.block_until_ready((source_loss, mixloss_source, mixloss_mix, mom_p))
    print("KERNEL_OK")
</pallas_src>

<mosaic_0001>
module attributes {stable_mosaic.version = 11 : i64} {
  func.func @kernel(%arg0: i32, %arg1: memref<8x1024xf32, #tpu.memory_space<vmem>>, %arg2: memref<8x1024xf32, #tpu.memory_space<vmem>>, %arg3: memref<8x1024xf32, #tpu.memory_space<vmem>>, %arg4: memref<1024x128xf32, #tpu.memory_space<vmem>>, %arg5: memref<128x128xf32, #tpu.memory_space<vmem>>, %arg6: memref<1x128xf32, #tpu.memory_space<vmem>>, %arg7: memref<1x128xf32, #tpu.memory_space<vmem>>, %arg8: memref<128x128xf32, #tpu.memory_space<vmem>>, %arg9: memref<1024x128xf32, #tpu.memory_space<vmem>>, %arg10: memref<128x128xf32, #tpu.memory_space<vmem>>, %arg11: memref<1x128xf32, #tpu.memory_space<vmem>>, %arg12: memref<1x128xf32, #tpu.memory_space<vmem>>, %arg13: memref<128x128xf32, #tpu.memory_space<vmem>>, %arg14: memref<8x128xf32, #tpu.memory_space<vmem>>, %arg15: memref<8x128xf32, #tpu.memory_space<vmem>>, %arg16: memref<8x128xf32, #tpu.memory_space<vmem>>, %arg17: memref<1024x128xf32, #tpu.memory_space<vmem>>, %arg18: memref<128x128xf32, #tpu.memory_space<vmem>>, %arg19: memref<1x128xf32, #tpu.memory_space<vmem>>, %arg20: memref<1x128xf32, #tpu.memory_space<vmem>>, %arg21: memref<128x128xf32, #tpu.memory_space<vmem>>) attributes {dimension_semantics = [#tpu.dimension_semantics<arbitrary>], iteration_bounds = array<i64: 1>, scalar_prefetch = 0 : i64, scratch_operands = 0 : i64, tpu.core_type = #tpu.core_type<tc>, window_params = [{pipeline_mode = #tpu.pipeline_mode<synchronous>, transform_indices = @transform_0, window_bounds = array<i64: 8, 1024>}, {pipeline_mode = #tpu.pipeline_mode<synchronous>, transform_indices = @transform_1, window_bounds = array<i64: 8, 1024>}, {pipeline_mode = #tpu.pipeline_mode<synchronous>, transform_indices = @transform_2, window_bounds = array<i64: 8, 1024>}, {pipeline_mode = #tpu.pipeline_mode<synchronous>, transform_indices = @transform_3, window_bounds = array<i64: 1024, 128>}, {pipeline_mode = #tpu.pipeline_mode<synchronous>, transform_indices = @transform_4, window_bounds = array<i64: 128, 128>}, {pipeline_mode = #tpu.pipeline_mode<synchronous>, transform_indices = @transform_5, window_bounds = array<i64: 1, 128>}, {pipeline_mode = #tpu.pipeline_mode<synchronous>, transform_indices = @transform_6, window_bounds = array<i64: 1, 128>}, {pipeline_mode = #tpu.pipeline_mode<synchronous>, transform_indices = @transform_7, window_bounds = array<i64: 128, 128>}, {pipeline_mode = #tpu.pipeline_mode<synchronous>, transform_indices = @transform_8, window_bounds = array<i64: 1024, 128>}, {pipeline_mode = #tpu.pipeline_mode<synchronous>, transform_indices = @transform_9, window_bounds = array<i64: 128, 128>}, {pipeline_mode = #tpu.pipeline_mode<synchronous>, transform_indices = @transform_10, window_bounds = array<i64: 1, 128>}, {pipeline_mode = #tpu.pipeline_mode<synchronous>, transform_indices = @transform_11, window_bounds = array<i64: 1, 128>}, {pipeline_mode = #tpu.pipeline_mode<synchronous>, transform_indices = @transform_12, window_bounds = array<i64: 128, 128>}, {pipeline_mode = #tpu.pipeline_mode<synchronous>, transform_indices = @transform_13, window_bounds = array<i64: 8, 128>}, {pipeline_mode = #tpu.pipeline_mode<synchronous>, transform_indices = @transform_14, window_bounds = array<i64: 8, 128>}, {pipeline_mode = #tpu.pipeline_mode<synchronous>, transform_indices = @transform_15, window_bounds = array<i64: 8, 128>}, {pipeline_mode = #tpu.pipeline_mode<synchronous>, transform_indices = @transform_16, window_bounds = array<i64: 1024, 128>}, {pipeline_mode = #tpu.pipeline_mode<synchronous>, transform_indices = @transform_17, window_bounds = array<i64: 128, 128>}, {pipeline_mode = #tpu.pipeline_mode<synchronous>, transform_indices = @transform_18, window_bounds = array<i64: 1, 128>}, {pipeline_mode = #tpu.pipeline_mode<synchronous>, transform_indices = @transform_19, window_bounds = array<i64: 1, 128>}, {pipeline_mode = #tpu.pipeline_mode<synchronous>, transform_indices = @transform_20, window_bounds = array<i64: 128, 128>}]} {
    %c0 = arith.constant 0 : index
    %c0_0 = arith.constant 0 : index
    %0 = vector.load %arg4[%c0, %c0_0] : memref<1024x128xf32, #tpu.memory_space<vmem>>, vector<1024x128xf32>
    %cst = arith.constant 9.900000e-01 : f32
    %1 = vector.broadcast %cst : f32 to vector<1024x128xf32>
    %2 = arith.mulf %0, %1 : vector<1024x128xf32>
    %c0_1 = arith.constant 0 : index
    %c0_2 = arith.constant 0 : index
    %3 = vector.load %arg9[%c0_1, %c0_2] : memref<1024x128xf32, #tpu.memory_space<vmem>>, vector<1024x128xf32>
    %cst_3 = arith.constant 0.00999999977 : f32
    %4 = vector.broadcast %cst_3 : f32 to vector<1024x128xf32>
    %5 = arith.mulf %3, %4 : vector<1024x128xf32>
    %6 = arith.addf %2, %5 : vector<1024x128xf32>
    %c0_4 = arith.constant 0 : index
    %c0_5 = arith.constant 0 : index
    %7 = vector.load %arg5[%c0_4, %c0_5] : memref<128x128xf32, #tpu.memory_space<vmem>>, vector<128x128xf32>
    %cst_6 = arith.constant 9.900000e-01 : f32
    %8 = vector.broadcast %cst_6 : f32 to vector<128x128xf32>
    %9 = arith.mulf %7, %8 : vector<128x128xf32>
    %c0_7 = arith.constant 0 : index
    %c0_8 = arith.constant 0 : index
    %10 = vector.load %arg10[%c0_7, %c0_8] : memref<128x128xf32, #tpu.memory_space<vmem>>, vector<128x128xf32>
    %cst_9 = arith.constant 0.00999999977 : f32
    %11 = vector.broadcast %cst_9 : f32 to vector<128x128xf32>
    %12 = arith.mulf %10, %11 : vector<128x128xf32>
    %13 = arith.addf %9, %12 : vector<128x128xf32>
    %c0_10 = arith.constant 0 : index
    %c0_11 = arith.constant 0 : index
    %14 = vector.load %arg6[%c0_10, %c0_11] : memref<1x128xf32, #tpu.memory_space<vmem>>, vector<1x128xf32>
    %cst_12 = arith.constant 9.900000e-01 : f32
    %15 = vector.broadcast %cst_12 : f32 to vector<1x128xf32>
    %16 = arith.mulf %14, %15 : vector<1x128xf32>
    %c0_13 = arith.constant 0 : index
    %c0_14 = arith.constant 0 : index
    %17 = vector.load %arg11[%c0_13, %c0_14] : memref<1x128xf32, #tpu.memory_space<vmem>>, vector<1x128xf32>
    %cst_15 = arith.constant 0.00999999977 : f32
    %18 = vector.broadcast %cst_15 : f32 to vector<1x128xf32>
    %19 = arith.mulf %17, %18 : vector<1x128xf32>
    %20 = arith.addf %16, %19 : vector<1x128xf32>
    %c0_16 = arith.constant 0 : index
    %c0_17 = arith.constant 0 : index
    %21 = vector.load %arg7[%c0_16, %c0_17] : memref<1x128xf32, #tpu.memory_space<vmem>>, vector<1x128xf32>
    %cst_18 = arith.constant 9.900000e-01 : f32
    %22 = vector.broadcast %cst_18 : f32 to vector<1x128xf32>
    %23 = arith.mulf %21, %22 : vector<1x128xf32>
    %c0_19 = arith.constant 0 : index
    %c0_20 = arith.constant 0 : index
    %24 = vector.load %arg12[%c0_19, %c0_20] : memref<1x128xf32, #tpu.memory_space<vmem>>, vector<1x128xf32>
    %cst_21 = arith.constant 0.00999999977 : f32
    %25 = vector.broadcast %cst_21 : f32 to vector<1x128xf32>
    %26 = arith.mulf %24, %25 : vector<1x128xf32>
    %27 = arith.addf %23, %26 : vector<1x128xf32>
    %c0_22 = arith.constant 0 : index
    %c0_23 = arith.constant 0 : index
    %28 = vector.load %arg8[%c0_22, %c0_23] : memref<128x128xf32, #tpu.memory_space<vmem>>, vector<128x128xf32>
    %cst_24 = arith.constant 9.900000e-01 : f32
    %29 = vector.broadcast %cst_24 : f32 to vector<128x128xf32>
    %30 = arith.mulf %28, %29 : vector<128x128xf32>
    %c0_25 = arith.constant 0 : index
    %c0_26 = arith.constant 0 : index
    %31 = vector.load %arg13[%c0_25, %c0_26] : memref<128x128xf32, #tpu.memory_space<vmem>>, vector<128x128xf32>
    %cst_27 = arith.constant 0.00999999977 : f32
    %32 = vector.broadcast %cst_27 : f32 to vector<128x128xf32>
    %33 = arith.mulf %31, %32 : vector<128x128xf32>
    %34 = arith.addf %30, %33 : vector<128x128xf32>
    %c0_28 = arith.constant 0 : index
    %c0_29 = arith.constant 0 : index
    %35 = vector.load %arg17[%c0_28, %c0_29] : memref<1024x128xf32, #tpu.memory_space<vmem>>, vector<1024x128xf32>
    tpu.vector_store %arg17[%c0_28, %c0_29], %6 {strides = array<i32>} : memref<1024x128xf32, #tpu.memory_space<vmem>>, vector<1024x128xf32>,
    %c0_30 = arith.constant 0 : index
    %c0_31 = arith.constant 0 : index
    %36 = vector.load %arg18[%c0_30, %c0_31] : memref<128x128xf32, #tpu.memory_space<vmem>>, vector<128x128xf32>
    tpu.vector_store %arg18[%c0_30, %c0_31], %13 {strides = array<i32>} : memref<128x128xf32, #tpu.memory_space<vmem>>, vector<128x128xf32>,
    %c0_32 = arith.constant 0 : index
    %c0_33 = arith.constant 0 : index
    %37 = vector.load %arg19[%c0_32, %c0_33] : memref<1x128xf32, #tpu.memory_space<vmem>>, vector<1x128xf32>
    tpu.vector_store %arg19[%c0_32, %c0_33], %20 {strides = array<i32>} : memref<1x128xf32, #tpu.memory_space<vmem>>, vector<1x128xf32>,
    %c0_34 = arith.constant 0 : index
    %c0_35 = arith.constant 0 : index
    %38 = vector.load %arg20[%c0_34, %c0_35] : memref<1x128xf32, #tpu.memory_space<vmem>>, vector<1x128xf32>
    tpu.vector_store %arg20[%c0_34, %c0_35], %27 {strides = array<i32>} : memref<1x128xf32, #tpu.memory_space<vmem>>, vector<1x128xf32>,
    %c0_36 = arith.constant 0 : index
    %c0_37 = arith.constant 0 : index
    %39 = vector.load %arg21[%c0_36, %c0_37] : memref<128x128xf32, #tpu.memory_space<vmem>>, vector<128x128xf32>
    tpu.vector_store %arg21[%c0_36, %c0_37], %34 {strides = array<i32>} : memref<128x128xf32, #tpu.memory_space<vmem>>, vector<128x128xf32>,
    %40 = arith.truncf %6 : vector<1024x128xf32> to vector<1024x128xbf16>
    %41 = arith.truncf %13 : vector<128x128xf32> to vector<128x128xbf16>
    %42 = arith.truncf %34 : vector<128x128xf32> to vector<128x128xbf16>
    %43 = vector.shape_cast %20 : vector<1x128xf32> to vector<1x128xf32>
    %44 = vector.broadcast %43 : vector<1x128xf32> to vector<8x128xf32>
    %45 = vector.shape_cast %27 : vector<1x128xf32> to vector<1x128xf32>
    %46 = vector.broadcast %45 : vector<1x128xf32> to vector<8x128xf32>
    %c0_38 = arith.constant 0 : index
    %c0_39 = arith.constant 0 : index
    %47 = vector.load %arg1[%c0_38, %c0_39] : memref<8x1024xf32, #tpu.memory_space<vmem>>, vector<8x1024xf32>
    %48 = arith.truncf %47 : vector<8x1024xf32> to vector<8x1024xbf16>
    %cst_40 = arith.constant dense<0.000000e+00> : vector<8x128xf32>
    %49 = tpu.matmul %48, %40, %cst_40 {dimension_numbers = #tpu.dot_dimension_numbers<[1], [0], [0], [1], [0, 0, 1, 1], [], []>} : vector<8x1024xbf16>, vector<1024x128xbf16>, vector<8x128xf32> -> vector<8x128xf32>
    %50 = arith.truncf %49 : vector<8x128xf32> to vector<8x128xbf16>
    %cst_41 = arith.constant dense<0.000000e+00> : vector<8x128xf32>
    %51 = tpu.matmul %50, %41, %cst_41 {dimension_numbers = #tpu.dot_dimension_numbers<[1], [0], [0], [1], [0, 0, 1, 1], [], []>} : vector<8x128xbf16>, vector<128x128xbf16>, vector<8x128xf32> -> vector<8x128xf32>
    %cst_42 = arith.constant dense<0.000000e+00> : vector<128xf32>
    %52 = vector.multi_reduction <add>, %51, %cst_42 [0] : vector<8x128xf32> to vector<128xf32>
    %53 = vector.shape_cast %52 : vector<128xf32> to vector<1x128xf32>
    %cst_43 = arith.constant 8.000000e+00 : f32
    %54 = vector.broadcast %cst_43 : f32 to vector<1x128xf32>
    %55 = arith.divf %53, %54 : vector<1x128xf32>
    %56 = vector.broadcast %55 : vector<1x128xf32> to vector<8x128xf32>
    %57 = arith.subf %51, %56 : vector<8x128xf32>
    %58 = arith.mulf %57, %57 : vector<8x128xf32>
    %cst_44 = arith.constant dense<0.000000e+00> : vector<128xf32>
    %59 = vector.multi_reduction <add>, %58, %cst_44 [0] : vector<8x128xf32> to vector<128xf32>
    %60 = vector.shape_cast %59 : vector<128xf32> to vector<1x128xf32>
    %cst_45 = arith.constant 8.000000e+00 : f32
    %61 = vector.broadcast %cst_45 : f32 to vector<1x128xf32>
    %62 = arith.divf %60, %61 : vector<1x128xf32>
    %63 = vector.broadcast %55 : vector<1x128xf32> to vector<8x128xf32>
    %64 = arith.subf %51, %63 : vector<8x128xf32>
    %cst_46 = arith.constant 9.99999974E-6 : f32
    %65 = vector.broadcast %cst_46 : f32 to vector<1x128xf32>
    %66 = arith.addf %62, %65 : vector<1x128xf32>
    %67 = math.rsqrt %66 : vector<1x128xf32>
    %68 = vector.broadcast %67 : vector<1x128xf32> to vector<8x128xf32>
    %69 = arith.mulf %64, %68 : vector<8x128xf32>
    %70 = arith.mulf %69, %44 : vector<8x128xf32>
    %71 = arith.addf %70, %46 : vector<8x128xf32>
    %cst_47 = arith.constant 0.000000e+00 : f32
    %72 = vector.broadcast %cst_47 : f32 to vector<8x128xf32>
    %73 = arith.maximumf %71, %72 : vector<8x128xf32>
    %74 = arith.truncf %73 : vector<8x128xf32> to vector<8x128xbf16>
    %cst_48 = arith.constant dense<0.000000e+00> : vector<8x128xf32>
    %75 = tpu.matmul %74, %42, %cst_48 {dimension_numbers = #tpu.dot_dimension_numbers<[1], [0], [0], [1], [0, 0, 1, 1], [], []>} : vector<8x128xbf16>, vector<128x128xbf16>, vector<8x128xf32> -> vector<8x128xf32>
    %cst_49 = arith.constant dense<0.000000e+00> : vector<128xf32>
    %76 = vector.multi_reduction <add>, %75, %cst_49 [0] : vector<8x128xf32> to vector<128xf32>
    %77 = vector.shape_cast %76 : vector<128xf32> to vector<1x128xf32>
    %cst_50 = arith.constant 8.000000e+00 : f32
    %78 = vector.broadcast %cst_50 : f32 to vector<1x128xf32>
    %79 = arith.divf %77, %78 : vector<1x128xf32>
    %80 = vector.broadcast %79 : vector<1x128xf32> to vector<8x128xf32>
    %81 = arith.subf %75, %80 : vector<8x128xf32>
    %82 = arith.mulf %81, %81 : vector<8x128xf32>
    %cst_51 = arith.constant dense<0.000000e+00> : vector<128xf32>
    %83 = vector.multi_reduction <add>, %82, %cst_51 [0] : vector<8x128xf32> to vector<128xf32>
    %84 = vector.shape_cast %83 : vector<128xf32> to vector<1x128xf32>
    %cst_52 = arith.constant 8.000000e+00 : f32
    %85 = vector.broadcast %cst_52 : f32 to vector<1x128xf32>
    %86 = arith.divf %84, %85 : vector<1x128xf32>
    %87 = vector.broadcast %79 : vector<1x128xf32> to vector<8x128xf32>
    %88 = arith.subf %75, %87 : vector<8x128xf32>
    %cst_53 = arith.constant 9.99999974E-6 : f32
    %89 = vector.broadcast %cst_53 : f32 to vector<1x128xf32>
    %90 = arith.addf %86, %89 : vector<1x128xf32>
    %91 = math.rsqrt %90 : vector<1x128xf32>
    %92 = vector.broadcast %91 : vector<1x128xf32> to vector<8x128xf32>
    %93 = arith.mulf %88, %92 : vector<8x128xf32>
    %94 = arith.mulf %93, %93 : vector<8x128xf32>
    %cst_54 = arith.constant dense<0.000000e+00> : vector<8xf32>
    %95 = vector.multi_reduction <add>, %94, %cst_54 [1] : vector<8x128xf32> to vector<8xf32>
    %96 = vector.shape_cast %95 : vector<8xf32> to vector<8x1xf32>
    %cst_55 = arith.constant 1.000000e-24 : f32
    %97 = vector.broadcast %cst_55 : f32 to vector<8x1xf32>
    %98 = arith.maximumf %96, %97 : vector<8x1xf32>
    %99 = math.rsqrt %98 : vector<8x1xf32>
    %100 = vector.broadcast %99 : vector<8x1xf32> to vector<8x128xf32>
    %101 = arith.mulf %93, %100 : vector<8x128xf32>
    %c0_56 = arith.constant 0 : index
    %c0_57 = arith.constant 0 : index
    %102 = vector.load %arg14[%c0_56, %c0_57] : memref<8x128xf32, #tpu.memory_space<vmem>>, vector<8x128xf32>
    tpu.vector_store %arg14[%c0_56, %c0_57], %101 {strides = array<i32>} : memref<8x128xf32, #tpu.memory_space<vmem>>, vector<8x128xf32>,
    %c0_58 = arith.constant 0 : index
    %c0_59 = arith.constant 0 : index
    %103 = vector.load %arg2[%c0_58, %c0_59] : memref<8x1024xf32, #tpu.memory_space<vmem>>, vector<8x1024xf32>
    %104 = arith.truncf %103 : vector<8x1024xf32> to vector<8x1024xbf16>
    %cst_60 = arith.constant dense<0.000000e+00> : vector<8x128xf32>
    %105 = tpu.matmul %104, %40, %cst_60 {dimension_numbers = #tpu.dot_dimension_numbers<[1], [0], [0], [1], [0, 0, 1, 1], [], []>} : vector<8x1024xbf16>, vector<1024x128xbf16>, vector<8x128xf32> -> vector<8x128xf32>
    %106 = arith.truncf %105 : vector<8x128xf32> to vector<8x128xbf16>
    %cst_61 = arith.constant dense<0.000000e+00> : vector<8x128xf32>
    %107 = tpu.matmul %106, %41, %cst_61 {dimension_numbers = #tpu.dot_dimension_numbers<[1], [0], [0], [1], [0, 0, 1, 1], [], []>} : vector<8x128xbf16>, vector<128x128xbf16>, vector<8x128xf32> -> vector<8x128xf32>
    %cst_62 = arith.constant dense<0.000000e+00> : vector<128xf32>
    %108 = vector.multi_reduction <add>, %107, %cst_62 [0] : vector<8x128xf32> to vector<128xf32>
    %109 = vector.shape_cast %108 : vector<128xf32> to vector<1x128xf32>
    %cst_63 = arith.constant 8.000000e+00 : f32
    %110 = vector.broadcast %cst_63 : f32 to vector<1x128xf32>
    %111 = arith.divf %109, %110 : vector<1x128xf32>
    %112 = vector.broadcast %111 : vector<1x128xf32> to vector<8x128xf32>
    %113 = arith.subf %107, %112 : vector<8x128xf32>
    %114 = arith.mulf %113, %113 : vector<8x128xf32>
    %cst_64 = arith.constant dense<0.000000e+00> : vector<128xf32>
    %115 = vector.multi_reduction <add>, %114, %cst_64 [0] : vector<8x128xf32> to vector<128xf32>
    %116 = vector.shape_cast %115 : vector<128xf32> to vector<1x128xf32>
    %cst_65 = arith.constant 8.000000e+00 : f32
    %117 = vector.broadcast %cst_65 : f32 to vector<1x128xf32>
    %118 = arith.divf %116, %117 : vector<1x128xf32>
    %119 = vector.broadcast %111 : vector<1x128xf32> to vector<8x128xf32>
    %120 = arith.subf %107, %119 : vector<8x128xf32>
    %cst_66 = arith.constant 9.99999974E-6 : f32
    %121 = vector.broadcast %cst_66 : f32 to vector<1x128xf32>
    %122 = arith.addf %118, %121 : vector<1x128xf32>
    %123 = math.rsqrt %122 : vector<1x128xf32>
    %124 = vector.broadcast %123 : vector<1x128xf32> to vector<8x128xf32>
    %125 = arith.mulf %120, %124 : vector<8x128xf32>
    %126 = arith.mulf %125, %44 : vector<8x128xf32>
    %127 = arith.addf %126, %46 : vector<8x128xf32>
    %cst_67 = arith.constant 0.000000e+00 : f32
    %128 = vector.broadcast %cst_67 : f32 to vector<8x128xf32>
    %129 = arith.maximumf %127, %128 : vector<8x128xf32>
    %130 = arith.truncf %129 : vector<8x128xf32> to vector<8x128xbf16>
    %cst_68 = arith.constant dense<0.000000e+00> : vector<8x128xf32>
    %131 = tpu.matmul %130, %42, %cst_68 {dimension_numbers = #tpu.dot_dimension_numbers<[1], [0], [0], [1], [0, 0, 1, 1], [], []>} : vector<8x128xbf16>, vector<128x128xbf16>, vector<8x128xf32> -> vector<8x128xf32>
    %cst_69 = arith.constant dense<0.000000e+00> : vector<128xf32>
    %132 = vector.multi_reduction <add>, %131, %cst_69 [0] : vector<8x128xf32> to vector<128xf32>
    %133 = vector.shape_cast %132 : vector<128xf32> to vector<1x128xf32>
    %cst_70 = arith.constant 8.000000e+00 : f32
    %134 = vector.broadcast %cst_70 : f32 to vector<1x128xf32>
    %135 = arith.divf %133, %134 : vector<1x128xf32>
    %136 = vector.broadcast %135 : vector<1x128xf32> to vector<8x128xf32>
    %137 = arith.subf %131, %136 : vector<8x128xf32>
    %138 = arith.mulf %137, %137 : vector<8x128xf32>
    %cst_71 = arith.constant dense<0.000000e+00> : vector<128xf32>
    %139 = vector.multi_reduction <add>, %138, %cst_71 [0] : vector<8x128xf32> to vector<128xf32>
    %140 = vector.shape_cast %139 : vector<128xf32> to vector<1x128xf32>
    %cst_72 = arith.constant 8.000000e+00 : f32
    %141 = vector.broadcast %cst_72 : f32 to vector<1x128xf32>
    %142 = arith.divf %140, %141 : vector<1x128xf32>
    %143 = vector.broadcast %135 : vector<1x128xf32> to vector<8x128xf32>
    %144 = arith.subf %131, %143 : vector<8x128xf32>
    %cst_73 = arith.constant 9.99999974E-6 : f32
    %145 = vector.broadcast %cst_73 : f32 to vector<1x128xf32>
    %146 = arith.addf %142, %145 : vector<1x128xf32>
    %147 = math.rsqrt %146 : vector<1x128xf32>
    %148 = vector.broadcast %147 : vector<1x128xf32> to vector<8x128xf32>
    %149 = arith.mulf %144, %148 : vector<8x128xf32>
    %150 = arith.mulf %149, %149 : vector<8x128xf32>
    %cst_74 = arith.constant dense<0.000000e+00> : vector<8xf32>
    %151 = vector.multi_reduction <add>, %150, %cst_74 [1] : vector<8x128xf32> to vector<8xf32>
    %152 = vector.shape_cast %151 : vector<8xf32> to vector<8x1xf32>
    %cst_75 = arith.constant 1.000000e-24 : f32
    %153 = vector.broadcast %cst_75 : f32 to vector<8x1xf32>
    %154 = arith.maximumf %152, %153 : vector<8x1xf32>
    %155 = math.rsqrt %154 : vector<8x1xf32>
    %156 = vector.broadcast %155 : vector<8x1xf32> to vector<8x128xf32>
    %157 = arith.mulf %149, %156 : vector<8x128xf32>
    %c0_76 = arith.constant 0 : index
    %c0_77 = arith.constant 0 : index
    %158 = vector.load %arg15[%c0_76, %c0_77] : memref<8x128xf32, #tpu.memory_space<vmem>>, vector<8x128xf32>
    tpu.vector_store %arg15[%c0_76, %c0_77], %157 {strides = array<i32>} : memref<8x128xf32, #tpu.memory_space<vmem>>, vector<8x128xf32>,
    %c0_78 = arith.constant 0 : index
    %c0_79 = arith.constant 0 : index
    %159 = vector.load %arg3[%c0_78, %c0_79] : memref<8x1024xf32, #tpu.memory_space<vmem>>, vector<8x1024xf32>
    %160 = arith.truncf %159 : vector<8x1024xf32> to vector<8x1024xbf16>
    %cst_80 = arith.constant dense<0.000000e+00> : vector<8x128xf32>
    %161 = tpu.matmul %160, %40, %cst_80 {dimension_numbers = #tpu.dot_dimension_numbers<[1], [0], [0], [1], [0, 0, 1, 1], [], []>} : vector<8x1024xbf16>, vector<1024x128xbf16>, vector<8x128xf32> -> vector<8x128xf32>
    %162 = arith.truncf %161 : vector<8x128xf32> to vector<8x128xbf16>
    %cst_81 = arith.constant dense<0.000000e+00> : vector<8x128xf32>
    %163 = tpu.matmul %162, %41, %cst_81 {dimension_numbers = #tpu.dot_dimension_numbers<[1], [0], [0], [1], [0, 0, 1, 1], [], []>} : vector<8x128xbf16>, vector<128x128xbf16>, vector<8x128xf32> -> vector<8x128xf32>
    %cst_82 = arith.constant dense<0.000000e+00> : vector<128xf32>
    %164 = vector.multi_reduction <add>, %163, %cst_82 [0] : vector<8x128xf32> to vector<128xf32>
    %165 = vector.shape_cast %164 : vector<128xf32> to vector<1x128xf32>
    %cst_83 = arith.constant 8.000000e+00 : f32
    %166 = vector.broadcast %cst_83 : f32 to vector<1x128xf32>
    %167 = arith.divf %165, %166 : vector<1x128xf32>
    %168 = vector.broadcast %167 : vector<1x128xf32> to vector<8x128xf32>
    %169 = arith.subf %163, %168 : vector<8x128xf32>
    %170 = arith.mulf %169, %169 : vector<8x128xf32>
    %cst_84 = arith.constant dense<0.000000e+00> : vector<128xf32>
    %171 = vector.multi_reduction <add>, %170, %cst_84 [0] : vector<8x128xf32> to vector<128xf32>
    %172 = vector.shape_cast %171 : vector<128xf32> to vector<1x128xf32>
    %cst_85 = arith.constant 8.000000e+00 : f32
    %173 = vector.broadcast %cst_85 : f32 to vector<1x128xf32>
    %174 = arith.divf %172, %173 : vector<1x128xf32>
    %175 = vector.broadcast %167 : vector<1x128xf32> to vector<8x128xf32>
    %176 = arith.subf %163, %175 : vector<8x128xf32>
    %cst_86 = arith.constant 9.99999974E-6 : f32
    %177 = vector.broadcast %cst_86 : f32 to vector<1x128xf32>
    %178 = arith.addf %174, %177 : vector<1x128xf32>
    %179 = math.rsqrt %178 : vector<1x128xf32>
    %180 = vector.broadcast %179 : vector<1x128xf32> to vector<8x128xf32>
    %181 = arith.mulf %176, %180 : vector<8x128xf32>
    %182 = arith.mulf %181, %44 : vector<8x128xf32>
    %183 = arith.addf %182, %46 : vector<8x128xf32>
    %cst_87 = arith.constant 0.000000e+00 : f32
    %184 = vector.broadcast %cst_87 : f32 to vector<8x128xf32>
    %185 = arith.maximumf %183, %184 : vector<8x128xf32>
    %186 = arith.truncf %185 : vector<8x128xf32> to vector<8x128xbf16>
    %cst_88 = arith.constant dense<0.000000e+00> : vector<8x128xf32>
    %187 = tpu.matmul %186, %42, %cst_88 {dimension_numbers = #tpu.dot_dimension_numbers<[1], [0], [0], [1], [0, 0, 1, 1], [], []>} : vector<8x128xbf16>, vector<128x128xbf16>, vector<8x128xf32> -> vector<8x128xf32>
    %cst_89 = arith.constant dense<0.000000e+00> : vector<128xf32>
    %188 = vector.multi_reduction <add>, %187, %cst_89 [0] : vector<8x128xf32> to vector<128xf32>
    %189 = vector.shape_cast %188 : vector<128xf32> to vector<1x128xf32>
    %cst_90 = arith.constant 8.000000e+00 : f32
    %190 = vector.broadcast %cst_90 : f32 to vector<1x128xf32>
    %191 = arith.divf %189, %190 : vector<1x128xf32>
    %192 = vector.broadcast %191 : vector<1x128xf32> to vector<8x128xf32>
    %193 = arith.subf %187, %192 : vector<8x128xf32>
    %194 = arith.mulf %193, %193 : vector<8x128xf32>
    %cst_91 = arith.constant dense<0.000000e+00> : vector<128xf32>
    %195 = vector.multi_reduction <add>, %194, %cst_91 [0] : vector<8x128xf32> to vector<128xf32>
    %196 = vector.shape_cast %195 : vector<128xf32> to vector<1x128xf32>
    %cst_92 = arith.constant 8.000000e+00 : f32
    %197 = vector.broadcast %cst_92 : f32 to vector<1x128xf32>
    %198 = arith.divf %196, %197 : vector<1x128xf32>
    %199 = vector.broadcast %191 : vector<1x128xf32> to vector<8x128xf32>
    %200 = arith.subf %187, %199 : vector<8x128xf32>
    %cst_93 = arith.constant 9.99999974E-6 : f32
    %201 = vector.broadcast %cst_93 : f32 to vector<1x128xf32>
    %202 = arith.addf %198, %201 : vector<1x128xf32>
    %203 = math.rsqrt %202 : vector<1x128xf32>
    %204 = vector.broadcast %203 : vector<1x128xf32> to vector<8x128xf32>
    %205 = arith.mulf %200, %204 : vector<8x128xf32>
    %206 = arith.mulf %205, %205 : vector<8x128xf32>
    %cst_94 = arith.constant dense<0.000000e+00> : vector<8xf32>
    %207 = vector.multi_reduction <add>, %206, %cst_94 [1] : vector<8x128xf32> to vector<8xf32>
    %208 = vector.shape_cast %207 : vector<8xf32> to vector<8x1xf32>
    %cst_95 = arith.constant 1.000000e-24 : f32
    %209 = vector.broadcast %cst_95 : f32 to vector<8x1xf32>
    %210 = arith.maximumf %208, %209 : vector<8x1xf32>
    %211 = math.rsqrt %210 : vector<8x1xf32>
    %212 = vector.broadcast %211 : vector<8x1xf32> to vector<8x128xf32>
    %213 = arith.mulf %205, %212 : vector<8x128xf32>
    %c0_96 = arith.constant 0 : index
    %c0_97 = arith.constant 0 : index
    %214 = vector.load %arg16[%c0_96, %c0_97] : memref<8x128xf32, #tpu.memory_space<vmem>>, vector<8x128xf32>
    tpu.vector_store %arg16[%c0_96, %c0_97], %213 {strides = array<i32>} : memref<8x128xf32, #tpu.memory_space<vmem>>, vector<8x128xf32>,
    return
  }
  func.func @transform_0(%arg0: i32) -> (i32, i32) {
    %c0_i32 = arith.constant 0 : i32
    %c0_i32_0 = arith.constant 0 : i32
    %c0_i32_1 = arith.constant 0 : i32
    return %c0_i32, %c0_i32_0 : i32, i32
  }
  func.func @transform_1(%arg0: i32) -> (i32, i32) {
    %c0_i32 = arith.constant 0 : i32
    %c0_i32_0 = arith.constant 0 : i32
    %c0_i32_1 = arith.constant 0 : i32
    return %c0_i32, %c0_i32_0 : i32, i32
  }
  func.func @transform_2(%arg0: i32) -> (i32, i32) {
    %c0_i32 = arith.constant 0 : i32
    %c0_i32_0 = arith.constant 0 : i32
    %c0_i32_1 = arith.constant 0 : i32
    return %c0_i32, %c0_i32_0 : i32, i32
  }
  func.func @transform_3(%arg0: i32) -> (i32, i32) {
    %c0_i32 = arith.constant 0 : i32
    %c0_i32_0 = arith.constant 0 : i32
    %c0_i32_1 = arith.constant 0 : i32
    return %c0_i32, %c0_i32_0 : i32, i32
  }
  func.func @transform_4(%arg0: i32) -> (i32, i32) {
    %c0_i32 = arith.constant 0 : i32
    %c0_i32_0 = arith.constant 0 : i32
    %c0_i32_1 = arith.constant 0 : i32
    return %c0_i32, %c0_i32_0 : i32, i32
  }
  func.func @transform_5(%arg0: i32) -> (i32, i32) {
    %c0_i32 = arith.constant 0 : i32
    %c0_i32_0 = arith.constant 0 : i32
    %c0_i32_1 = arith.constant 0 : i32
    return %c0_i32, %c0_i32_0 : i32, i32
  }
  func.func @transform_6(%arg0: i32) -> (i32, i32) {
    %c0_i32 = arith.constant 0 : i32
    %c0_i32_0 = arith.constant 0 : i32
    %c0_i32_1 = arith.constant 0 : i32
    return %c0_i32, %c0_i32_0 : i32, i32
  }
  func.func @transform_7(%arg0: i32) -> (i32, i32) {
    %c0_i32 = arith.constant 0 : i32
    %c0_i32_0 = arith.constant 0 : i32
    %c0_i32_1 = arith.constant 0 : i32
    return %c0_i32, %c0_i32_0 : i32, i32
  }
  func.func @transform_8(%arg0: i32) -> (i32, i32) {
    %c0_i32 = arith.constant 0 : i32
    %c0_i32_0 = arith.constant 0 : i32
    %c0_i32_1 = arith.constant 0 : i32
    return %c0_i32, %c0_i32_0 : i32, i32
  }
  func.func @transform_9(%arg0: i32) -> (i32, i32) {
    %c0_i32 = arith.constant 0 : i32
    %c0_i32_0 = arith.constant 0 : i32
    %c0_i32_1 = arith.constant 0 : i32
    return %c0_i32, %c0_i32_0 : i32, i32
  }
  func.func @transform_10(%arg0: i32) -> (i32, i32) {
    %c0_i32 = arith.constant 0 : i32
    %c0_i32_0 = arith.constant 0 : i32
    %c0_i32_1 = arith.constant 0 : i32
    return %c0_i32, %c0_i32_0 : i32, i32
  }
  func.func @transform_11(%arg0: i32) -> (i32, i32) {
    %c0_i32 = arith.constant 0 : i32
    %c0_i32_0 = arith.constant 0 : i32
    %c0_i32_1 = arith.constant 0 : i32
    return %c0_i32, %c0_i32_0 : i32, i32
  }
  func.func @transform_12(%arg0: i32) -> (i32, i32) {
    %c0_i32 = arith.constant 0 : i32
    %c0_i32_0 = arith.constant 0 : i32
    %c0_i32_1 = arith.constant 0 : i32
    return %c0_i32, %c0_i32_0 : i32, i32
  }
  func.func @transform_13(%arg0: i32) -> (i32, i32) {
    %c0_i32 = arith.constant 0 : i32
    %c0_i32_0 = arith.constant 0 : i32
    %c0_i32_1 = arith.constant 0 : i32
    return %c0_i32, %c0_i32_0 : i32, i32
  }
  func.func @transform_14(%arg0: i32) -> (i32, i32) {
    %c0_i32 = arith.constant 0 : i32
    %c0_i32_0 = arith.constant 0 : i32
    %c0_i32_1 = arith.constant 0 : i32
    return %c0_i32, %c0_i32_0 : i32, i32
  }
  func.func @transform_15(%arg0: i32) -> (i32, i32) {
    %c0_i32 = arith.constant 0 : i32
    %c0_i32_0 = arith.constant 0 : i32
    %c0_i32_1 = arith.constant 0 : i32
    return %c0_i32, %c0_i32_0 : i32, i32
  }
  func.func @transform_16(%arg0: i32) -> (i32, i32) {
    %c0_i32 = arith.constant 0 : i32
    %c0_i32_0 = arith.constant 0 : i32
    %c0_i32_1 = arith.constant 0 : i32
    return %c0_i32, %c0_i32_0 : i32, i32
  }
  func.func @transform_17(%arg0: i32) -> (i32, i32) {
    %c0_i32 = arith.constant 0 : i32
    %c0_i32_0 = arith.constant 0 : i32
    %c0_i32_1 = arith.constant 0 : i32
    return %c0_i32, %c0_i32_0 : i32, i32
  }
  func.func @transform_18(%arg0: i32) -> (i32, i32) {
    %c0_i32 = arith.constant 0 : i32
    %c0_i32_0 = arith.constant 0 : i32
    %c0_i32_1 = arith.constant 0 : i32
    return %c0_i32, %c0_i32_0 : i32, i32
  }
  func.func @transform_19(%arg0: i32) -> (i32, i32) {
    %c0_i32 = arith.constant 0 : i32
    %c0_i32_0 = arith.constant 0 : i32
    %c0_i32_1 = arith.constant 0 : i32
    return %c0_i32, %c0_i32_0 : i32, i32
  }
  func.func @transform_20(%arg0: i32) -> (i32, i32) {
    %c0_i32 = arith.constant 0 : i32
    %c0_i32_0 = arith.constant 0 : i32
    %c0_i32_1 = arith.constant 0 : i32
    return %c0_i32, %c0_i32_0 : i32, i32
  }
}

module attributes {stable_mosaic.version = 11 : i64} {
  func.func @kernel(%arg0: i32, %arg1: memref<8x128xf32, #tpu.memory_space<vmem>>, %arg2: memref<8x128xf32, #tpu.memory_space<vmem>>, %arg3: memref<8x128xf32, #tpu.memory_space<vmem>>, %arg4: memref<8x128xf32, #tpu.memory_space<vmem>>, %arg5: memref<8x128xf32, #tpu.memory_space<vmem>>, %arg6: memref<8x1xf32, #tpu.memory_space<vmem>>, %arg7: memref<8x1xf32, #tpu.memory_space<vmem>>, %arg8: memref<1x128xf32, #tpu.memory_space<vmem>>) attributes {dimension_semantics = [#tpu.dimension_semantics<arbitrary>], iteration_bounds = array<i64: 1>, scalar_prefetch = 0 : i64, scratch_operands = 0 : i64, tpu.core_type = #tpu.core_type<tc>, window_params = [{pipeline_mode = #tpu.pipeline_mode<synchronous>, transform_indices = @transform_0, window_bounds = array<i64: 8, 128>}, {pipeline_mode = #tpu.pipeline_mode<synchronous>, transform_indices = @transform_1, window_bounds = array<i64: 8, 128>}, {pipeline_mode = #tpu.pipeline_mode<synchronous>, transform_indices = @transform_2, window_bounds = array<i64: 8, 128>}, {pipeline_mode = #tpu.pipeline_mode<synchronous>, transform_indices = @transform_3, window_bounds = array<i64: 8, 128>}, {pipeline_mode = #tpu.pipeline_mode<synchronous>, transform_indices = @transform_4, window_bounds = array<i64: 8, 128>}, {pipeline_mode = #tpu.pipeline_mode<synchronous>, transform_indices = @transform_5, window_bounds = array<i64: 8, 1>}, {pipeline_mode = #tpu.pipeline_mode<synchronous>, transform_indices = @transform_6, window_bounds = array<i64: 8, 1>}, {pipeline_mode = #tpu.pipeline_mode<synchronous>, transform_indices = @transform_7, window_bounds = array<i64: 1, 128>}]} {
    %c0 = arith.constant 0 : index
    %c0_0 = arith.constant 0 : index
    %0 = vector.load %arg1[%c0, %c0_0] : memref<8x128xf32, #tpu.memory_space<vmem>>, vector<8x128xf32>
    %c0_1 = arith.constant 0 : index
    %c0_2 = arith.constant 0 : index
    %1 = vector.load %arg2[%c0_1, %c0_2] : memref<8x128xf32, #tpu.memory_space<vmem>>, vector<8x128xf32>
    %c0_3 = arith.constant 0 : index
    %c0_4 = arith.constant 0 : index
    %2 = vector.load %arg3[%c0_3, %c0_4] : memref<8x128xf32, #tpu.memory_space<vmem>>, vector<8x128xf32>
    %c0_5 = arith.constant 0 : index
    %c0_6 = arith.constant 0 : index
    %3 = vector.load %arg4[%c0_5, %c0_6] : memref<8x128xf32, #tpu.memory_space<vmem>>, vector<8x128xf32>
    %c0_7 = arith.constant 0 : index
    %c0_8 = arith.constant 0 : index
    %4 = vector.load %arg5[%c0_7, %c0_8] : memref<8x128xf32, #tpu.memory_space<vmem>>, vector<8x128xf32>
    %5 = tpu.iota {dimensions = array<i32: 0>} : vector<8x8xi32>
    %6 = tpu.iota {dimensions = array<i32: 1>} : vector<8x8xi32>
    %c0_9 = arith.constant 0 : index
    %c0_10 = arith.constant 0 : index
    %7 = vector.load %arg6[%c0_9, %c0_10] : memref<8x1xf32, #tpu.memory_space<vmem>>, vector<8x1xf32>
    %c0_11 = arith.constant 0 : index
    %c0_12 = arith.constant 0 : index
    %8 = vector.load %arg7[%c0_11, %c0_12] : memref<8x1xf32, #tpu.memory_space<vmem>>, vector<8x1xf32>
    %cst = arith.constant dense<0.000000e+00> : vector<8x8xf32>
    %9 = tpu.matmul %0, %4, %cst {dimension_numbers = #tpu.dot_dimension_numbers<[1], [1], [0], [0], [0, 0, 1, 0], [], []>} : vector<8x128xf32>, vector<8x128xf32>, vector<8x8xf32> -> vector<8x8xf32>
    %cst_13 = arith.constant 1.000000e+00 : f32
    %10 = vector.broadcast %cst_13 : f32 to vector<8x8xf32>
    %11 = arith.mulf %9, %10 : vector<8x8xf32>
    %cst_14 = arith.constant dense<0xFF800000> : vector<8xf32>
    %12 = vector.multi_reduction <maximumf>, %11, %cst_14 [1] : vector<8x8xf32> to vector<8xf32>
    %13 = vector.shape_cast %12 : vector<8xf32> to vector<8x1xf32>
    %14 = vector.broadcast %13 : vector<8x1xf32> to vector<8x8xf32>
    %15 = arith.subf %11, %14 : vector<8x8xf32>
    %16 = math.exp %15 : vector<8x8xf32>
    %cst_15 = arith.constant dense<0.000000e+00> : vector<8xf32>
    %17 = vector.multi_reduction <add>, %16, %cst_15 [1] : vector<8x8xf32> to vector<8xf32>
    %18 = vector.shape_cast %17 : vector<8xf32> to vector<8x1xf32>
    %19 = math.log %18 : vector<8x1xf32>
    %20 = arith.addf %13, %19 : vector<8x1xf32>
    %21 = arith.cmpi eq, %6, %5 : vector<8x8xi32>
    %cst_16 = arith.constant 0.000000e+00 : f32
    %22 = vector.broadcast %cst_16 : f32 to vector<8x8xf32>
    %23 = arith.select %21, %11, %22 : vector<8x8xi1>, vector<8x8xf32>
    %cst_17 = arith.constant dense<0.000000e+00> : vector<8xf32>
    %24 = vector.multi_reduction <add>, %23, %cst_17 [1] : vector<8x8xf32> to vector<8xf32>
    %25 = vector.shape_cast %24 : vector<8xf32> to vector<8x1xf32>
    %26 = arith.subf %20, %25 : vector<8x1xf32>
    %cst_18 = arith.constant 2.000000e+00 : f32
    %27 = vector.broadcast %cst_18 : f32 to vector<8x1xf32>
    %28 = arith.mulf %26, %27 : vector<8x1xf32>
    %cst_19 = arith.constant dense<0.000000e+00> : vector<8x8xf32>
    %29 = tpu.matmul %1, %2, %cst_19 {dimension_numbers = #tpu.dot_dimension_numbers<[1], [1], [0], [0], [0, 0, 1, 0], [], []>} : vector<8x128xf32>, vector<8x128xf32>, vector<8x8xf32> -> vector<8x8xf32>
    %cst_20 = arith.constant 1.000000e+00 : f32
    %30 = vector.broadcast %cst_20 : f32 to vector<8x8xf32>
    %31 = arith.mulf %29, %30 : vector<8x8xf32>
    %cst_21 = arith.constant dense<0xFF800000> : vector<8xf32>
    %32 = vector.multi_reduction <maximumf>, %31, %cst_21 [1] : vector<8x8xf32> to vector<8xf32>
    %33 = vector.shape_cast %32 : vector<8xf32> to vector<8x1xf32>
    %34 = vector.broadcast %33 : vector<8x1xf32> to vector<8x8xf32>
    %35 = arith.subf %31, %34 : vector<8x8xf32>
    %36 = math.exp %35 : vector<8x8xf32>
    %cst_22 = arith.constant dense<0.000000e+00> : vector<8xf32>
    %37 = vector.multi_reduction <add>, %36, %cst_22 [1] : vector<8x8xf32> to vector<8xf32>
    %38 = vector.shape_cast %37 : vector<8xf32> to vector<8x1xf32>
    %39 = math.log %38 : vector<8x1xf32>
    %40 = arith.addf %33, %39 : vector<8x1xf32>
    %41 = arith.cmpi eq, %6, %5 : vector<8x8xi32>
    %cst_23 = arith.constant 0.000000e+00 : f32
    %42 = vector.broadcast %cst_23 : f32 to vector<8x8xf32>
    %43 = arith.select %41, %31, %42 : vector<8x8xi1>, vector<8x8xf32>
    %cst_24 = arith.constant dense<0.000000e+00> : vector<8xf32>
    %44 = vector.multi_reduction <add>, %43, %cst_24 [1] : vector<8x8xf32> to vector<8xf32>
    %45 = vector.shape_cast %44 : vector<8xf32> to vector<8x1xf32>
    %46 = arith.subf %40, %45 : vector<8x1xf32>
    %cst_25 = arith.constant 2.000000e+00 : f32
    %47 = vector.broadcast %cst_25 : f32 to vector<8x1xf32>
    %48 = arith.mulf %46, %47 : vector<8x1xf32>
    %c7_i32 = arith.constant 7 : i32
    %49 = vector.broadcast %c7_i32 : i32 to vector<8x8xi32>
    %50 = arith.subi %49, %5 : vector<8x8xi32>
    %51 = arith.cmpi eq, %6, %50 : vector<8x8xi32>
    %cst_26 = arith.constant 0.000000e+00 : f32
    %52 = vector.broadcast %cst_26 : f32 to vector<8x8xf32>
    %53 = arith.select %51, %31, %52 : vector<8x8xi1>, vector<8x8xf32>
    %cst_27 = arith.constant dense<0.000000e+00> : vector<8xf32>
    %54 = vector.multi_reduction <add>, %53, %cst_27 [1] : vector<8x8xf32> to vector<8xf32>
    %55 = vector.shape_cast %54 : vector<8xf32> to vector<8x1xf32>
    %56 = arith.subf %40, %55 : vector<8x1xf32>
    %cst_28 = arith.constant 2.000000e+00 : f32
    %57 = vector.broadcast %cst_28 : f32 to vector<8x1xf32>
    %58 = arith.mulf %56, %57 : vector<8x1xf32>
    %cst_29 = arith.constant dense<0.000000e+00> : vector<8x8xf32>
    %59 = tpu.matmul %1, %3, %cst_29 {dimension_numbers = #tpu.dot_dimension_numbers<[1], [1], [0], [0], [0, 0, 1, 0], [], []>} : vector<8x128xf32>, vector<8x128xf32>, vector<8x8xf32> -> vector<8x8xf32>
    %cst_30 = arith.constant 1.000000e+00 : f32
    %60 = vector.broadcast %cst_30 : f32 to vector<8x8xf32>
    %61 = arith.mulf %59, %60 : vector<8x8xf32>
    %cst_31 = arith.constant dense<0xFF800000> : vector<8xf32>
    %62 = vector.multi_reduction <maximumf>, %61, %cst_31 [1] : vector<8x8xf32> to vector<8xf32>
    %63 = vector.shape_cast %62 : vector<8xf32> to vector<8x1xf32>
    %64 = vector.broadcast %63 : vector<8x1xf32> to vector<8x8xf32>
    %65 = arith.subf %61, %64 : vector<8x8xf32>
    %66 = math.exp %65 : vector<8x8xf32>
    %cst_32 = arith.constant dense<0.000000e+00> : vector<8xf32>
    %67 = vector.multi_reduction <add>, %66, %cst_32 [1] : vector<8x8xf32> to vector<8xf32>
    %68 = vector.shape_cast %67 : vector<8xf32> to vector<8x1xf32>
    %69 = math.log %68 : vector<8x1xf32>
    %70 = arith.addf %63, %69 : vector<8x1xf32>
    %71 = arith.cmpi eq, %6, %5 : vector<8x8xi32>
    %cst_33 = arith.constant 0.000000e+00 : f32
    %72 = vector.broadcast %cst_33 : f32 to vector<8x8xf32>
    %73 = arith.select %71, %61, %72 : vector<8x8xi1>, vector<8x8xf32>
    %cst_34 = arith.constant dense<0.000000e+00> : vector<8xf32>
    %74 = vector.multi_reduction <add>, %73, %cst_34 [1] : vector<8x8xf32> to vector<8xf32>
    %75 = vector.shape_cast %74 : vector<8xf32> to vector<8x1xf32>
    %76 = arith.subf %70, %75 : vector<8x1xf32>
    %cst_35 = arith.constant 2.000000e+00 : f32
    %77 = vector.broadcast %cst_35 : f32 to vector<8x1xf32>
    %78 = arith.mulf %76, %77 : vector<8x1xf32>
    %c7_i32_36 = arith.constant 7 : i32
    %79 = vector.broadcast %c7_i32_36 : i32 to vector<8x8xi32>
    %80 = arith.subi %79, %5 : vector<8x8xi32>
    %81 = arith.cmpi eq, %6, %80 : vector<8x8xi32>
    %cst_37 = arith.constant 0.000000e+00 : f32
    %82 = vector.broadcast %cst_37 : f32 to vector<8x8xf32>
    %83 = arith.select %81, %61, %82 : vector<8x8xi1>, vector<8x8xf32>
    %cst_38 = arith.constant dense<0.000000e+00> : vector<8xf32>
    %84 = vector.multi_reduction <add>, %83, %cst_38 [1] : vector<8x8xf32> to vector<8xf32>
    %85 = vector.shape_cast %84 : vector<8xf32> to vector<8x1xf32>
    %86 = arith.subf %70, %85 : vector<8x1xf32>
    %cst_39 = arith.constant 2.000000e+00 : f32
    %87 = vector.broadcast %cst_39 : f32 to vector<8x1xf32>
    %88 = arith.mulf %86, %87 : vector<8x1xf32>
    %cst_40 = arith.constant dense<0.000000e+00> : vector<1xf32>
    %89 = vector.multi_reduction <add>, %28, %cst_40 [0] : vector<8x1xf32> to vector<1xf32>
    %90 = vector.shape_cast %89 : vector<1xf32> to vector<1x1xf32>
    %cst_41 = arith.constant 1.250000e-01 : f32
    %91 = vector.broadcast %cst_41 : f32 to vector<1x1xf32>
    %92 = arith.mulf %90, %91 : vector<1x1xf32>
    %93 = arith.mulf %48, %7 : vector<8x1xf32>
    %cst_42 = arith.constant 1.000000e+00 : f32
    %94 = vector.broadcast %cst_42 : f32 to vector<8x1xf32>
    %95 = arith.subf %94, %7 : vector<8x1xf32>
    %96 = arith.mulf %58, %95 : vector<8x1xf32>
    %97 = arith.addf %93, %96 : vector<8x1xf32>
    %cst_43 = arith.constant dense<0.000000e+00> : vector<1xf32>
    %98 = vector.multi_reduction <add>, %97, %cst_43 [0] : vector<8x1xf32> to vector<1xf32>
    %99 = vector.shape_cast %98 : vector<1xf32> to vector<1x1xf32>
    %cst_44 = arith.constant 6.250000e-02 : f32
    %100 = vector.broadcast %cst_44 : f32 to vector<1x1xf32>
    %101 = arith.mulf %99, %100 : vector<1x1xf32>
    %cst_45 = arith.constant 1.000000e+00 : f32
    %102 = vector.broadcast %cst_45 : f32 to vector<8x1xf32>
    %103 = arith.addf %102, %8 : vector<8x1xf32>
    %cst_46 = arith.constant 1.000000e+00 : f32
    %104 = vector.broadcast %cst_46 : f32 to vector<8x1xf32>
    %105 = arith.divf %104, %103 : vector<8x1xf32>
    %106 = arith.mulf %78, %105 : vector<8x1xf32>
    %107 = arith.mulf %8, %105 : vector<8x1xf32>
    %108 = arith.mulf %88, %107 : vector<8x1xf32>
    %109 = arith.addf %106, %108 : vector<8x1xf32>
    %cst_47 = arith.constant dense<0.000000e+00> : vector<1xf32>
    %110 = vector.multi_reduction <add>, %109, %cst_47 [0] : vector<8x1xf32> to vector<1xf32>
    %111 = vector.shape_cast %110 : vector<1xf32> to vector<1x1xf32>
    %cst_48 = arith.constant 6.250000e-02 : f32
    %112 = vector.broadcast %cst_48 : f32 to vector<1x1xf32>
    %113 = arith.mulf %111, %112 : vector<1x1xf32>
    %114 = tpu.iota {dimensions = array<i32: 1>} : vector<1x128xi32>
    %c0_i32 = arith.constant 0 : i32
    %115 = vector.broadcast %c0_i32 : i32 to vector<1x128xi32>
    %116 = arith.cmpi eq, %114, %115 : vector<1x128xi32>
    %c1_i32 = arith.constant 1 : i32
    %117 = vector.broadcast %c1_i32 : i32 to vector<1x128xi32>
    %118 = arith.cmpi eq, %114, %117 : vector<1x128xi32>
    %c2_i32 = arith.constant 2 : i32
    %119 = vector.broadcast %c2_i32 : i32 to vector<1x128xi32>
    %120 = arith.cmpi eq, %114, %119 : vector<1x128xi32>
    %cst_49 = arith.constant 0.000000e+00 : f32
    %121 = vector.shape_cast %113 : vector<1x1xf32> to vector<1x1xf32>
    %122 = vector.broadcast %121 : vector<1x1xf32> to vector<1x128xf32>
    %123 = vector.broadcast %cst_49 : f32 to vector<1x128xf32>
    %124 = arith.select %120, %122, %123 : vector<1x128xi1>, vector<1x128xf32>
    %125 = vector.shape_cast %101 : vector<1x1xf32> to vector<1x1xf32>
    %126 = vector.broadcast %125 : vector<1x1xf32> to vector<1x128xf32>
    %127 = arith.select %118, %126, %124 : vector<1x128xi1>, vector<1x128xf32>
    %128 = vector.shape_cast %92 : vector<1x1xf32> to vector<1x1xf32>
    %129 = vector.broadcast %128 : vector<1x1xf32> to vector<1x128xf32>
    %130 = arith.select %116, %129, %127 : vector<1x128xi1>, vector<1x128xf32>
    %c0_50 = arith.constant 0 : index
    %c0_51 = arith.constant 0 : index
    %131 = vector.load %arg8[%c0_50, %c0_51] : memref<1x128xf32, #tpu.memory_space<vmem>>, vector<1x128xf32>
    tpu.vector_store %arg8[%c0_50, %c0_51], %130 {strides = array<i32>} : memref<1x128xf32, #tpu.memory_space<vmem>>, vector<1x128xf32>,
    return
  }
  func.func @transform_0(%arg0: i32) -> (i32, i32) {
    %c0_i32 = arith.constant 0 : i32
    %c0_i32_0 = arith.constant 0 : i32
    %c0_i32_1 = arith.constant 0 : i32
    return %c0_i32, %c0_i32_0 : i32, i32
  }
  func.func @transform_1(%arg0: i32) -> (i32, i32) {
    %c0_i32 = arith.constant 0 : i32
    %c0_i32_0 = arith.constant 0 : i32
    %c0_i32_1 = arith.constant 0 : i32
    return %c0_i32, %c0_i32_0 : i32, i32
  }
  func.func @transform_2(%arg0: i32) -> (i32, i32) {
    %c0_i32 = arith.constant 0 : i32
    %c0_i32_0 = arith.constant 0 : i32
    %c0_i32_1 = arith.constant 0 : i32
    return %c0_i32, %c0_i32_0 : i32, i32
  }
  func.func @transform_3(%arg0: i32) -> (i32, i32) {
    %c0_i32 = arith.constant 0 : i32
    %c0_i32_0 = arith.constant 0 : i32
    %c0_i32_1 = arith.constant 0 : i32
    return %c0_i32, %c0_i32_0 : i32, i32
  }
  func.func @transform_4(%arg0: i32) -> (i32, i32) {
    %c0_i32 = arith.constant 0 : i32
    %c0_i32_0 = arith.constant 0 : i32
    %c0_i32_1 = arith.constant 0 : i32
    return %c0_i32, %c0_i32_0 : i32, i32
  }
  func.func @transform_5(%arg0: i32) -> (i32, i32) {
    %c0_i32 = arith.constant 0 : i32
    %c0_i32_0 = arith.constant 0 : i32
    %c0_i32_1 = arith.constant 0 : i32
    return %c0_i32, %c0_i32_0 : i32, i32
  }
  func.func @transform_6(%arg0: i32) -> (i32, i32) {
    %c0_i32 = arith.constant 0 : i32
    %c0_i32_0 = arith.constant 0 : i32
    %c0_i32_1 = arith.constant 0 : i32
    return %c0_i32, %c0_i32_0 : i32, i32
  }
  func.func @transform_7(%arg0: i32) -> (i32, i32) {
    %c0_i32 = arith.constant 0 : i32
    %c0_i32_0 = arith.constant 0 : i32
    %c0_i32_1 = arith.constant 0 : i32
    return %c0_i32, %c0_i32_0 : i32, i32
  }
}

module attributes {stable_mosaic.version = 11 : i64} {
  func.func @_q_kernel(%arg0: i32, %arg1: memref<8x1024xf32, #tpu.memory_space<vmem>>, %arg2: memref<8x1024xf32, #tpu.memory_space<vmem>>, %arg3: memref<1024x128xbf16, #tpu.memory_space<vmem>>, %arg4: memref<128x128xbf16, #tpu.memory_space<vmem>>, %arg5: memref<1x128xf32, #tpu.memory_space<vmem>>, %arg6: memref<1x128xf32, #tpu.memory_space<vmem>>, %arg7: memref<128x128xbf16, #tpu.memory_space<vmem>>, %arg8: memref<128x128xbf16, #tpu.memory_space<vmem>>, %arg9: memref<1x128xf32, #tpu.memory_space<vmem>>, %arg10: memref<1x128xf32, #tpu.memory_space<vmem>>, %arg11: memref<128x128xbf16, #tpu.memory_space<vmem>>, %arg12: memref<8x128xf32, #tpu.memory_space<vmem>>, %arg13: memref<8x128xf32, #tpu.memory_space<vmem>>) attributes {dimension_semantics = [#tpu.dimension_semantics<arbitrary>], iteration_bounds = array<i64: 1>, scalar_prefetch = 0 : i64, scratch_operands = 0 : i64, tpu.core_type = #tpu.core_type<tc>, window_params = [{pipeline_mode = #tpu.pipeline_mode<synchronous>, transform_indices = @transform_0, window_bounds = array<i64: 8, 1024>}, {pipeline_mode = #tpu.pipeline_mode<synchronous>, transform_indices = @transform_1, window_bounds = array<i64: 8, 1024>}, {pipeline_mode = #tpu.pipeline_mode<synchronous>, transform_indices = @transform_2, window_bounds = array<i64: 1024, 128>}, {pipeline_mode = #tpu.pipeline_mode<synchronous>, transform_indices = @transform_3, window_bounds = array<i64: 128, 128>}, {pipeline_mode = #tpu.pipeline_mode<synchronous>, transform_indices = @transform_4, window_bounds = array<i64: 1, 128>}, {pipeline_mode = #tpu.pipeline_mode<synchronous>, transform_indices = @transform_5, window_bounds = array<i64: 1, 128>}, {pipeline_mode = #tpu.pipeline_mode<synchronous>, transform_indices = @transform_6, window_bounds = array<i64: 128, 128>}, {pipeline_mode = #tpu.pipeline_mode<synchronous>, transform_indices = @transform_7, window_bounds = array<i64: 128, 128>}, {pipeline_mode = #tpu.pipeline_mode<synchronous>, transform_indices = @transform_8, window_bounds = array<i64: 1, 128>}, {pipeline_mode = #tpu.pipeline_mode<synchronous>, transform_indices = @transform_9, window_bounds = array<i64: 1, 128>}, {pipeline_mode = #tpu.pipeline_mode<synchronous>, transform_indices = @transform_10, window_bounds = array<i64: 128, 128>}, {pipeline_mode = #tpu.pipeline_mode<synchronous>, transform_indices = @transform_11, window_bounds = array<i64: 8, 128>}, {pipeline_mode = #tpu.pipeline_mode<synchronous>, transform_indices = @transform_12, window_bounds = array<i64: 8, 128>}]} {
    %c0 = arith.constant 0 : index
    %c0_0 = arith.constant 0 : index
    %0 = vector.load %arg3[%c0, %c0_0] : memref<1024x128xbf16, #tpu.memory_space<vmem>>, vector<1024x128xbf16>
    %c0_1 = arith.constant 0 : index
    %c0_2 = arith.constant 0 : index
    %1 = vector.load %arg4[%c0_1, %c0_2] : memref<128x128xbf16, #tpu.memory_space<vmem>>, vector<128x128xbf16>
    %c0_3 = arith.constant 0 : index
    %c0_4 = arith.constant 0 : index
    %2 = vector.load %arg7[%c0_3, %c0_4] : memref<128x128xbf16, #tpu.memory_space<vmem>>, vector<128x128xbf16>
    %c0_5 = arith.constant 0 : index
    %c0_6 = arith.constant 0 : index
    %3 = vector.load %arg8[%c0_5, %c0_6] : memref<128x128xbf16, #tpu.memory_space<vmem>>, vector<128x128xbf16>
    %c0_7 = arith.constant 0 : index
    %c0_8 = arith.constant 0 : index
    %4 = vector.load %arg11[%c0_7, %c0_8] : memref<128x128xbf16, #tpu.memory_space<vmem>>, vector<128x128xbf16>
    %c0_9 = arith.constant 0 : index
    %c0_10 = arith.constant 0 : index
    %5 = vector.load %arg5[%c0_9, %c0_10] : memref<1x128xf32, #tpu.memory_space<vmem>>, vector<1x128xf32>
    %6 = vector.shape_cast %5 : vector<1x128xf32> to vector<1x128xf32>
    %7 = vector.broadcast %6 : vector<1x128xf32> to vector<8x128xf32>
    %c0_11 = arith.constant 0 : index
    %c0_12 = arith.constant 0 : index
    %8 = vector.load %arg6[%c0_11, %c0_12] : memref<1x128xf32, #tpu.memory_space<vmem>>, vector<1x128xf32>
    %9 = vector.shape_cast %8 : vector<1x128xf32> to vector<1x128xf32>
    %10 = vector.broadcast %9 : vector<1x128xf32> to vector<8x128xf32>
    %c0_13 = arith.constant 0 : index
    %c0_14 = arith.constant 0 : index
    %11 = vector.load %arg9[%c0_13, %c0_14] : memref<1x128xf32, #tpu.memory_space<vmem>>, vector<1x128xf32>
    %12 = vector.shape_cast %11 : vector<1x128xf32> to vector<1x128xf32>
    %13 = vector.broadcast %12 : vector<1x128xf32> to vector<8x128xf32>
    %c0_15 = arith.constant 0 : index
    %c0_16 = arith.constant 0 : index
    %14 = vector.load %arg10[%c0_15, %c0_16] : memref<1x128xf32, #tpu.memory_space<vmem>>, vector<1x128xf32>
    %15 = vector.shape_cast %14 : vector<1x128xf32> to vector<1x128xf32>
    %16 = vector.broadcast %15 : vector<1x128xf32> to vector<8x128xf32>
    %c0_17 = arith.constant 0 : index
    %c0_18 = arith.constant 0 : index
    %17 = vector.load %arg1[%c0_17, %c0_18] : memref<8x1024xf32, #tpu.memory_space<vmem>>, vector<8x1024xf32>
    %18 = arith.truncf %17 : vector<8x1024xf32> to vector<8x1024xbf16>
    %cst = arith.constant dense<0.000000e+00> : vector<8x128xf32>
    %19 = tpu.matmul %18, %0, %cst {dimension_numbers = #tpu.dot_dimension_numbers<[1], [0], [0], [1], [0, 0, 1, 1], [], []>} : vector<8x1024xbf16>, vector<1024x128xbf16>, vector<8x128xf32> -> vector<8x128xf32>
    %20 = arith.truncf %19 : vector<8x128xf32> to vector<8x128xbf16>
    %cst_19 = arith.constant dense<0.000000e+00> : vector<8x128xf32>
    %21 = tpu.matmul %20, %1, %cst_19 {dimension_numbers = #tpu.dot_dimension_numbers<[1], [0], [0], [1], [0, 0, 1, 1], [], []>} : vector<8x128xbf16>, vector<128x128xbf16>, vector<8x128xf32> -> vector<8x128xf32>
    %cst_20 = arith.constant dense<0.000000e+00> : vector<128xf32>
    %22 = vector.multi_reduction <add>, %21, %cst_20 [0] : vector<8x128xf32> to vector<128xf32>
    %23 = vector.shape_cast %22 : vector<128xf32> to vector<1x128xf32>
    %cst_21 = arith.constant 8.000000e+00 : f32
    %24 = vector.broadcast %cst_21 : f32 to vector<1x128xf32>
    %25 = arith.divf %23, %24 : vector<1x128xf32>
    %26 = vector.broadcast %25 : vector<1x128xf32> to vector<8x128xf32>
    %27 = arith.subf %21, %26 : vector<8x128xf32>
    %28 = arith.mulf %27, %27 : vector<8x128xf32>
    %cst_22 = arith.constant dense<0.000000e+00> : vector<128xf32>
    %29 = vector.multi_reduction <add>, %28, %cst_22 [0] : vector<8x128xf32> to vector<128xf32>
    %30 = vector.shape_cast %29 : vector<128xf32> to vector<1x128xf32>
    %cst_23 = arith.constant 8.000000e+00 : f32
    %31 = vector.broadcast %cst_23 : f32 to vector<1x128xf32>
    %32 = arith.divf %30, %31 : vector<1x128xf32>
    %33 = vector.broadcast %25 : vector<1x128xf32> to vector<8x128xf32>
    %34 = arith.subf %21, %33 : vector<8x128xf32>
    %cst_24 = arith.constant 9.99999974E-6 : f32
    %35 = vector.broadcast %cst_24 : f32 to vector<1x128xf32>
    %36 = arith.addf %32, %35 : vector<1x128xf32>
    %37 = math.rsqrt %36 : vector<1x128xf32>
    %38 = vector.broadcast %37 : vector<1x128xf32> to vector<8x128xf32>
    %39 = arith.mulf %34, %38 : vector<8x128xf32>
    %40 = arith.mulf %39, %7 : vector<8x128xf32>
    %41 = arith.addf %40, %10 : vector<8x128xf32>
    %cst_25 = arith.constant 0.000000e+00 : f32
    %42 = vector.broadcast %cst_25 : f32 to vector<8x128xf32>
    %43 = arith.maximumf %41, %42 : vector<8x128xf32>
    %44 = arith.truncf %43 : vector<8x128xf32> to vector<8x128xbf16>
    %cst_26 = arith.constant dense<0.000000e+00> : vector<8x128xf32>
    %45 = tpu.matmul %44, %2, %cst_26 {dimension_numbers = #tpu.dot_dimension_numbers<[1], [0], [0], [1], [0, 0, 1, 1], [], []>} : vector<8x128xbf16>, vector<128x128xbf16>, vector<8x128xf32> -> vector<8x128xf32>
    %cst_27 = arith.constant dense<0.000000e+00> : vector<128xf32>
    %46 = vector.multi_reduction <add>, %45, %cst_27 [0] : vector<8x128xf32> to vector<128xf32>
    %47 = vector.shape_cast %46 : vector<128xf32> to vector<1x128xf32>
    %cst_28 = arith.constant 8.000000e+00 : f32
    %48 = vector.broadcast %cst_28 : f32 to vector<1x128xf32>
    %49 = arith.divf %47, %48 : vector<1x128xf32>
    %50 = vector.broadcast %49 : vector<1x128xf32> to vector<8x128xf32>
    %51 = arith.subf %45, %50 : vector<8x128xf32>
    %52 = arith.mulf %51, %51 : vector<8x128xf32>
    %cst_29 = arith.constant dense<0.000000e+00> : vector<128xf32>
    %53 = vector.multi_reduction <add>, %52, %cst_29 [0] : vector<8x128xf32> to vector<128xf32>
    %54 = vector.shape_cast %53 : vector<128xf32> to vector<1x128xf32>
    %cst_30 = arith.constant 8.000000e+00 : f32
    %55 = vector.broadcast %cst_30 : f32 to vector<1x128xf32>
    %56 = arith.divf %54, %55 : vector<1x128xf32>
    %57 = vector.broadcast %49 : vector<1x128xf32> to vector<8x128xf32>
    %58 = arith.subf %45, %57 : vector<8x128xf32>
    %cst_31 = arith.constant 9.99999974E-6 : f32
    %59 = vector.broadcast %cst_31 : f32 to vector<1x128xf32>
    %60 = arith.addf %56, %59 : vector<1x128xf32>
    %61 = math.rsqrt %60 : vector<1x128xf32>
    %62 = vector.broadcast %61 : vector<1x128xf32> to vector<8x128xf32>
    %63 = arith.mulf %58, %62 : vector<8x128xf32>
    %64 = arith.truncf %63 : vector<8x128xf32> to vector<8x128xbf16>
    %cst_32 = arith.constant dense<0.000000e+00> : vector<8x128xf32>
    %65 = tpu.matmul %64, %3, %cst_32 {dimension_numbers = #tpu.dot_dimension_numbers<[1], [0], [0], [1], [0, 0, 1, 1], [], []>} : vector<8x128xbf16>, vector<128x128xbf16>, vector<8x128xf32> -> vector<8x128xf32>
    %cst_33 = arith.constant dense<0.000000e+00> : vector<128xf32>
    %66 = vector.multi_reduction <add>, %65, %cst_33 [0] : vector<8x128xf32> to vector<128xf32>
    %67 = vector.shape_cast %66 : vector<128xf32> to vector<1x128xf32>
    %cst_34 = arith.constant 8.000000e+00 : f32
    %68 = vector.broadcast %cst_34 : f32 to vector<1x128xf32>
    %69 = arith.divf %67, %68 : vector<1x128xf32>
    %70 = vector.broadcast %69 : vector<1x128xf32> to vector<8x128xf32>
    %71 = arith.subf %65, %70 : vector<8x128xf32>
    %72 = arith.mulf %71, %71 : vector<8x128xf32>
    %cst_35 = arith.constant dense<0.000000e+00> : vector<128xf32>
    %73 = vector.multi_reduction <add>, %72, %cst_35 [0] : vector<8x128xf32> to vector<128xf32>
    %74 = vector.shape_cast %73 : vector<128xf32> to vector<1x128xf32>
    %cst_36 = arith.constant 8.000000e+00 : f32
    %75 = vector.broadcast %cst_36 : f32 to vector<1x128xf32>
    %76 = arith.divf %74, %75 : vector<1x128xf32>
    %77 = vector.broadcast %69 : vector<1x128xf32> to vector<8x128xf32>
    %78 = arith.subf %65, %77 : vector<8x128xf32>
    %cst_37 = arith.constant 9.99999974E-6 : f32
    %79 = vector.broadcast %cst_37 : f32 to vector<1x128xf32>
    %80 = arith.addf %76, %79 : vector<1x128xf32>
    %81 = math.rsqrt %80 : vector<1x128xf32>
    %82 = vector.broadcast %81 : vector<1x128xf32> to vector<8x128xf32>
    %83 = arith.mulf %78, %82 : vector<8x128xf32>
    %84 = arith.mulf %83, %13 : vector<8x128xf32>
    %85 = arith.addf %84, %16 : vector<8x128xf32>
    %cst_38 = arith.constant 0.000000e+00 : f32
    %86 = vector.broadcast %cst_38 : f32 to vector<8x128xf32>
    %87 = arith.maximumf %85, %86 : vector<8x128xf32>
    %88 = arith.truncf %87 : vector<8x128xf32> to vector<8x128xbf16>
    %cst_39 = arith.constant dense<0.000000e+00> : vector<8x128xf32>
    %89 = tpu.matmul %88, %4, %cst_39 {dimension_numbers = #tpu.dot_dimension_numbers<[1], [0], [0], [1], [0, 0, 1, 1], [], []>} : vector<8x128xbf16>, vector<128x128xbf16>, vector<8x128xf32> -> vector<8x128xf32>
    %90 = arith.mulf %89, %89 : vector<8x128xf32>
    %cst_40 = arith.constant dense<0.000000e+00> : vector<8xf32>
    %91 = vector.multi_reduction <add>, %90, %cst_40 [1] : vector<8x128xf32> to vector<8xf32>
    %92 = vector.shape_cast %91 : vector<8xf32> to vector<8x1xf32>
    %cst_41 = arith.constant 1.000000e-24 : f32
    %93 = vector.broadcast %cst_41 : f32 to vector<8x1xf32>
    %94 = arith.maximumf %92, %93 : vector<8x1xf32>
    %95 = math.rsqrt %94 : vector<8x1xf32>
    %96 = vector.broadcast %95 : vector<8x1xf32> to vector<8x128xf32>
    %97 = arith.mulf %89, %96 : vector<8x128xf32>
    %c0_42 = arith.constant 0 : index
    %c0_43 = arith.constant 0 : index
    %98 = vector.load %arg12[%c0_42, %c0_43] : memref<8x128xf32, #tpu.memory_space<vmem>>, vector<8x128xf32>
    tpu.vector_store %arg12[%c0_42, %c0_43], %97 {strides = array<i32>} : memref<8x128xf32, #tpu.memory_space<vmem>>, vector<8x128xf32>,
    %c0_44 = arith.constant 0 : index
    %c0_45 = arith.constant 0 : index
    %99 = vector.load %arg2[%c0_44, %c0_45] : memref<8x1024xf32, #tpu.memory_space<vmem>>, vector<8x1024xf32>
    %100 = arith.truncf %99 : vector<8x1024xf32> to vector<8x1024xbf16>
    %cst_46 = arith.constant dense<0.000000e+00> : vector<8x128xf32>
    %101 = tpu.matmul %100, %0, %cst_46 {dimension_numbers = #tpu.dot_dimension_numbers<[1], [0], [0], [1], [0, 0, 1, 1], [], []>} : vector<8x1024xbf16>, vector<1024x128xbf16>, vector<8x128xf32> -> vector<8x128xf32>
    %102 = arith.truncf %101 : vector<8x128xf32> to vector<8x128xbf16>
    %cst_47 = arith.constant dense<0.000000e+00> : vector<8x128xf32>
    %103 = tpu.matmul %102, %1, %cst_47 {dimension_numbers = #tpu.dot_dimension_numbers<[1], [0], [0], [1], [0, 0, 1, 1], [], []>} : vector<8x128xbf16>, vector<128x128xbf16>, vector<8x128xf32> -> vector<8x128xf32>
    %cst_48 = arith.constant dense<0.000000e+00> : vector<128xf32>
    %104 = vector.multi_reduction <add>, %103, %cst_48 [0] : vector<8x128xf32> to vector<128xf32>
    %105 = vector.shape_cast %104 : vector<128xf32> to vector<1x128xf32>
    %cst_49 = arith.constant 8.000000e+00 : f32
    %106 = vector.broadcast %cst_49 : f32 to vector<1x128xf32>
    %107 = arith.divf %105, %106 : vector<1x128xf32>
    %108 = vector.broadcast %107 : vector<1x128xf32> to vector<8x128xf32>
    %109 = arith.subf %103, %108 : vector<8x128xf32>
    %110 = arith.mulf %109, %109 : vector<8x128xf32>
    %cst_50 = arith.constant dense<0.000000e+00> : vector<128xf32>
    %111 = vector.multi_reduction <add>, %110, %cst_50 [0] : vector<8x128xf32> to vector<128xf32>
    %112 = vector.shape_cast %111 : vector<128xf32> to vector<1x128xf32>
    %cst_51 = arith.constant 8.000000e+00 : f32
    %113 = vector.broadcast %cst_51 : f32 to vector<1x128xf32>
    %114 = arith.divf %112, %113 : vector<1x128xf32>
    %115 = vector.broadcast %107 : vector<1x128xf32> to vector<8x128xf32>
    %116 = arith.subf %103, %115 : vector<8x128xf32>
    %cst_52 = arith.constant 9.99999974E-6 : f32
    %117 = vector.broadcast %cst_52 : f32 to vector<1x128xf32>
    %118 = arith.addf %114, %117 : vector<1x128xf32>
    %119 = math.rsqrt %118 : vector<1x128xf32>
    %120 = vector.broadcast %119 : vector<1x128xf32> to vector<8x128xf32>
    %121 = arith.mulf %116, %120 : vector<8x128xf32>
    %122 = arith.mulf %121, %7 : vector<8x128xf32>
    %123 = arith.addf %122, %10 : vector<8x128xf32>
    %cst_53 = arith.constant 0.000000e+00 : f32
    %124 = vector.broadcast %cst_53 : f32 to vector<8x128xf32>
    %125 = arith.maximumf %123, %124 : vector<8x128xf32>
    %126 = arith.truncf %125 : vector<8x128xf32> to vector<8x128xbf16>
    %cst_54 = arith.constant dense<0.000000e+00> : vector<8x128xf32>
    %127 = tpu.matmul %126, %2, %cst_54 {dimension_numbers = #tpu.dot_dimension_numbers<[1], [0], [0], [1], [0, 0, 1, 1], [], []>} : vector<8x128xbf16>, vector<128x128xbf16>, vector<8x128xf32> -> vector<8x128xf32>
    %cst_55 = arith.constant dense<0.000000e+00> : vector<128xf32>
    %128 = vector.multi_reduction <add>, %127, %cst_55 [0] : vector<8x128xf32> to vector<128xf32>
    %129 = vector.shape_cast %128 : vector<128xf32> to vector<1x128xf32>
    %cst_56 = arith.constant 8.000000e+00 : f32
    %130 = vector.broadcast %cst_56 : f32 to vector<1x128xf32>
    %131 = arith.divf %129, %130 : vector<1x128xf32>
    %132 = vector.broadcast %131 : vector<1x128xf32> to vector<8x128xf32>
    %133 = arith.subf %127, %132 : vector<8x128xf32>
    %134 = arith.mulf %133, %133 : vector<8x128xf32>
    %cst_57 = arith.constant dense<0.000000e+00> : vector<128xf32>
    %135 = vector.multi_reduction <add>, %134, %cst_57 [0] : vector<8x128xf32> to vector<128xf32>
    %136 = vector.shape_cast %135 : vector<128xf32> to vector<1x128xf32>
    %cst_58 = arith.constant 8.000000e+00 : f32
    %137 = vector.broadcast %cst_58 : f32 to vector<1x128xf32>
    %138 = arith.divf %136, %137 : vector<1x128xf32>
    %139 = vector.broadcast %131 : vector<1x128xf32> to vector<8x128xf32>
    %140 = arith.subf %127, %139 : vector<8x128xf32>
    %cst_59 = arith.constant 9.99999974E-6 : f32
    %141 = vector.broadcast %cst_59 : f32 to vector<1x128xf32>
    %142 = arith.addf %138, %141 : vector<1x128xf32>
    %143 = math.rsqrt %142 : vector<1x128xf32>
    %144 = vector.broadcast %143 : vector<1x128xf32> to vector<8x128xf32>
    %145 = arith.mulf %140, %144 : vector<8x128xf32>
    %146 = arith.truncf %145 : vector<8x128xf32> to vector<8x128xbf16>
    %cst_60 = arith.constant dense<0.000000e+00> : vector<8x128xf32>
    %147 = tpu.matmul %146, %3, %cst_60 {dimension_numbers = #tpu.dot_dimension_numbers<[1], [0], [0], [1], [0, 0, 1, 1], [], []>} : vector<8x128xbf16>, vector<128x128xbf16>, vector<8x128xf32> -> vector<8x128xf32>
    %cst_61 = arith.constant dense<0.000000e+00> : vector<128xf32>
    %148 = vector.multi_reduction <add>, %147, %cst_61 [0] : vector<8x128xf32> to vector<128xf32>
    %149 = vector.shape_cast %148 : vector<128xf32> to vector<1x128xf32>
    %cst_62 = arith.constant 8.000000e+00 : f32
    %150 = vector.broadcast %cst_62 : f32 to vector<1x128xf32>
    %151 = arith.divf %149, %150 : vector<1x128xf32>
    %152 = vector.broadcast %151 : vector<1x128xf32> to vector<8x128xf32>
    %153 = arith.subf %147, %152 : vector<8x128xf32>
    %154 = arith.mulf %153, %153 : vector<8x128xf32>
    %cst_63 = arith.constant dense<0.000000e+00> : vector<128xf32>
    %155 = vector.multi_reduction <add>, %154, %cst_63 [0] : vector<8x128xf32> to vector<128xf32>
    %156 = vector.shape_cast %155 : vector<128xf32> to vector<1x128xf32>
    %cst_64 = arith.constant 8.000000e+00 : f32
    %157 = vector.broadcast %cst_64 : f32 to vector<1x128xf32>
    %158 = arith.divf %156, %157 : vector<1x128xf32>
    %159 = vector.broadcast %151 : vector<1x128xf32> to vector<8x128xf32>
    %160 = arith.subf %147, %159 : vector<8x128xf32>
    %cst_65 = arith.constant 9.99999974E-6 : f32
    %161 = vector.broadcast %cst_65 : f32 to vector<1x128xf32>
    %162 = arith.addf %158, %161 : vector<1x128xf32>
    %163 = math.rsqrt %162 : vector<1x128xf32>
    %164 = vector.broadcast %163 : vector<1x128xf32> to vector<8x128xf32>
    %165 = arith.mulf %160, %164 : vector<8x128xf32>
    %166 = arith.mulf %165, %13 : vector<8x128xf32>
    %167 = arith.addf %166, %16 : vector<8x128xf32>
    %cst_66 = arith.constant 0.000000e+00 : f32
    %168 = vector.broadcast %cst_66 : f32 to vector<8x128xf32>
    %169 = arith.maximumf %167, %168 : vector<8x128xf32>
    %170 = arith.truncf %169 : vector<8x128xf32> to vector<8x128xbf16>
    %cst_67 = arith.constant dense<0.000000e+00> : vector<8x128xf32>
    %171 = tpu.matmul %170, %4, %cst_67 {dimension_numbers = #tpu.dot_dimension_numbers<[1], [0], [0], [1], [0, 0, 1, 1], [], []>} : vector<8x128xbf16>, vector<128x128xbf16>, vector<8x128xf32> -> vector<8x128xf32>
    %172 = arith.mulf %171, %171 : vector<8x128xf32>
    %cst_68 = arith.constant dense<0.000000e+00> : vector<8xf32>
    %173 = vector.multi_reduction <add>, %172, %cst_68 [1] : vector<8x128xf32> to vector<8xf32>
    %174 = vector.shape_cast %173 : vector<8xf32> to vector<8x1xf32>
    %cst_69 = arith.constant 1.000000e-24 : f32
    %175 = vector.broadcast %cst_69 : f32 to vector<8x1xf32>
    %176 = arith.maximumf %174, %175 : vector<8x1xf32>
    %177 = math.rsqrt %176 : vector<8x1xf32>
    %178 = vector.broadcast %177 : vector<8x1xf32> to vector<8x128xf32>
    %179 = arith.mulf %171, %178 : vector<8x128xf32>
    %c0_70 = arith.constant 0 : index
    %c0_71 = arith.constant 0 : index
    %180 = vector.load %arg13[%c0_70, %c0_71] : memref<8x128xf32, #tpu.memory_space<vmem>>, vector<8x128xf32>
    tpu.vector_store %arg13[%c0_70, %c0_71], %179 {strides = array<i32>} : memref<8x128xf32, #tpu.memory_space<vmem>>, vector<8x128xf32>,
    return
  }
  func.func @transform_0(%arg0: i32) -> (i32, i32) {
    %c0_i32 = arith.constant 0 : i32
    %c0_i32_0 = arith.constant 0 : i32
    %c0_i32_1 = arith.constant 0 : i32
    return %c0_i32, %c0_i32_0 : i32, i32
  }
  func.func @transform_1(%arg0: i32) -> (i32, i32) {
    %c0_i32 = arith.constant 0 : i32
    %c0_i32_0 = arith.constant 0 : i32
    %c0_i32_1 = arith.constant 0 : i32
    return %c0_i32, %c0_i32_0 : i32, i32
  }
  func.func @transform_2(%arg0: i32) -> (i32, i32) {
    %c0_i32 = arith.constant 0 : i32
    %c0_i32_0 = arith.constant 0 : i32
    %c0_i32_1 = arith.constant 0 : i32
    return %c0_i32, %c0_i32_0 : i32, i32
  }
  func.func @transform_3(%arg0: i32) -> (i32, i32) {
    %c0_i32 = arith.constant 0 : i32
    %c0_i32_0 = arith.constant 0 : i32
    %c0_i32_1 = arith.constant 0 : i32
    return %c0_i32, %c0_i32_0 : i32, i32
  }
  func.func @transform_4(%arg0: i32) -> (i32, i32) {
    %c0_i32 = arith.constant 0 : i32
    %c0_i32_0 = arith.constant 0 : i32
    %c0_i32_1 = arith.constant 0 : i32
    return %c0_i32, %c0_i32_0 : i32, i32
  }
  func.func @transform_5(%arg0: i32) -> (i32, i32) {
    %c0_i32 = arith.constant 0 : i32
    %c0_i32_0 = arith.constant 0 : i32
    %c0_i32_1 = arith.constant 0 : i32
    return %c0_i32, %c0_i32_0 : i32, i32
  }
  func.func @transform_6(%arg0: i32) -> (i32, i32) {
    %c0_i32 = arith.constant 0 : i32
    %c0_i32_0 = arith.constant 0 : i32
    %c0_i32_1 = arith.constant 0 : i32
    return %c0_i32, %c0_i32_0 : i32, i32
  }
  func.func @transform_7(%arg0: i32) -> (i32, i32) {
    %c0_i32 = arith.constant 0 : i32
    %c0_i32_0 = arith.constant 0 : i32
    %c0_i32_1 = arith.constant 0 : i32
    return %c0_i32, %c0_i32_0 : i32, i32
  }
  func.func @transform_8(%arg0: i32) -> (i32, i32) {
    %c0_i32 = arith.constant 0 : i32
    %c0_i32_0 = arith.constant 0 : i32
    %c0_i32_1 = arith.constant 0 : i32
    return %c0_i32, %c0_i32_0 : i32, i32
  }
  func.func @transform_9(%arg0: i32) -> (i32, i32) {
    %c0_i32 = arith.constant 0 : i32
    %c0_i32_0 = arith.constant 0 : i32
    %c0_i32_1 = arith.constant 0 : i32
    return %c0_i32, %c0_i32_0 : i32, i32
  }
  func.func @transform_10(%arg0: i32) -> (i32, i32) {
    %c0_i32 = arith.constant 0 : i32
    %c0_i32_0 = arith.constant 0 : i32
    %c0_i32_1 = arith.constant 0 : i32
    return %c0_i32, %c0_i32_0 : i32, i32
  }
  func.func @transform_11(%arg0: i32) -> (i32, i32) {
    %c0_i32 = arith.constant 0 : i32
    %c0_i32_0 = arith.constant 0 : i32
    %c0_i32_1 = arith.constant 0 : i32
    return %c0_i32, %c0_i32_0 : i32, i32
  }
  func.func @transform_12(%arg0: i32) -> (i32, i32) {
    %c0_i32 = arith.constant 0 : i32
    %c0_i32_0 = arith.constant 0 : i32
    %c0_i32_1 = arith.constant 0 : i32
    return %c0_i32, %c0_i32_0 : i32, i32
  }
}

</mosaic_0001>

<bundles_post_ra>
// kernel: moco_forward.5
= control target key start
LH: loop header
LB: loop body
LE: loop exit
PB: predicated region body
PF: predicated region fallthrough
CT: control target
= control target key end

     0   :  { %v413_v0 = vmov 0.0   ;;  %vm414_vm0 = vmmov 0   ;;  %vm107_vm1 = vcmask 64512   ;;  %v31_v23 = vlaneseq  ;;  %s520_s4 = inlined_call_operand.vmem [shape: f32[8,128], index: 4, kind: input, shape index: {}]   ;;  %s521_s0 = inlined_call_operand.vmem [shape: f32[8,128], index: 0, kind: input, shape index: {}]   ;;  %s522_s3 = inlined_call_operand.vmem [shape: f32[8,128], index: 3, kind: input, shape index: {}]   ;;  %s523_s2 = inlined_call_operand.vmem [shape: f32[8,128], index: 2, kind: input, shape index: {}]   ;;  %s524_s1 = inlined_call_operand.vmem [shape: f32[8,128], index: 1, kind: input, shape index: {}]   ;;  %s525_s6 = inlined_call_operand.vmem [shape: f32[8,1], index: 6, kind: input, shape index: {}]   ;;  %s526_s5 = inlined_call_operand.vmem [shape: f32[8,1], index: 5, kind: input, shape index: {}]   ;;  %s527_s7 = inlined_call_operand.vmem [shape: f32[1,128], index: 7, kind: output, shape index: {}]  }
   0x1   :  { %379 = vmatprep.subr.mxu0 %v413_v0  ;;  %v30_v1 = vld [vmem:[%s520_s4] sm:$0xff]  ;;  %381 = vmatprep.mubr.msk.f32.mxu0 %vm414_vm0, %v413_v0  ;;  %v415_v45 = vmov 0   ;;  %vm328_vm4 = vcmask 7168  }
   0x2   :  { %380 = vmatpush3.xpose.msra.mxu0 %v30_v1  ;;  %v26_v2 = vld [vmem:[%s521_s0] sm:$0xff]  ;;  %384 = vmatprep.subr.mxu1 %v413_v0  ;;  %v32_v25 = vshrl.u32 %v31_v23, 7  ;;  %v480_v26 = vand.u32 127, %v31_v23 }
   0x3   :  { %v28_v3 = vld [vmem:[%s523_s2] sm:$0xff]  ;;  %389 = vmatprep.subr.mxu0 %v413_v0  ;;  %386 = vmatprep.mubr.msk.f32.mxu1 %vm414_vm0, %v413_v0 }
   0x4   :  { %v29_v4 = vld [vmem:[%s522_s3] sm:$0xff]  ;;  %385 = vmatpush3.xpose.msra.mxu1 %v28_v3  ;;  %v215_v27 = vsub.s32 7, %v32_v25  ;;  %vm120_vm2 = vcmp.eq.s32.totalorder %v480_v26, %v32_v25  ;;  %397 = vset.pattern.permute.xlu1 %v415_v45  ;;  %vm354_vm5 = vcmp.eq.s32.totalorder %v480_v26, 2  ;;  %vm353_vm6 = vcmp.eq.s32.totalorder %v480_v26, 1 }
   0x5   :  { %382 = vmatmul.mubr.f32.vlgmr.msra.gmra.mrb[0].mxu0 %v26_v2  ;;  %v27_v5 = vld [vmem:[%s524_s1] sm:$0xff]  ;;  %398 = vset.pattern.permute.xlu0 %v415_v45  ;;  %vm352_vm7 = vcmp.eq.s32.totalorder %v480_v26, 0 }
   0x6   :  { %390 = vmatpush3.xpose.msra.mxu0 %v29_v4  ;;  %391 = vmatprep.mubr.msk.f32.mxu0 %vm414_vm0, %v413_v0  ;;  %vm487_vm3 = vcmp.eq.s32.totalorder %v480_v26, %v215_v27  ;;  %v36_v46 = vld [vmem:[%s525_s6] sm:$0xff] }
   0x7   :  { %387 = vmatmul.mubr.f32.vlgmr.msra.gmra.mrb[0].mxu1 %v27_v5  ;;  %v337_v47 = vadd.f32 1.0, %v36_v46  ;;  %v35_v59 = vld [vmem:[%s526_s5] sm:$0xff] }
   0x8   :  { %v325_v2 = vsub.f32 1.0, %v35_v59 }
   0x9   :  { %392 = vmatmul.mubr.f32.vlgmr.msra.gmra.mrb[2].mxu0 %v27_v5 }
  0xd8   :  { %v103_v6 = vpop.f32.mrb[0].mxu0 }
  0xd9   :  { %v383_v7 = vpop.f32.mrb[1].mxu0  ;;  %v108_v8 = vsel %vm107_vm1, %v103_v6, -inf  ;;  %v121_v43 = vsel %vm120_vm2, %v103_v6, 0.0 }
  0xda   :  { %109 = vmax.xlane.f32.xlu1 %v108_v8  ;;  %v193_v9 = vpop.f32.mrb[0].mxu1  ;;  %v122_v44 = vsel %vm107_vm1, %v121_v43, 0.0 }
  0xdb   :  { %v388_v10 = vpop.f32.mrb[1].mxu1  ;;  %v197_v14 = vsel %vm107_vm1, %v193_v9, -inf  ;;  %v209_v35 = vsel %vm120_vm2, %v193_v9, 0.0  ;;  %v217_v40 = vsel %vm487_vm3, %v193_v9, 0.0 }
  0xdc   :  { %v289_v11 = vpop.f32.mrb[2].mxu0  ;;  %v210_v37 = vsel %vm107_vm1, %v209_v35, 0.0  ;;  %v218_v42 = vsel %vm107_vm1, %v217_v40, 0.0 }
  0xdd   :  { %v393_v12 = vpop.f32.mrb[3].mxu0  ;;  %v293_v13 = vsel %vm107_vm1, %v289_v11, -inf  ;;  %v305_v30 = vsel %vm120_vm2, %v289_v11, 0.0  ;;  %v311_v36 = vsel %vm487_vm3, %v289_v11, 0.0 }
  0xde   :  { %294 = vmax.xlane.f32.xlu0 %v293_v13  ;;  %v306_v33 = vsel %vm107_vm1, %v305_v30, 0.0  ;;  %v312_v38 = vsel %vm107_vm1, %v311_v36, 0.0 }
  0xe2   :  { %198 = vmax.xlane.f32.xlu0 %v197_v14 }
 0x167   :  { %v474_v18 = vpop.xlane.xlu1 %109 }
 0x168   :  { %v111_v21 = vsub.f32 %v103_v6, %v474_v18 }
 0x16a   :  { %v112_v24 = vmul.f32 1.442695, %v111_v21 }
 0x16b   :  { %v295_v15 = vpop.xlane.xlu0 %294 }
 0x16c   :  { %v296_v16 = vsub.f32 %v289_v11, %v295_v15 }
 0x16e   :  { %v297_v17 = vmul.f32 1.442695, %v296_v16 }
 0x16f   :  { %v476_v19 = vpop.xlane.xlu0 %198 }
 0x170   :  { %399 = vpow2.f32 %v297_v17  ;;  %v200_v20 = vsub.f32 %v193_v9, %v476_v19 }
 0x172   :  { %v201_v22 = vmul.f32 1.442695, %v200_v20 }
 0x174   :  { %401 = vpow2.f32 %v201_v22 }
 0x175   :  { %403 = vpow2.f32 %v112_v24 }
 0x17a   :  { %v400_v28 = vpop.eup %399 }
 0x17b   :  { %v299_v29 = vsel %vm107_vm1, %v400_v28, 0.0 }
 0x17c   :  { %300 = vadd.xlane.f32.xlu1 %v299_v29 }
 0x17e   :  { %v402_v32 = vpop.eup %401 }
 0x17f   :  { %v203_v34 = vsel %vm107_vm1, %v402_v32, 0.0  ;;  %v404_v39 = vpop.eup %403 }
 0x180   :  { %307 = vadd.xlane.f32.xlu1 %v306_v33  ;;  %204 = vadd.xlane.f32.xlu0 %v203_v34  ;;  %v114_v41 = vsel %vm107_vm1, %v404_v39, 0.0 }
 0x184   :  { %211 = vadd.xlane.f32.xlu1 %v210_v37  ;;  %313 = vadd.xlane.f32.xlu0 %v312_v38 }
 0x188   :  { %115 = vadd.xlane.f32.xlu1 %v114_v41  ;;  %219 = vadd.xlane.f32.xlu0 %v218_v42 }
 0x18c   :  { %123 = vadd.xlane.f32.xlu0 %v122_v44 }
 0x209   :  { %v301_v48 = vpop.xlane.xlu1 %300 }
 0x20a   :  { %405 = vlog2.f32 %v301_v48 }
 0x20b   :  { %407 = vrcp.f32 %v337_v47 }
 0x20d   :  { %v205_v49 = vpop.xlane.xlu0 %204  ;;  %v308_v53 = vpop.xlane.xlu1 %307 }
 0x20e   :  { %409 = vlog2.f32 %v205_v49 }
 0x211   :  { %v314_v54 = vpop.xlane.xlu0 %313  ;;  %v212_v1 = vpop.xlane.xlu1 %211 }
 0x214   :  { %v406_v50 = vpop.eup %405 }
 0x215   :  { %v303_v51 = vmul.f32 0.6931472, %v406_v50  ;;  %v408_v52 = vpop.eup %407  ;;  %v220_v3 = vpop.xlane.xlu0 %219 }
 0x216   :  { %v341_v60 = vmul.f32 %v408_v52, %v36_v46  ;;  %v116_v32 = vpop.xlane.xlu1 %115 }
 0x217   :  { %v304_v55 = vadd.f32 %v303_v51, %v295_v15  ;;  %411 = vlog2.f32 %v116_v32 }
 0x218   :  { %v410_v56 = vpop.eup %409 }
 0x219   :  { %v309_v57 = vsub.f32 %v304_v55, %v308_v53  ;;  %v207_v58 = vmul.f32 0.6931472, %v410_v56  ;;  %v315_v61 = vsub.f32 %v304_v55, %v314_v54  ;;  %v124_v36 = vpop.xlane.xlu0 %123 }
 0x21b   :  { %v310_v62 = vmul.f32 2.0, %v309_v57  ;;  %v208_v63 = vadd.f32 %v207_v58, %v476_v19  ;;  %v316_v0 = vmul.f32 2.0, %v315_v61 }
 0x21d   :  { %v340_v4 = vmul.f32 %v408_v52, %v310_v62  ;;  %v213_v5 = vsub.f32 %v208_v63, %v212_v1  ;;  %v342_v6 = vmul.f32 %v341_v60, %v316_v0  ;;  %v221_v7 = vsub.f32 %v208_v63, %v220_v3 }
 0x21f   :  { %v214_v8 = vmul.f32 2.0, %v213_v5  ;;  %v343_v9 = vadd.f32 %v342_v6, %v340_v4  ;;  %v222_v10 = vmul.f32 2.0, %v221_v7 }
 0x221   :  { %v324_v11 = vmul.f32 %v214_v8, %v35_v59  ;;  %v344_v12 = vsel %vm328_vm4, %v343_v9, 0.0  ;;  %v326_v13 = vmul.f32 %v325_v2, %v222_v10  ;;  %v412_v33 = vpop.eup %411 }
 0x222   :  { %v345_v14 = vrot.slane %v344_v12, 4  ;;  %v118_v34 = vmul.f32 0.6931472, %v412_v33 }
 0x223   :  { %v327_v15 = vadd.f32 %v326_v13, %v324_v11 }
 0x224   :  { %v346_v16 = vadd.f32 %v345_v14, %v344_v12  ;;  %v119_v35 = vadd.f32 %v118_v34, %v474_v18 }
 0x225   :  { %v329_v17 = vsel %vm328_vm4, %v327_v15, 0.0 }
 0x226   :  { %v330_v19 = vrot.slane %v329_v17, 4  ;;  %v347_v20 = vrot.slane %v346_v16, 2  ;;  %v125_v37 = vsub.f32 %v119_v35, %v124_v36 }
 0x228   :  { %v331_v21 = vadd.f32 %v330_v19, %v329_v17  ;;  %v348_v22 = vadd.f32 %v347_v20, %v346_v16  ;;  %v126_v38 = vmul.f32 2.0, %v125_v37 }
 0x22a   :  { %v349_v23 = vrot.slane %v348_v22, 1  ;;  %v332_v24 = vrot.slane %v331_v21, 2  ;;  %v317_v39 = vrot.slane %v126_v38, 4 }
 0x22c   :  { %v350_v25 = vadd.f32 %v349_v23, %v348_v22  ;;  %v333_v27 = vadd.f32 %v332_v24, %v331_v21  ;;  %v318_v40 = vadd.f32 %v317_v39, %v126_v38 }
 0x22e   :  { %v351_v28 = vmul.f32 0.0625, %v350_v25  ;;  %v334_v29 = vrot.slane %v333_v27, 1  ;;  %v319_v41 = vrot.slane %v318_v40, 2 }
 0x230   :  { %357 = vperm.xlu1 %397, %v351_v28   ;;  %v335_v30 = vadd.f32 %v334_v29, %v333_v27  ;;  %v320_v42 = vadd.f32 %v319_v41, %v318_v40 }
 0x232   :  { %v336_v31 = vmul.f32 0.0625, %v335_v30  ;;  %v321_v43 = vrot.slane %v320_v42, 1 }
 0x234   :  { %363 = vperm.xlu0 %398, %v336_v31   ;;  %v322_v44 = vadd.f32 %v321_v43, %v320_v42 }
 0x236   :  { %v323_v46 = vmul.f32 0.125, %v322_v44 }
 0x2af   :  { %v358_v45 = vpop.permute.xlu1 %357 }
 0x2b0   :  { %v360_v47 = vsel %vm354_vm5, %v358_v45, 0.0 }
 0x2b3   :  { %v364_v48 = vpop.permute.xlu0 %363 }
 0x2b4   :  { %v366_v18 = vsel %vm353_vm6, %v364_v48, %v360_v47 }
 0x2b5   :  { %v367_v49 = vsel %vm352_vm7, %v323_v46, %v366_v18 }
 0x2b6   :  { %368 = vst [vmem:[%s527_s7] sm:$0x1] %v367_v49 }

// kernel: moco_forward.4
= control target key start
LH: loop header
LB: loop body
LE: loop exit
PB: predicated region body
PF: predicated region fallthrough
CT: control target
= control target key end

     0   :  { %vm2527_vm0 = vmmov 0   ;;  %s4674_s3 = inlined_call_operand.vmem [shape: f32[1024,128], index: 3, kind: input, shape index: {}, may-alias: {3,16}]   ;;  %s4675_s8 = inlined_call_operand.vmem [shape: f32[1024,128], index: 8, kind: input, shape index: {}]   ;;  %s4676_s16 = inlined_call_operand.vmem [shape: f32[1024,128], index: 16, kind: output, shape index: {3}, may-alias: {3,16}]   ;;  %s4677_s0 = inlined_call_operand.vmem [shape: f32[8,1024], index: 0, kind: input, shape index: {}]   ;;  %s4678_s4 = inlined_call_operand.vmem [shape: f32[128,128], index: 4, kind: input, shape index: {}, may-alias: {4,17}]   ;;  %s4679_s9 = inlined_call_operand.vmem [shape: f32[128,128], index: 9, kind: input, shape index: {}]   ;;  %s4680_s17 = inlined_call_operand.vmem [shape: f32[128,128], index: 17, kind: output, shape index: {4}, may-alias: {4,17}]   ;;  %s4681_s5 = inlined_call_operand.vmem [shape: f32[1,128], index: 5, kind: input, shape index: {}, may-alias: {5,18}]   ;;  %s4682_s10 = inlined_call_operand.vmem [shape: f32[1,128], index: 10, kind: input, shape index: {}]   ;;  %s4683_s18 = inlined_call_operand.vmem [shape: f32[1,128], index: 18, kind: output, shape index: {5}, may-alias: {5,18}]   ;;  %s4684_s7 = inlined_call_operand.vmem [shape: f32[128,128], index: 7, kind: input, shape index: {}, may-alias: {7,20}]   ;;  %s4685_s12 = inlined_call_operand.vmem [shape: f32[128,128], index: 12, kind: input, shape index: {}]   ;;  %s4686_s6 = inlined_call_operand.vmem [shape: f32[1,128], index: 6, kind: input, shape index: {}, may-alias: {6,19}]   ;;  %s4687_s11 = inlined_call_operand.vmem [shape: f32[1,128], index: 11, kind: input, shape index: {}]   ;;  %s4688_s20 = inlined_call_operand.vmem [shape: f32[128,128], index: 20, kind: output, shape index: {7}, may-alias: {7,20}]   ;;  %s4689_s19 = inlined_call_operand.vmem [shape: f32[1,128], index: 19, kind: output, shape index: {6}, may-alias: {6,19}]   ;;  %s4690_s1 = inlined_call_operand.vmem [shape: f32[8,1024], index: 1, kind: input, shape index: {}]   ;;  %s4691_s13 = inlined_call_operand.vmem [shape: f32[8,128], index: 13, kind: output, shape index: {0}]   ;;  %s4692_s2 = inlined_call_operand.vmem [shape: f32[8,1024], index: 2, kind: input, shape index: {}]   ;;  %s4693_s14 = inlined_call_operand.vmem [shape: f32[8,128], index: 14, kind: output, shape index: {1}]   ;;  %s4694_s15 = inlined_call_operand.vmem [shape: f32[8,128], index: 15, kind: output, shape index: {2}]  }
   0x1   :  { %4783 = sst [smem:[#allocation52_spill]] %s4674_s3 }
   0x2   :  { %4784 = sst [smem:[#allocation53_spill]] %s4675_s8  ;;  %s4788_s23 = sld [smem:[#allocation52_spill]] }
   0x3   :  { %4785 = sst [smem:[#allocation54_spill]] %s4676_s16  ;;  %s4789_s26 = sld [smem:[#allocation53_spill]] }
   0x4   :  { %4786 = sst [smem:[#allocation55_spill]] %s4677_s0  ;;  %s4790_s24 = sld [smem:[#allocation54_spill]] }
   0x5   :  { %4787 = sst [smem:[#allocation56_spill]] %s4678_s4  ;;  %s4812_s16 = sld [smem:[#allocation55_spill]] }
   0x8   :  { %v69_v0 = vld [vmem:[%s4788_s23 + $0x80] sm:$0xff]  ;;  %v70_v1 = vld [vmem:[%s4788_s23 + $0x88] sm:$0xff] }
   0x9   :  { %v325_v2 = vld [vmem:[%s4789_s26 + $0x80] sm:$0xff]  ;;  %v197_v3 = vmul.f32 0.99, %v69_v0  ;;  %v198_v4 = vmul.f32 0.99, %v70_v1  ;;  %v326_v5 = vld [vmem:[%s4789_s26 + $0x88] sm:$0xff] }
   0xa   :  { %v101_v6 = vld [vmem:[%s4788_s23 + $0x180] sm:$0xff]  ;;  %v453_v7 = vmul.f32 0.01, %v325_v2  ;;  %v454_v8 = vmul.f32 0.01, %v326_v5  ;;  %v102_v9 = vld [vmem:[%s4788_s23 + $0x188] sm:$0xff] }
   0xb   :  { %v357_v10 = vld [vmem:[%s4789_s26 + $0x180] sm:$0xff]  ;;  %v229_v11 = vmul.f32 0.99, %v101_v6  ;;  %v230_v12 = vmul.f32 0.99, %v102_v9  ;;  %v358_v13 = vld [vmem:[%s4789_s26 + $0x188] sm:$0xff] }
   0xc   :  { %v53_v14 = vld [vmem:[%s4788_s23] sm:$0xff]  ;;  %v581_v15 = vadd.f32 %v453_v7, %v197_v3  ;;  %v582_v16 = vadd.f32 %v454_v8, %v198_v4  ;;  %v485_v17 = vmul.f32 0.01, %v357_v10  ;;  %v486_v18 = vmul.f32 0.01, %v358_v13  ;;  %v54_v19 = vld [vmem:[%s4788_s23 + $0x8] sm:$0xff] }
   0xd   :  { %v309_v20 = vld [vmem:[%s4789_s26] sm:$0xff]  ;;  %v181_v21 = vmul.f32 0.99, %v53_v14  ;;  %v182_v22 = vmul.f32 0.99, %v54_v19  ;;  %v310_v23 = vld [vmem:[%s4789_s26 + $0x8] sm:$0xff] }
   0xe   :  { %v85_v24 = vld [vmem:[%s4788_s23 + $0x100] sm:$0xff]  ;;  %v2678_v25 = vpack.c.bf16 %v582_v16, %v581_v15  ;;  %v613_v26 = vadd.f32 %v485_v17, %v229_v11  ;;  %v614_v27 = vadd.f32 %v486_v18, %v230_v12  ;;  %v437_v28 = vmul.f32 0.01, %v309_v20  ;;  %v342_v31 = vld [vmem:[%s4789_s26 + $0x108] sm:$0xff]  ;;  %v327_v44 = vld [vmem:[%s4789_s26 + $0x90] sm:$0xff] }
   0xf   :  { %879 = vst [vmem:[%s4790_s24 + $0x80] sm:$0xff] %v581_v15  ;;  %880 = vst [vmem:[%s4790_s24 + $0x88] sm:$0xff] %v582_v16  ;;  %v341_v30 = vld [vmem:[%s4789_s26 + $0x100] sm:$0xff]  ;;  %v438_v32 = vmul.f32 0.01, %v310_v23  ;;  %v328_v45 = vld [vmem:[%s4789_s26 + $0x98] sm:$0xff] }
  0x10   :  { %4791 = vst [vmem:[#allocation2_spill] sm:$0xff] %v2678_v25  ;;  %v213_v33 = vmul.f32 0.99, %v85_v24  ;;  %2068 = vmatprep.subr.bf16.mxu0 %v2678_v25  ;;  %v2696_v35 = vpack.c.bf16 %v614_v27, %v613_v26  ;;  %v565_v36 = vadd.f32 %v437_v28, %v181_v21  ;;  %v469_v37 = vmul.f32 0.01, %v341_v30  ;;  %v359_v55 = vld [vmem:[%s4789_s26 + $0x190] sm:$0xff] }
  0x11   :  { %v470_v38 = vmul.f32 0.01, %v342_v31  ;;  %v566_v41 = vadd.f32 %v438_v32, %v182_v22  ;;  %v455_v48 = vmul.f32 0.01, %v327_v44  ;;  %v456_v49 = vmul.f32 0.01, %v328_v45 }
  0x12   :  { %2090 = vmatprep.subr.bf16.mxu1 %v2696_v35  ;;  %v597_v46 = vadd.f32 %v469_v37, %v213_v33  ;;  %v360_v56 = vld [vmem:[%s4789_s26 + $0x198] sm:$0xff]  ;;  %v487_v60 = vmul.f32 0.01, %v359_v55  ;;  %v311_v63 = vld [vmem:[%s4789_s26 + $0x10] sm:$0xff]  ;;  %v329_v22 = vld [vmem:[%s4789_s26 + $0xa0] sm:$0xff] }
  0x13   :  { %v2723_v52 = vpack.c.bf16 %v566_v41, %v565_v36  ;;  %v488_v0 = vmul.f32 0.01, %v360_v56  ;;  %v312_v5 = vld [vmem:[%s4789_s26 + $0x18] sm:$0xff]  ;;  %v439_v6 = vmul.f32 0.01, %v311_v63  ;;  %v343_v14 = vld [vmem:[%s4789_s26 + $0x110] sm:$0xff] }
  0x14   :  { %v440_v10 = vmul.f32 0.01, %v312_v5  ;;  %v344_v15 = vld [vmem:[%s4789_s26 + $0x118] sm:$0xff]  ;;  %v471_v19 = vmul.f32 0.01, %v343_v14  ;;  %v361_v33 = vld [vmem:[%s4789_s26 + $0x1a0] sm:$0xff] }
  0x15   :  { %2069 = vmatpush3.bf16.msra.mxu0 %v2723_v52  ;;  %v472_v20 = vmul.f32 0.01, %v344_v15  ;;  %v457_v31 = vmul.f32 0.01, %v329_v22  ;;  %v363_v22 = vld [vmem:[%s4789_s26 + $0x1b0] sm:$0xff] }
  0x16   :  { %v86_v29 = vld [vmem:[%s4788_s23 + $0x108] sm:$0xff] }
  0x17   :  { %v214_v34 = vmul.f32 0.99, %v86_v29  ;;  %911 = vst [vmem:[%s4790_s24 + $0x180] sm:$0xff] %v613_v26  ;;  %912 = vst [vmem:[%s4790_s24 + $0x188] sm:$0xff] %v614_v27  ;;  %v330_v26 = vld [vmem:[%s4789_s26 + $0xa8] sm:$0xff] }
  0x19   :  { %v598_v47 = vadd.f32 %v470_v38, %v214_v34  ;;  %v362_v34 = vld [vmem:[%s4789_s26 + $0x1a8] sm:$0xff] }
  0x1b   :  { %v2737_v57 = vpack.c.bf16 %v598_v47, %v597_v46 }
  0x1d   :  { %4792 = vst [vmem:[#allocation3_spill] sm:$0xff] %v2737_v57  ;;  %2091 = vmatpush3.bf16.msra.mxu1 %v2737_v57 }
  0x1e   :  { %v71_v39 = vld [vmem:[%s4788_s23 + $0x90] sm:$0xff]  ;;  %v72_v40 = vld [vmem:[%s4788_s23 + $0x98] sm:$0xff] }
  0x1f   :  { %v199_v42 = vmul.f32 0.99, %v71_v39  ;;  %v200_v43 = vmul.f32 0.99, %v72_v40  ;;  %863 = vst [vmem:[%s4790_s24] sm:$0xff] %v565_v36  ;;  %v458_v36 = vmul.f32 0.01, %v330_v26 }
  0x21   :  { %v583_v58 = vadd.f32 %v455_v48, %v199_v42  ;;  %v584_v59 = vadd.f32 %v456_v49, %v200_v43  ;;  %v490_v42 = vmul.f32 0.01, %v362_v34  ;;  %v313_v48 = vld [vmem:[%s4789_s26 + $0x20] sm:$0xff]  ;;  %v314_v49 = vld [vmem:[%s4789_s26 + $0x28] sm:$0xff] }
  0x23   :  { %v2756_v3 = vpack.c.bf16 %v584_v59, %v583_v58 }
  0x25   :  { %2070 = vmatprep.subr.bf16.mxu0 %v2756_v3 }
  0x26   :  { %v103_v50 = vld [vmem:[%s4788_s23 + $0x190] sm:$0xff]  ;;  %v104_v51 = vld [vmem:[%s4788_s23 + $0x198] sm:$0xff] }
  0x27   :  { %864 = vst [vmem:[%s4790_s24 + $0x8] sm:$0xff] %v566_v41  ;;  %v231_v53 = vmul.f32 0.99, %v103_v50  ;;  %v232_v54 = vmul.f32 0.99, %v104_v51  ;;  %895 = vst [vmem:[%s4790_s24 + $0x100] sm:$0xff] %v597_v46 }
  0x28   :  { %896 = vst [vmem:[%s4790_s24 + $0x108] sm:$0xff] %v598_v47  ;;  %v489_v41 = vmul.f32 0.01, %v361_v33 }
  0x29   :  { %v615_v4 = vadd.f32 %v487_v60, %v231_v53  ;;  %v616_v9 = vadd.f32 %v488_v0, %v232_v54  ;;  %v441_v53 = vmul.f32 0.01, %v313_v48  ;;  %v442_v54 = vmul.f32 0.01, %v314_v49 }
  0x2b   :  { %v2783_v17 = vpack.c.bf16 %v616_v9, %v615_v4 }
  0x2d   :  { %4793 = vst [vmem:[#allocation4_spill] sm:$0xff] %v2783_v17  ;;  %2092 = vmatprep.subr.bf16.mxu1 %v2783_v17 }
  0x2f   :  { %v55_v61 = vld [vmem:[%s4788_s23 + $0x10] sm:$0xff]  ;;  %v56_v62 = vld [vmem:[%s4788_s23 + $0x18] sm:$0xff] }
  0x30   :  { %v183_v1 = vmul.f32 0.99, %v55_v61  ;;  %v184_v2 = vmul.f32 0.99, %v56_v62  ;;  %881 = vst [vmem:[%s4790_s24 + $0x90] sm:$0xff] %v583_v58  ;;  %882 = vst [vmem:[%s4790_s24 + $0x98] sm:$0xff] %v584_v59 }
  0x31   :  { %v345_v61 = vld [vmem:[%s4789_s26 + $0x120] sm:$0xff]  ;;  %v346_v62 = vld [vmem:[%s4789_s26 + $0x128] sm:$0xff] }
  0x32   :  { %v567_v13 = vadd.f32 %v439_v6, %v183_v1  ;;  %v568_v18 = vadd.f32 %v440_v10, %v184_v2  ;;  %v473_v2 = vmul.f32 0.01, %v345_v61  ;;  %v331_v6 = vld [vmem:[%s4789_s26 + $0xb0] sm:$0xff]  ;;  %v333_v61 = vld [vmem:[%s4789_s26 + $0xc0] sm:$0xff] }
  0x34   :  { %v2804_v28 = vpack.c.bf16 %v568_v18, %v567_v13 }
  0x36   :  { %2071 = vmatpush3.bf16.msra.mxu0 %v2804_v28 }
  0x37   :  { %v87_v7 = vld [vmem:[%s4788_s23 + $0x110] sm:$0xff]  ;;  %v88_v8 = vld [vmem:[%s4788_s23 + $0x118] sm:$0xff] }
  0x38   :  { %v215_v11 = vmul.f32 0.99, %v87_v7  ;;  %v216_v12 = vmul.f32 0.99, %v88_v8  ;;  %913 = vst [vmem:[%s4790_s24 + $0x190] sm:$0xff] %v615_v4 }
  0x39   :  { %v474_v7 = vmul.f32 0.01, %v346_v62  ;;  %v334_v62 = vld [vmem:[%s4789_s26 + $0xc8] sm:$0xff] }
  0x3a   :  { %v599_v29 = vadd.f32 %v471_v19, %v215_v11  ;;  %v600_v30 = vadd.f32 %v472_v20, %v216_v12  ;;  %v332_v12 = vld [vmem:[%s4789_s26 + $0xb8] sm:$0xff] }
  0x3c   :  { %v2822_v39 = vpack.c.bf16 %v600_v30, %v599_v29 }
  0x3e   :  { %4794 = vst [vmem:[#allocation5_spill] sm:$0xff] %v2822_v39  ;;  %2093 = vmatpush3.bf16.msra.mxu1 %v2822_v39 }
  0x3f   :  { %v73_v16 = vld [vmem:[%s4788_s23 + $0xa0] sm:$0xff] }
  0x40   :  { %914 = vst [vmem:[%s4790_s24 + $0x198] sm:$0xff] %v616_v9  ;;  %v201_v23 = vmul.f32 0.99, %v73_v16 }
  0x42   :  { %v585_v40 = vadd.f32 %v457_v31, %v201_v23  ;;  %v364_v23 = vld [vmem:[%s4789_s26 + $0x1b8] sm:$0xff] }
  0x47   :  { %v74_v21 = vld [vmem:[%s4788_s23 + $0xa8] sm:$0xff] }
  0x48   :  { %865 = vst [vmem:[%s4790_s24 + $0x10] sm:$0xff] %v567_v13  ;;  %v202_v24 = vmul.f32 0.99, %v74_v21  ;;  %v459_v13 = vmul.f32 0.01, %v331_v6 }
  0x4a   :  { %v586_v45 = vadd.f32 %v458_v36, %v202_v24  ;;  %v316_v36 = vld [vmem:[%s4789_s26 + $0x38] sm:$0xff] }
  0x4c   :  { %v2849_v58 = vpack.c.bf16 %v586_v45, %v585_v40 }
  0x4e   :  { %2072 = vmatprep.subr.bf16.mxu0 %v2849_v58 }
  0x4f   :  { %v105_v27 = vld [vmem:[%s4788_s23 + $0x1a0] sm:$0xff] }
  0x50   :  { %866 = vst [vmem:[%s4790_s24 + $0x18] sm:$0xff] %v568_v18  ;;  %v233_v37 = vmul.f32 0.99, %v105_v27  ;;  %v460_v18 = vmul.f32 0.01, %v332_v12  ;;  %v366_v12 = vld [vmem:[%s4789_s26 + $0x1c8] sm:$0xff] }
  0x52   :  { %v617_v50 = vadd.f32 %v489_v41, %v233_v37 }
  0x57   :  { %v106_v32 = vld [vmem:[%s4788_s23 + $0x1a8] sm:$0xff] }
  0x58   :  { %v234_v38 = vmul.f32 0.99, %v106_v32  ;;  %897 = vst [vmem:[%s4790_s24 + $0x110] sm:$0xff] %v599_v29  ;;  %898 = vst [vmem:[%s4790_s24 + $0x118] sm:$0xff] %v600_v30  ;;  %v491_v29 = vmul.f32 0.01, %v363_v22 }
  0x59   :  { %v492_v30 = vmul.f32 0.01, %v364_v23  ;;  %v315_v32 = vld [vmem:[%s4789_s26 + $0x30] sm:$0xff] }
  0x5a   :  { %v618_v51 = vadd.f32 %v490_v42, %v234_v38  ;;  %v443_v42 = vmul.f32 0.01, %v315_v32 }
  0x5c   :  { %v2863_v63 = vpack.c.bf16 %v618_v51, %v617_v50 }
  0x5e   :  { %4795 = vst [vmem:[#allocation6_spill] sm:$0xff] %v2863_v63  ;;  %2094 = vmatprep.subr.bf16.mxu1 %v2863_v63 }
  0x5f   :  { %v57_v43 = vld [vmem:[%s4788_s23 + $0x20] sm:$0xff]  ;;  %v58_v44 = vld [vmem:[%s4788_s23 + $0x28] sm:$0xff] }
  0x60   :  { %v185_v46 = vmul.f32 0.99, %v57_v43  ;;  %v186_v47 = vmul.f32 0.99, %v58_v44  ;;  %883 = vst [vmem:[%s4790_s24 + $0xa0] sm:$0xff] %v585_v40  ;;  %v347_v44 = vld [vmem:[%s4789_s26 + $0x130] sm:$0xff] }
  0x62   :  { %v569_v0 = vadd.f32 %v441_v53, %v185_v46  ;;  %v570_v1 = vadd.f32 %v442_v54, %v186_v47  ;;  %v444_v46 = vmul.f32 0.01, %v316_v36 }
  0x64   :  { %v2882_v10 = vpack.c.bf16 %v570_v1, %v569_v0 }
  0x66   :  { %2073 = vmatpush3.bf16.msra.mxu0 %v2882_v10 }
  0x67   :  { %v89_v55 = vld [vmem:[%s4788_s23 + $0x120] sm:$0xff]  ;;  %v90_v56 = vld [vmem:[%s4788_s23 + $0x128] sm:$0xff] }
  0x68   :  { %884 = vst [vmem:[%s4790_s24 + $0xa8] sm:$0xff] %v586_v45  ;;  %v217_v59 = vmul.f32 0.99, %v89_v55  ;;  %v218_v60 = vmul.f32 0.99, %v90_v56  ;;  %915 = vst [vmem:[%s4790_s24 + $0x1a0] sm:$0xff] %v617_v50 }
  0x69   :  { %916 = vst [vmem:[%s4790_s24 + $0x1a8] sm:$0xff] %v618_v51  ;;  %v348_v45 = vld [vmem:[%s4789_s26 + $0x138] sm:$0xff]  ;;  %v475_v51 = vmul.f32 0.01, %v347_v44 }
  0x6a   :  { %v601_v11 = vadd.f32 %v473_v2, %v217_v59  ;;  %v602_v16 = vadd.f32 %v474_v7, %v218_v60  ;;  %v476_v53 = vmul.f32 0.01, %v348_v45  ;;  %v461_v2 = vmul.f32 0.01, %v333_v61 }
  0x6c   :  { %v2909_v26 = vpack.c.bf16 %v602_v16, %v601_v11 }
  0x6e   :  { %4796 = vst [vmem:[#allocation7_spill] sm:$0xff] %v2909_v26  ;;  %2095 = vmatpush3.bf16.msra.mxu1 %v2909_v26 }
  0x70   :  { %v75_v4 = vld [vmem:[%s4788_s23 + $0xb0] sm:$0xff]  ;;  %v76_v5 = vld [vmem:[%s4788_s23 + $0xb8] sm:$0xff] }
  0x71   :  { %v203_v8 = vmul.f32 0.99, %v75_v4  ;;  %v204_v9 = vmul.f32 0.99, %v76_v5  ;;  %867 = vst [vmem:[%s4790_s24 + $0x20] sm:$0xff] %v569_v0  ;;  %868 = vst [vmem:[%s4790_s24 + $0x28] sm:$0xff] %v570_v1 }
  0x72   :  { %v462_v4 = vmul.f32 0.01, %v334_v62 }
  0x73   :  { %v587_v21 = vadd.f32 %v459_v13, %v203_v8  ;;  %v588_v27 = vadd.f32 %v460_v18, %v204_v9 }
  0x75   :  { %v2930_v38 = vpack.c.bf16 %v588_v27, %v587_v21 }
  0x77   :  { %2074 = vmatprep.subr.bf16.mxu0 %v2930_v38 }
  0x78   :  { %v107_v14 = vld [vmem:[%s4788_s23 + $0x1b0] sm:$0xff]  ;;  %v108_v15 = vld [vmem:[%s4788_s23 + $0x1b8] sm:$0xff] }
  0x79   :  { %v235_v19 = vmul.f32 0.99, %v107_v14  ;;  %v236_v20 = vmul.f32 0.99, %v108_v15  ;;  %899 = vst [vmem:[%s4790_s24 + $0x120] sm:$0xff] %v601_v11  ;;  %v365_v11 = vld [vmem:[%s4789_s26 + $0x1c0] sm:$0xff] }
  0x7b   :  { %v619_v40 = vadd.f32 %v491_v29, %v235_v19  ;;  %v620_v41 = vadd.f32 %v492_v30, %v236_v20  ;;  %v317_v20 = vld [vmem:[%s4789_s26 + $0x40] sm:$0xff]  ;;  %v318_v29 = vld [vmem:[%s4789_s26 + $0x48] sm:$0xff] }
  0x7c   :  { %v445_v30 = vmul.f32 0.01, %v317_v20  ;;  %v320_v20 = vld [vmem:[%s4789_s26 + $0x58] sm:$0xff] }
  0x7d   :  { %v2948_v49 = vpack.c.bf16 %v620_v41, %v619_v40 }
  0x7f   :  { %4797 = vst [vmem:[#allocation8_spill] sm:$0xff] %v2948_v49  ;;  %2096 = vmatprep.subr.bf16.mxu1 %v2948_v49 }
  0x80   :  { %v59_v24 = vld [vmem:[%s4788_s23 + $0x30] sm:$0xff] }
  0x81   :  { %900 = vst [vmem:[%s4790_s24 + $0x128] sm:$0xff] %v602_v16  ;;  %v187_v33 = vmul.f32 0.99, %v59_v24  ;;  %v493_v16 = vmul.f32 0.01, %v365_v11 }
  0x83   :  { %v571_v50 = vadd.f32 %v443_v42, %v187_v33  ;;  %v350_v42 = vld [vmem:[%s4789_s26 + $0x148] sm:$0xff] }
  0x88   :  { %v60_v31 = vld [vmem:[%s4788_s23 + $0x38] sm:$0xff] }
  0x89   :  { %885 = vst [vmem:[%s4790_s24 + $0xb0] sm:$0xff] %v587_v21  ;;  %v188_v34 = vmul.f32 0.99, %v60_v31  ;;  %v494_v21 = vmul.f32 0.01, %v366_v12 }
  0x8b   :  { %v572_v56 = vadd.f32 %v444_v46, %v188_v34  ;;  %v446_v34 = vmul.f32 0.01, %v318_v29 }
  0x8d   :  { %v2975_v7 = vpack.c.bf16 %v572_v56, %v571_v50 }
  0x8f   :  { %2075 = vmatpush3.bf16.msra.mxu0 %v2975_v7 }
  0x90   :  { %v91_v37 = vld [vmem:[%s4788_s23 + $0x130] sm:$0xff] }
  0x91   :  { %886 = vst [vmem:[%s4790_s24 + $0xb8] sm:$0xff] %v588_v27  ;;  %v219_v47 = vmul.f32 0.99, %v91_v37 }
  0x93   :  { %v603_v0 = vadd.f32 %v475_v51, %v219_v47  ;;  %v478_v47 = vmul.f32 0.01, %v350_v42 }
  0x98   :  { %v92_v43 = vld [vmem:[%s4788_s23 + $0x138] sm:$0xff] }
  0x99   :  { %v220_v48 = vmul.f32 0.99, %v92_v43  ;;  %917 = vst [vmem:[%s4790_s24 + $0x1b0] sm:$0xff] %v619_v40  ;;  %918 = vst [vmem:[%s4790_s24 + $0x1b8] sm:$0xff] %v620_v41  ;;  %v349_v41 = vld [vmem:[%s4789_s26 + $0x140] sm:$0xff] }
  0x9a   :  { %v477_v46 = vmul.f32 0.01, %v349_v41 }
  0x9b   :  { %v604_v1 = vadd.f32 %v476_v53, %v220_v48 }
  0x9d   :  { %v2989_v13 = vpack.c.bf16 %v604_v1, %v603_v0 }
  0x9f   :  { %4798 = vst [vmem:[#allocation9_spill] sm:$0xff] %v2989_v13  ;;  %2097 = vmatpush3.bf16.msra.mxu1 %v2989_v13 }
  0xa0   :  { %v77_v54 = vld [vmem:[%s4788_s23 + $0xc0] sm:$0xff]  ;;  %v78_v55 = vld [vmem:[%s4788_s23 + $0xc8] sm:$0xff] }
  0xa1   :  { %v205_v59 = vmul.f32 0.99, %v77_v54  ;;  %v206_v60 = vmul.f32 0.99, %v78_v55  ;;  %869 = vst [vmem:[%s4790_s24 + $0x30] sm:$0xff] %v571_v50  ;;  %v335_v50 = vld [vmem:[%s4789_s26 + $0xd0] sm:$0xff] }
  0xa2   :  { %v336_v54 = vld [vmem:[%s4789_s26 + $0xd8] sm:$0xff]  ;;  %v463_v61 = vmul.f32 0.01, %v335_v50 }
  0xa3   :  { %v589_v14 = vadd.f32 %v461_v2, %v205_v59  ;;  %v590_v15 = vadd.f32 %v462_v4, %v206_v60  ;;  %v464_v2 = vmul.f32 0.01, %v336_v54  ;;  %v338_v54 = vld [vmem:[%s4789_s26 + $0xe8] sm:$0xff] }
  0xa5   :  { %v3008_v24 = vpack.c.bf16 %v590_v15, %v589_v14 }
  0xa7   :  { %4799 = vst [vmem:[#allocation10_spill] sm:$0xff] %v3008_v24  ;;  %2076 = vmatprep.subr.bf16.mxu0 %v3008_v24 }
  0xa8   :  { %v109_v5 = vld [vmem:[%s4788_s23 + $0x1c0] sm:$0xff]  ;;  %v110_v6 = vld [vmem:[%s4788_s23 + $0x1c8] sm:$0xff] }
  0xa9   :  { %870 = vst [vmem:[%s4790_s24 + $0x38] sm:$0xff] %v572_v56  ;;  %v237_v8 = vmul.f32 0.99, %v109_v5  ;;  %v238_v9 = vmul.f32 0.99, %v110_v6  ;;  %901 = vst [vmem:[%s4790_s24 + $0x130] sm:$0xff] %v603_v0 }
  0xaa   :  { %902 = vst [vmem:[%s4790_s24 + $0x138] sm:$0xff] %v604_v1  ;;  %v367_v0 = vld [vmem:[%s4789_s26 + $0x1d0] sm:$0xff]  ;;  %v368_v1 = vld [vmem:[%s4789_s26 + $0x1d8] sm:$0xff] }
  0xab   :  { %v621_v27 = vadd.f32 %v493_v16, %v237_v8  ;;  %v622_v33 = vadd.f32 %v494_v21, %v238_v9  ;;  %v495_v9 = vmul.f32 0.01, %v367_v0  ;;  %v496_v11 = vmul.f32 0.01, %v368_v1 }
  0xad   :  { %v3035_v44 = vpack.c.bf16 %v622_v33, %v621_v27 }
  0xaf   :  { %4800 = vst [vmem:[#allocation11_spill] sm:$0xff] %v3035_v44  ;;  %2098 = vmatprep.subr.bf16.mxu1 %v3035_v44 }
  0xb1   :  { %v61_v18 = vld [vmem:[%s4788_s23 + $0x40] sm:$0xff]  ;;  %v62_v19 = vld [vmem:[%s4788_s23 + $0x48] sm:$0xff] }
  0xb2   :  { %v189_v22 = vmul.f32 0.99, %v61_v18  ;;  %v190_v23 = vmul.f32 0.99, %v62_v19  ;;  %887 = vst [vmem:[%s4790_s24 + $0xc0] sm:$0xff] %v589_v14  ;;  %888 = vst [vmem:[%s4790_s24 + $0xc8] sm:$0xff] %v590_v15 }
  0xb3   :  { %v319_v19 = vld [vmem:[%s4789_s26 + $0x50] sm:$0xff] }
  0xb4   :  { %v573_v40 = vadd.f32 %v445_v30, %v189_v22  ;;  %v574_v45 = vadd.f32 %v446_v34, %v190_v23  ;;  %v447_v23 = vmul.f32 0.01, %v319_v19  ;;  %v351_v34 = vld [vmem:[%s4789_s26 + $0x150] sm:$0xff] }
  0xb5   :  { %v479_v42 = vmul.f32 0.01, %v351_v34 }
  0xb6   :  { %v3056_v56 = vpack.c.bf16 %v574_v45, %v573_v40 }
  0xb8   :  { %4801 = vst [vmem:[#allocation12_spill] sm:$0xff] %v3056_v56  ;;  %2077 = vmatpush3.bf16.msra.mxu0 %v3056_v56 }
  0xb9   :  { %v93_v31 = vld [vmem:[%s4788_s23 + $0x140] sm:$0xff]  ;;  %v94_v32 = vld [vmem:[%s4788_s23 + $0x148] sm:$0xff] }
  0xba   :  { %v221_v36 = vmul.f32 0.99, %v93_v31  ;;  %v222_v37 = vmul.f32 0.99, %v94_v32  ;;  %919 = vst [vmem:[%s4790_s24 + $0x1c0] sm:$0xff] %v621_v27 }
  0xbb   :  { %v448_v27 = vmul.f32 0.01, %v320_v20  ;;  %v322_v20 = vld [vmem:[%s4789_s26 + $0x68] sm:$0xff] }
  0xbc   :  { %v605_v59 = vadd.f32 %v477_v46, %v221_v36  ;;  %v606_v60 = vadd.f32 %v478_v47, %v222_v37  ;;  %v352_v36 = vld [vmem:[%s4789_s26 + $0x158] sm:$0xff]  ;;  %v337_v46 = vld [vmem:[%s4789_s26 + $0xe0] sm:$0xff]  ;;  %v450_v34 = vmul.f32 0.01, %v322_v20  ;;  %v323_v20 = vld [vmem:[%s4789_s26 + $0x70] sm:$0xff] }
  0xbd   :  { %v480_v47 = vmul.f32 0.01, %v352_v36 }
  0xbe   :  { %v3074_v6 = vpack.c.bf16 %v606_v60, %v605_v59 }
  0xc0   :  { %4802 = vst [vmem:[#allocation13_spill] sm:$0xff] %v3074_v6  ;;  %2099 = vmatpush3.bf16.msra.mxu1 %v3074_v6 }
  0xc1   :  { %v79_v43 = vld [vmem:[%s4788_s23 + $0xd0] sm:$0xff] }
  0xc2   :  { %920 = vst [vmem:[%s4790_s24 + $0x1c8] sm:$0xff] %v622_v33  ;;  %v207_v51 = vmul.f32 0.99, %v79_v43 }
  0xc4   :  { %v591_v8 = vadd.f32 %v463_v61, %v207_v51 }
  0xc9   :  { %v80_v48 = vld [vmem:[%s4788_s23 + $0xd8] sm:$0xff] }
  0xca   :  { %871 = vst [vmem:[%s4790_s24 + $0x40] sm:$0xff] %v573_v40  ;;  %v208_v53 = vmul.f32 0.99, %v80_v48 }
  0xcc   :  { %v592_v15 = vadd.f32 %v464_v2, %v208_v53 }
  0xce   :  { %v3101_v31 = vpack.c.bf16 %v592_v15, %v591_v8 }
  0xd0   :  { %4803 = vst [vmem:[#allocation14_spill] sm:$0xff] %v3101_v31  ;;  %2078 = vmatprep.subr.bf16.mxu0 %v3101_v31 }
  0xd1   :  { %v111_v55 = vld [vmem:[%s4788_s23 + $0x1d0] sm:$0xff] }
  0xd2   :  { %872 = vst [vmem:[%s4790_s24 + $0x48] sm:$0xff] %v574_v45  ;;  %v239_v4 = vmul.f32 0.99, %v111_v55  ;;  %v465_v55 = vmul.f32 0.01, %v337_v46 }
  0xd4   :  { %v623_v21 = vadd.f32 %v495_v9, %v239_v4  ;;  %v369_v4 = vld [vmem:[%s4789_s26 + $0x1e0] sm:$0xff] }
  0xd9   :  { %v112_v62 = vld [vmem:[%s4788_s23 + $0x1d8] sm:$0xff] }
  0xda   :  { %v240_v5 = vmul.f32 0.99, %v112_v62  ;;  %903 = vst [vmem:[%s4790_s24 + $0x140] sm:$0xff] %v605_v59  ;;  %904 = vst [vmem:[%s4790_s24 + $0x148] sm:$0xff] %v606_v60  ;;  %v466_v62 = vmul.f32 0.01, %v338_v54 }
  0xdb   :  { %v339_v54 = vld [vmem:[%s4789_s26 + $0xf0] sm:$0xff] }
  0xdc   :  { %v624_v22 = vadd.f32 %v496_v11, %v240_v5  ;;  %v370_v5 = vld [vmem:[%s4789_s26 + $0x1e8] sm:$0xff] }
  0xde   :  { %v3115_v37 = vpack.c.bf16 %v624_v22, %v623_v21 }
  0xe0   :  { %4804 = vst [vmem:[#allocation15_spill] sm:$0xff] %v3115_v37  ;;  %2100 = vmatprep.subr.bf16.mxu1 %v3115_v37 }
  0xe1   :  { %v63_v12 = vld [vmem:[%s4788_s23 + $0x50] sm:$0xff]  ;;  %v64_v14 = vld [vmem:[%s4788_s23 + $0x58] sm:$0xff] }
  0xe2   :  { %v191_v16 = vmul.f32 0.99, %v63_v12  ;;  %v192_v18 = vmul.f32 0.99, %v64_v14  ;;  %889 = vst [vmem:[%s4790_s24 + $0xd0] sm:$0xff] %v591_v8 }
  0xe3   :  { %v497_v12 = vmul.f32 0.01, %v369_v4  ;;  %v498_v14 = vmul.f32 0.01, %v370_v5 }
  0xe4   :  { %v575_v40 = vadd.f32 %v447_v23, %v191_v16  ;;  %v576_v41 = vadd.f32 %v448_v27, %v192_v18  ;;  %v321_v16 = vld [vmem:[%s4789_s26 + $0x60] sm:$0xff] }
  0xe6   :  { %v3134_v51 = vpack.c.bf16 %v576_v41, %v575_v40 }
  0xe8   :  { %4805 = vst [vmem:[#allocation16_spill] sm:$0xff] %v3134_v51  ;;  %2079 = vmatpush3.bf16.msra.mxu0 %v3134_v51 }
  0xe9   :  { %v95_v29 = vld [vmem:[%s4788_s23 + $0x150] sm:$0xff]  ;;  %v96_v30 = vld [vmem:[%s4788_s23 + $0x158] sm:$0xff] }
  0xea   :  { %890 = vst [vmem:[%s4790_s24 + $0xd8] sm:$0xff] %v592_v15  ;;  %v223_v32 = vmul.f32 0.99, %v95_v29  ;;  %v224_v33 = vmul.f32 0.99, %v96_v30  ;;  %921 = vst [vmem:[%s4790_s24 + $0x1d0] sm:$0xff] %v623_v21 }
  0xeb   :  { %922 = vst [vmem:[%s4790_s24 + $0x1d8] sm:$0xff] %v624_v22  ;;  %v449_v29 = vmul.f32 0.01, %v321_v16 }
  0xec   :  { %v607_v53 = vadd.f32 %v479_v42, %v223_v32  ;;  %v608_v61 = vadd.f32 %v480_v47, %v224_v33  ;;  %v353_v32 = vld [vmem:[%s4789_s26 + $0x160] sm:$0xff]  ;;  %v354_v33 = vld [vmem:[%s4789_s26 + $0x168] sm:$0xff] }
  0xee   :  { %v3161_v9 = vpack.c.bf16 %v608_v61, %v607_v53 }
  0xf0   :  { %4806 = vst [vmem:[#allocation17_spill] sm:$0xff] %v3161_v9  ;;  %2101 = vmatpush3.bf16.msra.mxu1 %v3161_v9 }
  0xf2   :  { %v81_v43 = vld [vmem:[%s4788_s23 + $0xe0] sm:$0xff]  ;;  %v82_v45 = vld [vmem:[%s4788_s23 + $0xe8] sm:$0xff] }
  0xf3   :  { %v209_v48 = vmul.f32 0.99, %v81_v43  ;;  %v210_v50 = vmul.f32 0.99, %v82_v45  ;;  %873 = vst [vmem:[%s4790_s24 + $0x50] sm:$0xff] %v575_v40  ;;  %874 = vst [vmem:[%s4790_s24 + $0x58] sm:$0xff] %v576_v41 }
  0xf4   :  { %v481_v43 = vmul.f32 0.01, %v353_v32  ;;  %v482_v45 = vmul.f32 0.01, %v354_v33  ;;  %v324_v32 = vld [vmem:[%s4789_s26 + $0x78] sm:$0xff] }
  0xf5   :  { %v593_v2 = vadd.f32 %v465_v55, %v209_v48  ;;  %v594_v11 = vadd.f32 %v466_v62, %v210_v50  ;;  %v340_v55 = vld [vmem:[%s4789_s26 + $0xf8] sm:$0xff]  ;;  %v451_v33 = vmul.f32 0.01, %v323_v20 }
  0xf6   :  { %v468_v62 = vmul.f32 0.01, %v340_v55 }
  0xf7   :  { %v3182_v22 = vpack.c.bf16 %v594_v11, %v593_v2 }
  0xf9   :  { %4807 = vst [vmem:[#allocation18_spill] sm:$0xff] %v3182_v22  ;;  %2080 = vmatprep.subr.bf16.mxu0 %v3182_v22 }
  0xfa   :  { %v113_v59 = vld [vmem:[%s4788_s23 + $0x1e0] sm:$0xff]  ;;  %v114_v60 = vld [vmem:[%s4788_s23 + $0x1e8] sm:$0xff] }
  0xfb   :  { %v241_v0 = vmul.f32 0.99, %v113_v59  ;;  %v242_v1 = vmul.f32 0.99, %v114_v60  ;;  %905 = vst [vmem:[%s4790_s24 + $0x150] sm:$0xff] %v607_v53 }
  0xfd   :  { %v625_v23 = vadd.f32 %v497_v12, %v241_v0  ;;  %v626_v27 = vadd.f32 %v498_v14, %v242_v1 }
  0xff   :  { %v3200_v41 = vpack.c.bf16 %v626_v27, %v625_v23 }
 0x101   :  { %4808 = vst [vmem:[#allocation19_spill] sm:$0xff] %v3200_v41  ;;  %2102 = vmatprep.subr.bf16.mxu1 %v3200_v41 }
 0x102   :  { %v65_v8 = vld [vmem:[%s4788_s23 + $0x60] sm:$0xff] }
 0x103   :  { %906 = vst [vmem:[%s4790_s24 + $0x158] sm:$0xff] %v608_v61  ;;  %v193_v18 = vmul.f32 0.99, %v65_v8  ;;  %v467_v61 = vmul.f32 0.01, %v339_v54  ;;  %v371_v8 = vld [vmem:[%s4789_s26 + $0x1f0] sm:$0xff] }
 0x104   :  { %v499_v16 = vmul.f32 0.01, %v371_v8 }
 0x105   :  { %v577_v42 = vadd.f32 %v449_v29, %v193_v18 }
 0x10a   :  { %v66_v15 = vld [vmem:[%s4788_s23 + $0x68] sm:$0xff] }
 0x10b   :  { %891 = vst [vmem:[%s4790_s24 + $0xe0] sm:$0xff] %v593_v2  ;;  %v194_v19 = vmul.f32 0.99, %v66_v15 }
 0x10d   :  { %v578_v48 = vadd.f32 %v450_v34, %v194_v19 }
 0x10f   :  { %v3227_v2 = vpack.c.bf16 %v578_v48, %v577_v42 }
 0x111   :  { %4809 = vst [vmem:[#allocation20_spill] sm:$0xff] %v3227_v2  ;;  %2081 = vmatpush3.bf16.msra.mxu0 %v3227_v2 }
 0x112   :  { %v97_v21 = vld [vmem:[%s4788_s23 + $0x160] sm:$0xff] }
 0x113   :  { %892 = vst [vmem:[%s4790_s24 + $0xe8] sm:$0xff] %v594_v11  ;;  %v225_v36 = vmul.f32 0.99, %v97_v21  ;;  %v372_v11 = vld [vmem:[%s4789_s26 + $0x1f8] sm:$0xff] }
 0x114   :  { %v500_v21 = vmul.f32 0.01, %v372_v11 }
 0x115   :  { %v609_v59 = vadd.f32 %v481_v43, %v225_v36 }
 0x11a   :  { %v98_v30 = vld [vmem:[%s4788_s23 + $0x168] sm:$0xff] }
 0x11b   :  { %v226_v40 = vmul.f32 0.99, %v98_v30  ;;  %923 = vst [vmem:[%s4790_s24 + $0x1e0] sm:$0xff] %v625_v23  ;;  %924 = vst [vmem:[%s4790_s24 + $0x1e8] sm:$0xff] %v626_v27 }
 0x11d   :  { %v610_v60 = vadd.f32 %v482_v45, %v226_v40 }
 0x11f   :  { %v3241_v12 = vpack.c.bf16 %v610_v60, %v609_v59 }
 0x121   :  { %4810 = vst [vmem:[#allocation21_spill] sm:$0xff] %v3241_v12  ;;  %2103 = vmatpush3.bf16.msra.mxu1 %v3241_v12 }
 0x122   :  { %v83_v46 = vld [vmem:[%s4788_s23 + $0xf0] sm:$0xff]  ;;  %v84_v47 = vld [vmem:[%s4788_s23 + $0xf8] sm:$0xff] }
 0x123   :  { %v211_v50 = vmul.f32 0.99, %v83_v46  ;;  %v212_v53 = vmul.f32 0.99, %v84_v47  ;;  %875 = vst [vmem:[%s4790_s24 + $0x60] sm:$0xff] %v577_v42  ;;  %v355_v47 = vld [vmem:[%s4789_s26 + $0x170] sm:$0xff] }
 0x124   :  { %v452_v42 = vmul.f32 0.01, %v324_v32  ;;  %v483_v55 = vmul.f32 0.01, %v355_v47 }
 0x125   :  { %v595_v14 = vadd.f32 %v467_v61, %v211_v50  ;;  %v596_v15 = vadd.f32 %v468_v62, %v212_v53  ;;  %v1118_v50 = vld [vmem:[%s4812_s16 + $0x8] sm:$0xff]  ;;  %v1117_v61 = vld [vmem:[%s4812_s16] sm:$0xff] }
 0x126   :  { %v1126_v62 = vpack.c.bf16 %v1118_v50, %v1118_v50 }
 0x127   :  { %v3260_v29 = vpack.c.bf16 %v596_v15, %v595_v14 }
 0x128   :  { %1165 = vmatprep.mubr.bf16.mxu0 %v1126_v62 }
 0x129   :  { %4811 = vst [vmem:[#allocation22_spill] sm:$0xff] %v3260_v29  ;;  %2082 = vmatprep.subr.bf16.mxu0 %v3260_v29 }
 0x12a   :  { %v115_v0 = vld [vmem:[%s4788_s23 + $0x1f0] sm:$0xff]  ;;  %v116_v1 = vld [vmem:[%s4788_s23 + $0x1f8] sm:$0xff] }
 0x12b   :  { %876 = vst [vmem:[%s4790_s24 + $0x68] sm:$0xff] %v578_v48  ;;  %v243_v4 = vmul.f32 0.99, %v115_v0  ;;  %v244_v5 = vmul.f32 0.99, %v116_v1  ;;  %907 = vst [vmem:[%s4790_s24 + $0x160] sm:$0xff] %v609_v59 }
 0x12c   :  { %908 = vst [vmem:[%s4790_s24 + $0x168] sm:$0xff] %v610_v60  ;;  %v356_v48 = vld [vmem:[%s4789_s26 + $0x178] sm:$0xff]  ;;  %v1119_v1 = vld [vmem:[%s4812_s16 + $0x10] sm:$0xff] }
 0x12d   :  { %v627_v30 = vadd.f32 %v499_v16, %v243_v4  ;;  %v628_v40 = vadd.f32 %v500_v21, %v244_v5  ;;  %v484_v59 = vmul.f32 0.01, %v356_v48  ;;  %v1120_v60 = vld [vmem:[%s4812_s16 + $0x18] sm:$0xff]  ;;  %v390_v16 = vld [vmem:[%s4789_s26 + $0x288] sm:$0xff] }
 0x12e   :  { %v1128_v0 = vpack.c.bf16 %v1120_v60, %v1120_v60 }
 0x12f   :  { %v3287_v53 = vpack.c.bf16 %v628_v40, %v627_v30 }
 0x130   :  { %1205 = vmatprep.mubr.bf16.mxu1 %v1128_v0 }
 0x131   :  { %4813 = vst [vmem:[#allocation23_spill] sm:$0xff] %v3287_v53  ;;  %2104 = vmatprep.subr.bf16.mxu1 %v3287_v53  ;;  %v730_v53 = vld [vmem:[%s4679_s9 + $0x28] sm:$0xff] }
 0x132   :  { %v746_v12 = vmul.f32 0.01, %v730_v53 }
 0x133   :  { %v67_v18 = vld [vmem:[%s4788_s23 + $0x70] sm:$0xff]  ;;  %v68_v19 = vld [vmem:[%s4788_s23 + $0x78] sm:$0xff] }
 0x134   :  { %v195_v23 = vmul.f32 0.99, %v67_v18  ;;  %v196_v27 = vmul.f32 0.99, %v68_v19  ;;  %893 = vst [vmem:[%s4790_s24 + $0xf0] sm:$0xff] %v595_v14  ;;  %894 = vst [vmem:[%s4790_s24 + $0xf8] sm:$0xff] %v596_v15  ;;  %v1125_v19 = vpack.c.bf16 %v1117_v61, %v1117_v61 }
 0x135   :  { %v389_v15 = vld [vmem:[%s4789_s26 + $0x280] sm:$0xff]  ;;  %v374_v61 = vld [vmem:[%s4789_s26 + $0x208] sm:$0xff] }
 0x136   :  { %v579_v46 = vadd.f32 %v451_v33, %v195_v23  ;;  %v580_v54 = vadd.f32 %v452_v42, %v196_v27  ;;  %v517_v23 = vmul.f32 0.01, %v389_v15  ;;  %v405_v15 = vld [vmem:[%s4789_s26 + $0x300] sm:$0xff] }
 0x138   :  { %v3311_v8 = vpack.c.bf16 %v580_v54, %v579_v46 }
 0x13a   :  { %4814 = vst [vmem:[#allocation24_spill] sm:$0xff] %v3311_v8  ;;  %2083 = vmatpush3.bf16.msra.mxu0 %v3311_v8 }
 0x13b   :  { %v99_v34 = vld [vmem:[%s4788_s23 + $0x170] sm:$0xff]  ;;  %v100_v36 = vld [vmem:[%s4788_s23 + $0x178] sm:$0xff] }
 0x13c   :  { %v227_v43 = vmul.f32 0.99, %v99_v34  ;;  %v228_v45 = vmul.f32 0.99, %v100_v36  ;;  %925 = vst [vmem:[%s4790_s24 + $0x1f0] sm:$0xff] %v627_v30  ;;  %926 = vst [vmem:[%s4790_s24 + $0x1f8] sm:$0xff] %v628_v40  ;;  %v1127_v36 = vpack.c.bf16 %v1119_v1, %v1119_v1 }
 0x13d   :  { %877 = vst [vmem:[%s4790_s24 + $0x70] sm:$0xff] %v579_v46  ;;  %v518_v30 = vmul.f32 0.01, %v390_v16  ;;  %v421_v34 = vld [vmem:[%s4789_s26 + $0x380] sm:$0xff]  ;;  %1166 = vmatmul.mubr.bf16.vlgmr.msra.gmra.mrb[0].mxu0 %v1125_v19  ;;  %v406_v19 = vld [vmem:[%s4789_s26 + $0x308] sm:$0xff] }
 0x13e   :  { %v611_v11 = vadd.f32 %v483_v55, %v227_v43  ;;  %v612_v14 = vadd.f32 %v484_v59, %v228_v45  ;;  %v422_v43 = vld [vmem:[%s4789_s26 + $0x388] sm:$0xff]  ;;  %v549_v45 = vmul.f32 0.01, %v421_v34  ;;  %v373_v55 = vld [vmem:[%s4789_s26 + $0x200] sm:$0xff] }
 0x13f   :  { %v550_v48 = vmul.f32 0.01, %v422_v43  ;;  %v501_v62 = vmul.f32 0.01, %v373_v55  ;;  %v392_v43 = vld [vmem:[%s4789_s26 + $0x298] sm:$0xff] }
 0x140   :  { %v3329_v27 = vpack.c.bf16 %v612_v14, %v611_v11 }
 0x142   :  { %4815 = vst [vmem:[#allocation25_spill] sm:$0xff] %v3329_v27  ;;  %2105 = vmatpush3.bf16.msra.mxu1 %v3329_v27 }
 0x144   :  { %v133_v4 = vld [vmem:[%s4788_s23 + $0x280] sm:$0xff]  ;;  %v134_v5 = vld [vmem:[%s4788_s23 + $0x288] sm:$0xff] }
 0x145   :  { %878 = vst [vmem:[%s4790_s24 + $0x78] sm:$0xff] %v580_v54  ;;  %v261_v20 = vmul.f32 0.99, %v133_v4  ;;  %v262_v21 = vmul.f32 0.99, %v134_v5  ;;  %1206 = vmatmul.mubr.bf16.vlgmr.msra.gmra.mrb[0].mxu1 %v1127_v36  ;;  %v391_v36 = vld [vmem:[%s4789_s26 + $0x290] sm:$0xff] }
 0x146   :  { %v502_v5 = vmul.f32 0.01, %v374_v61 }
 0x147   :  { %v645_v40 = vadd.f32 %v517_v23, %v261_v20  ;;  %v646_v47 = vadd.f32 %v518_v30, %v262_v21  ;;  %v533_v20 = vmul.f32 0.01, %v405_v15 }
 0x149   :  { %v3362_v1 = vpack.c.bf16 %v646_v47, %v645_v40 }
 0x14b   :  { %4816 = vst [vmem:[#allocation26_spill] sm:$0xff] %v3362_v1  ;;  %2112 = vmatprep.subr.bf16.mxu0 %v3362_v1 }
 0x14c   :  { %v165_v18 = vld [vmem:[%s4788_s23 + $0x380] sm:$0xff] }
 0x14d   :  { %909 = vst [vmem:[%s4790_s24 + $0x170] sm:$0xff] %v611_v11  ;;  %910 = vst [vmem:[%s4790_s24 + $0x178] sm:$0xff] %v612_v14  ;;  %v293_v33 = vmul.f32 0.99, %v165_v18 }
 0x14f   :  { %v677_v59 = vadd.f32 %v549_v45, %v293_v33  ;;  %v519_v45 = vmul.f32 0.01, %v391_v36 }
 0x154   :  { %v166_v32 = vld [vmem:[%s4788_s23 + $0x388] sm:$0xff]  ;;  %v117_v46 = vld [vmem:[%s4788_s23 + $0x200] sm:$0xff] }
 0x155   :  { %v294_v42 = vmul.f32 0.99, %v166_v32  ;;  %v118_v50 = vld [vmem:[%s4788_s23 + $0x208] sm:$0xff]  ;;  %v245_v54 = vmul.f32 0.99, %v117_v46 }
 0x156   :  { %943 = vst [vmem:[%s4790_s24 + $0x280] sm:$0xff] %v645_v40  ;;  %v246_v60 = vmul.f32 0.99, %v118_v50  ;;  %v534_v32 = vmul.f32 0.01, %v406_v19 }
 0x157   :  { %v678_v4 = vadd.f32 %v550_v48, %v294_v42  ;;  %v629_v16 = vadd.f32 %v501_v62, %v245_v54  ;;  %v520_v50 = vmul.f32 0.01, %v392_v43  ;;  %v424_v62 = vld [vmem:[%s4789_s26 + $0x398] sm:$0xff]  ;;  %v407_v43 = vld [vmem:[%s4789_s26 + $0x310] sm:$0xff] }
 0x158   :  { %v630_v30 = vadd.f32 %v502_v5, %v246_v60 }
 0x159   :  { %v3383_v23 = vpack.c.bf16 %v678_v4, %v677_v59 }
 0x15b   :  { %4817 = vst [vmem:[#allocation27_spill] sm:$0xff] %v3383_v23  ;;  %2134 = vmatprep.subr.bf16.mxu1 %v3383_v23 }
 0x15d   :  { %v149_v0 = vld [vmem:[%s4788_s23 + $0x300] sm:$0xff] }
 0x15e   :  { %944 = vst [vmem:[%s4790_s24 + $0x288] sm:$0xff] %v646_v47  ;;  %v277_v14 = vmul.f32 0.99, %v149_v0  ;;  %v3404_v47 = vpack.c.bf16 %v630_v30, %v629_v16 }
 0x160   :  { %v661_v40 = vadd.f32 %v533_v20, %v277_v14  ;;  %2113 = vmatpush3.bf16.msra.mxu0 %v3404_v47  ;;  %v552_v14 = vmul.f32 0.01, %v424_v62 }
 0x165   :  { %v150_v11 = vld [vmem:[%s4788_s23 + $0x308] sm:$0xff] }
 0x166   :  { %975 = vst [vmem:[%s4790_s24 + $0x380] sm:$0xff] %v677_v59  ;;  %v278_v18 = vmul.f32 0.99, %v150_v11  ;;  %v423_v59 = vld [vmem:[%s4789_s26 + $0x390] sm:$0xff] }
 0x167   :  { %v551_v0 = vmul.f32 0.01, %v423_v59 }
 0x168   :  { %v662_v48 = vadd.f32 %v534_v32, %v278_v18  ;;  %v375_v18 = vld [vmem:[%s4789_s26 + $0x210] sm:$0xff] }
 0x16a   :  { %v3425_v5 = vpack.c.bf16 %v662_v48, %v661_v40 }
 0x16c   :  { %4818 = vst [vmem:[#allocation28_spill] sm:$0xff] %v3425_v5  ;;  %2135 = vmatpush3.bf16.msra.mxu1 %v3425_v5 }
 0x16d   :  { %v135_v21 = vld [vmem:[%s4788_s23 + $0x290] sm:$0xff] }
 0x16e   :  { %976 = vst [vmem:[%s4790_s24 + $0x388] sm:$0xff] %v678_v4  ;;  %v263_v34 = vmul.f32 0.99, %v135_v21  ;;  %v376_v21 = vld [vmem:[%s4789_s26 + $0x218] sm:$0xff] }
 0x16f   :  { %v504_v36 = vmul.f32 0.01, %v376_v21 }
 0x170   :  { %v647_v60 = vadd.f32 %v519_v45, %v263_v34 }
 0x175   :  { %v136_v33 = vld [vmem:[%s4788_s23 + $0x298] sm:$0xff] }
 0x176   :  { %927 = vst [vmem:[%s4790_s24 + $0x200] sm:$0xff] %v629_v16  ;;  %v264_v42 = vmul.f32 0.99, %v136_v33 }
 0x178   :  { %v648_v11 = vadd.f32 %v520_v50, %v264_v42  ;;  %v535_v50 = vmul.f32 0.01, %v407_v43 }
 0x17a   :  { %v3446_v33 = vpack.c.bf16 %v648_v11, %v647_v60 }
 0x17c   :  { %2114 = vmatprep.subr.bf16.mxu0 %v3446_v33 }
 0x17d   :  { %v167_v46 = vld [vmem:[%s4788_s23 + $0x390] sm:$0xff] }
 0x17e   :  { %928 = vst [vmem:[%s4790_s24 + $0x208] sm:$0xff] %v630_v30  ;;  %v295_v55 = vmul.f32 0.99, %v167_v46  ;;  %v503_v30 = vmul.f32 0.01, %v375_v18 }
 0x180   :  { %v679_v19 = vadd.f32 %v551_v0, %v295_v55  ;;  %v393_v0 = vld [vmem:[%s4789_s26 + $0x2a0] sm:$0xff] }
 0x185   :  { %v168_v54 = vld [vmem:[%s4788_s23 + $0x398] sm:$0xff] }
 0x186   :  { %959 = vst [vmem:[%s4790_s24 + $0x300] sm:$0xff] %v661_v40  ;;  %v296_v61 = vmul.f32 0.99, %v168_v54 }
 0x188   :  { %v680_v34 = vadd.f32 %v552_v14, %v296_v61  ;;  %v394_v14 = vld [vmem:[%s4789_s26 + $0x2a8] sm:$0xff] }
 0x18a   :  { %v3467_v55 = vpack.c.bf16 %v680_v34, %v679_v19 }
 0x18c   :  { %4819 = vst [vmem:[#allocation29_spill] sm:$0xff] %v3467_v55  ;;  %2136 = vmatprep.subr.bf16.mxu1 %v3467_v55 }
 0x18d   :  { %v119_v4 = vld [vmem:[%s4788_s23 + $0x210] sm:$0xff] }
 0x18e   :  { %960 = vst [vmem:[%s4790_s24 + $0x308] sm:$0xff] %v662_v48  ;;  %v247_v16 = vmul.f32 0.99, %v119_v4  ;;  %v408_v48 = vld [vmem:[%s4789_s26 + $0x318] sm:$0xff] }
 0x190   :  { %v631_v45 = vadd.f32 %v503_v30, %v247_v16 }
 0x195   :  { %v120_v15 = vld [vmem:[%s4788_s23 + $0x218] sm:$0xff] }
 0x196   :  { %945 = vst [vmem:[%s4790_s24 + $0x290] sm:$0xff] %v647_v60  ;;  %v248_v20 = vmul.f32 0.99, %v120_v15  ;;  %v536_v60 = vmul.f32 0.01, %v408_v48 }
 0x197   :  { %v521_v15 = vmul.f32 0.01, %v393_v0 }
 0x198   :  { %v632_v59 = vadd.f32 %v504_v36, %v248_v20  ;;  %v522_v20 = vmul.f32 0.01, %v394_v14 }
 0x19a   :  { %v3488_v18 = vpack.c.bf16 %v632_v59, %v631_v45 }
 0x19c   :  { %2115 = vmatpush3.bf16.msra.mxu0 %v3488_v18 }
 0x19d   :  { %v151_v32 = vld [vmem:[%s4788_s23 + $0x310] sm:$0xff] }
 0x19e   :  { %946 = vst [vmem:[%s4790_s24 + $0x298] sm:$0xff] %v648_v11  ;;  %v279_v42 = vmul.f32 0.99, %v151_v32  ;;  %v425_v32 = vld [vmem:[%s4789_s26 + $0x3a0] sm:$0xff] }
 0x1a0   :  { %v663_v4 = vadd.f32 %v535_v50, %v279_v42  ;;  %v553_v42 = vmul.f32 0.01, %v425_v32  ;;  %v410_v32 = vld [vmem:[%s4789_s26 + $0x328] sm:$0xff] }
 0x1a5   :  { %v152_v40 = vld [vmem:[%s4788_s23 + $0x318] sm:$0xff] }
 0x1a6   :  { %977 = vst [vmem:[%s4790_s24 + $0x390] sm:$0xff] %v679_v19  ;;  %v280_v46 = vmul.f32 0.99, %v152_v40  ;;  %v426_v40 = vld [vmem:[%s4789_s26 + $0x3a8] sm:$0xff] }
 0x1a7   :  { %v554_v48 = vmul.f32 0.01, %v426_v40 }
 0x1a8   :  { %v664_v19 = vadd.f32 %v536_v60, %v280_v46 }
 0x1ad   :  { %v137_v54 = vld [vmem:[%s4788_s23 + $0x2a0] sm:$0xff] }
 0x1ae   :  { %978 = vst [vmem:[%s4790_s24 + $0x398] sm:$0xff] %v680_v34  ;;  %v265_v62 = vmul.f32 0.99, %v137_v54 }
 0x1b0   :  { %v649_v34 = vadd.f32 %v521_v15, %v265_v62  ;;  %v378_v62 = vld [vmem:[%s4789_s26 + $0x228] sm:$0xff] }
 0x1b1   :  { %v506_v15 = vmul.f32 0.01, %v378_v62 }
 0x1b5   :  { %v138_v61 = vld [vmem:[%s4788_s23 + $0x2a8] sm:$0xff] }
 0x1b6   :  { %929 = vst [vmem:[%s4790_s24 + $0x210] sm:$0xff] %v631_v45  ;;  %v266_v11 = vmul.f32 0.99, %v138_v61  ;;  %v3509_v45 = vpack.c.bf16 %v664_v19, %v663_v4 }
 0x1b8   :  { %4820 = vst [vmem:[#allocation30_spill] sm:$0xff] %v3509_v45  ;;  %v650_v46 = vadd.f32 %v522_v20, %v266_v11  ;;  %2137 = vmatpush3.bf16.msra.mxu1 %v3509_v45  ;;  %v409_v20 = vld [vmem:[%s4789_s26 + $0x320] sm:$0xff] }
 0x1ba   :  { %v3530_v11 = vpack.c.bf16 %v650_v46, %v649_v34 }
 0x1bc   :  { %2116 = vmatprep.subr.bf16.mxu0 %v3530_v11 }
 0x1bd   :  { %v169_v16 = vld [vmem:[%s4788_s23 + $0x3a0] sm:$0xff] }
 0x1be   :  { %930 = vst [vmem:[%s4790_s24 + $0x218] sm:$0xff] %v632_v59  ;;  %v297_v30 = vmul.f32 0.99, %v169_v16  ;;  %v377_v59 = vld [vmem:[%s4789_s26 + $0x220] sm:$0xff] }
 0x1bf   :  { %v505_v0 = vmul.f32 0.01, %v377_v59 }
 0x1c0   :  { %v681_v60 = vadd.f32 %v553_v42, %v297_v30 }
 0x1c5   :  { %v170_v21 = vld [vmem:[%s4788_s23 + $0x3a8] sm:$0xff] }
 0x1c6   :  { %961 = vst [vmem:[%s4790_s24 + $0x310] sm:$0xff] %v663_v4  ;;  %v298_v36 = vmul.f32 0.99, %v170_v21 }
 0x1c8   :  { %v682_v14 = vadd.f32 %v554_v48, %v298_v36 }
 0x1ca   :  { %v3551_v40 = vpack.c.bf16 %v682_v14, %v681_v60 }
 0x1cc   :  { %4821 = vst [vmem:[#allocation31_spill] sm:$0xff] %v3551_v40  ;;  %2138 = vmatprep.subr.bf16.mxu1 %v3551_v40 }
 0x1cd   :  { %v121_v43 = vld [vmem:[%s4788_s23 + $0x220] sm:$0xff] }
 0x1ce   :  { %962 = vst [vmem:[%s4790_s24 + $0x318] sm:$0xff] %v664_v19  ;;  %v249_v54 = vmul.f32 0.99, %v121_v43  ;;  %v538_v43 = vmul.f32 0.01, %v410_v32 }
 0x1d0   :  { %v633_v21 = vadd.f32 %v505_v0, %v249_v54 }
 0x1d5   :  { %v122_v50 = vld [vmem:[%s4788_s23 + $0x228] sm:$0xff] }
 0x1d6   :  { %947 = vst [vmem:[%s4790_s24 + $0x2a0] sm:$0xff] %v649_v34  ;;  %v250_v61 = vmul.f32 0.99, %v122_v50  ;;  %v537_v34 = vmul.f32 0.01, %v409_v20  ;;  %v395_v50 = vld [vmem:[%s4789_s26 + $0x2b0] sm:$0xff] }
 0x1d8   :  { %v634_v42 = vadd.f32 %v506_v15, %v250_v61  ;;  %v523_v61 = vmul.f32 0.01, %v395_v50  ;;  %v379_v50 = vld [vmem:[%s4789_s26 + $0x230] sm:$0xff] }
 0x1da   :  { %v3572_v0 = vpack.c.bf16 %v634_v42, %v633_v21 }
 0x1dc   :  { %2117 = vmatpush3.bf16.msra.mxu0 %v3572_v0 }
 0x1dd   :  { %v153_v4 = vld [vmem:[%s4788_s23 + $0x320] sm:$0xff] }
 0x1de   :  { %948 = vst [vmem:[%s4790_s24 + $0x2a8] sm:$0xff] %v650_v46  ;;  %v281_v19 = vmul.f32 0.99, %v153_v4 }
 0x1e0   :  { %v665_v54 = vadd.f32 %v537_v34, %v281_v19  ;;  %v427_v19 = vld [vmem:[%s4789_s26 + $0x3b0] sm:$0xff] }
 0x1e5   :  { %v154_v16 = vld [vmem:[%s4788_s23 + $0x328] sm:$0xff] }
 0x1e6   :  { %979 = vst [vmem:[%s4790_s24 + $0x3a0] sm:$0xff] %v681_v60  ;;  %v282_v30 = vmul.f32 0.99, %v154_v16  ;;  %v396_v60 = vld [vmem:[%s4789_s26 + $0x2b8] sm:$0xff] }
 0x1e8   :  { %v666_v4 = vadd.f32 %v538_v43, %v282_v30  ;;  %v555_v30 = vmul.f32 0.01, %v427_v19 }
 0x1ed   :  { %v139_v36 = vld [vmem:[%s4788_s23 + $0x2b0] sm:$0xff] }
 0x1ee   :  { %980 = vst [vmem:[%s4790_s24 + $0x3a8] sm:$0xff] %v682_v14  ;;  %v267_v48 = vmul.f32 0.99, %v139_v36  ;;  %v524_v14 = vmul.f32 0.01, %v396_v60  ;;  %v3593_v36 = vpack.c.bf16 %v666_v4, %v665_v54 }
 0x1f0   :  { %v651_v20 = vadd.f32 %v523_v61, %v267_v48  ;;  %4822 = vst [vmem:[#allocation32_spill] sm:$0xff] %v3593_v36  ;;  %2139 = vmatpush3.bf16.msra.mxu1 %v3593_v36 }
 0x1f5   :  { %v140_v46 = vld [vmem:[%s4788_s23 + $0x2b8] sm:$0xff] }
 0x1f6   :  { %931 = vst [vmem:[%s4790_s24 + $0x220] sm:$0xff] %v633_v21  ;;  %v268_v59 = vmul.f32 0.99, %v140_v46  ;;  %v428_v21 = vld [vmem:[%s4789_s26 + $0x3b8] sm:$0xff] }
 0x1f7   :  { %v556_v43 = vmul.f32 0.01, %v428_v21  ;;  %v411_v21 = vld [vmem:[%s4789_s26 + $0x330] sm:$0xff] }
 0x1fd   :  { %v171_v62 = vld [vmem:[%s4788_s23 + $0x3b0] sm:$0xff] }
 0x1fe   :  { %932 = vst [vmem:[%s4790_s24 + $0x228] sm:$0xff] %v634_v42  ;;  %v299_v16 = vmul.f32 0.99, %v171_v62  ;;  %v652_v42 = vadd.f32 %v524_v14, %v268_v59  ;;  %v507_v59 = vmul.f32 0.01, %v379_v50 }
 0x200   :  { %v683_v60 = vadd.f32 %v555_v30, %v299_v16 }
 0x205   :  { %v172_v15 = vld [vmem:[%s4788_s23 + $0x3b8] sm:$0xff] }
 0x206   :  { %963 = vst [vmem:[%s4790_s24 + $0x320] sm:$0xff] %v665_v54  ;;  %v300_v32 = vmul.f32 0.99, %v172_v15  ;;  %v380_v54 = vld [vmem:[%s4789_s26 + $0x238] sm:$0xff] }
 0x207   :  { %v508_v15 = vmul.f32 0.01, %v380_v54 }
 0x208   :  { %v684_v14 = vadd.f32 %v556_v43, %v300_v32  ;;  %v539_v32 = vmul.f32 0.01, %v411_v21 }
 0x20a   :  { %v3635_v43 = vpack.c.bf16 %v684_v14, %v683_v60 }
 0x20c   :  { %4823 = vst [vmem:[#allocation33_spill] sm:$0xff] %v3635_v43  ;;  %2140 = vmatprep.subr.bf16.mxu1 %v3635_v43 }
 0x20d   :  { %v123_v34 = vld [vmem:[%s4788_s23 + $0x230] sm:$0xff] }
 0x20e   :  { %964 = vst [vmem:[%s4790_s24 + $0x328] sm:$0xff] %v666_v4  ;;  %v251_v48 = vmul.f32 0.99, %v123_v34  ;;  %v3614_v4 = vpack.c.bf16 %v652_v42, %v651_v20 }
 0x210   :  { %v635_v30 = vadd.f32 %v507_v59, %v251_v48  ;;  %2118 = vmatprep.subr.bf16.mxu0 %v3614_v4  ;;  %v397_v59 = vld [vmem:[%s4789_s26 + $0x2c0] sm:$0xff] }
 0x215   :  { %v124_v46 = vld [vmem:[%s4788_s23 + $0x238] sm:$0xff] }
 0x216   :  { %949 = vst [vmem:[%s4790_s24 + $0x2b0] sm:$0xff] %v651_v20  ;;  %v252_v61 = vmul.f32 0.99, %v124_v46  ;;  %v412_v20 = vld [vmem:[%s4789_s26 + $0x338] sm:$0xff] }
 0x217   :  { %v540_v48 = vmul.f32 0.01, %v412_v20 }
 0x218   :  { %v636_v46 = vadd.f32 %v508_v15, %v252_v61  ;;  %v525_v61 = vmul.f32 0.01, %v397_v59 }
 0x21a   :  { %v3656_v15 = vpack.c.bf16 %v636_v46, %v635_v30 }
 0x21c   :  { %2119 = vmatpush3.bf16.msra.mxu0 %v3656_v15 }
 0x21d   :  { %v155_v62 = vld [vmem:[%s4788_s23 + $0x330] sm:$0xff] }
 0x21e   :  { %950 = vst [vmem:[%s4790_s24 + $0x2b8] sm:$0xff] %v652_v42  ;;  %v283_v19 = vmul.f32 0.99, %v155_v62 }
 0x220   :  { %v667_v62 = vadd.f32 %v539_v32, %v283_v19 }
 0x225   :  { %v156_v16 = vld [vmem:[%s4788_s23 + $0x338] sm:$0xff] }
 0x226   :  { %981 = vst [vmem:[%s4790_s24 + $0x3b0] sm:$0xff] %v683_v60  ;;  %v284_v34 = vmul.f32 0.99, %v156_v16  ;;  %v398_v60 = vld [vmem:[%s4789_s26 + $0x2c8] sm:$0xff] }
 0x227   :  { %v526_v19 = vmul.f32 0.01, %v398_v60 }
 0x228   :  { %v668_v21 = vadd.f32 %v540_v48, %v284_v34 }
 0x22a   :  { %v3677_v48 = vpack.c.bf16 %v668_v21, %v667_v62 }
 0x22c   :  { %4824 = vst [vmem:[#allocation34_spill] sm:$0xff] %v3677_v48  ;;  %2141 = vmatpush3.bf16.msra.mxu1 %v3677_v48 }
 0x22d   :  { %v141_v42 = vld [vmem:[%s4788_s23 + $0x2c0] sm:$0xff] }
 0x22e   :  { %982 = vst [vmem:[%s4790_s24 + $0x3b8] sm:$0xff] %v684_v14  ;;  %v269_v54 = vmul.f32 0.99, %v141_v42  ;;  %v429_v42 = vld [vmem:[%s4789_s26 + $0x3c0] sm:$0xff] }
 0x22f   :  { %v557_v34 = vmul.f32 0.01, %v429_v42 }
 0x235   :  { %v142_v50 = vld [vmem:[%s4788_s23 + $0x2c8] sm:$0xff] }
 0x236   :  { %933 = vst [vmem:[%s4790_s24 + $0x230] sm:$0xff] %v635_v30  ;;  %v270_v16 = vmul.f32 0.99, %v142_v50  ;;  %v653_v50 = vadd.f32 %v525_v61, %v269_v54  ;;  %v430_v30 = vld [vmem:[%s4789_s26 + $0x3c8] sm:$0xff] }
 0x237   :  { %v558_v54 = vmul.f32 0.01, %v430_v30 }
 0x238   :  { %v654_v60 = vadd.f32 %v526_v19, %v270_v16 }
 0x23a   :  { %v3698_v19 = vpack.c.bf16 %v654_v60, %v653_v50 }
 0x23c   :  { %2120 = vmatprep.subr.bf16.mxu0 %v3698_v19 }
 0x23d   :  { %v173_v14 = vld [vmem:[%s4788_s23 + $0x3c0] sm:$0xff] }
 0x23e   :  { %934 = vst [vmem:[%s4790_s24 + $0x238] sm:$0xff] %v636_v46  ;;  %v301_v32 = vmul.f32 0.99, %v173_v14 }
 0x240   :  { %v685_v42 = vadd.f32 %v557_v34, %v301_v32 }
 0x245   :  { %v174_v20 = vld [vmem:[%s4788_s23 + $0x3c8] sm:$0xff] }
 0x246   :  { %965 = vst [vmem:[%s4790_s24 + $0x330] sm:$0xff] %v667_v62  ;;  %v302_v59 = vmul.f32 0.99, %v174_v20  ;;  %v381_v20 = vld [vmem:[%s4789_s26 + $0x240] sm:$0xff]  ;;  %v382_v62 = vld [vmem:[%s4789_s26 + $0x248] sm:$0xff] }
 0x247   :  { %v509_v16 = vmul.f32 0.01, %v381_v20  ;;  %v510_v32 = vmul.f32 0.01, %v382_v62 }
 0x248   :  { %v686_v30 = vadd.f32 %v558_v54, %v302_v59 }
 0x24a   :  { %v3719_v54 = vpack.c.bf16 %v686_v30, %v685_v42 }
 0x24c   :  { %4825 = vst [vmem:[#allocation35_spill] sm:$0xff] %v3719_v54  ;;  %2142 = vmatprep.subr.bf16.mxu1 %v3719_v54 }
 0x24d   :  { %v125_v46 = vld [vmem:[%s4788_s23 + $0x240] sm:$0xff] }
 0x24e   :  { %966 = vst [vmem:[%s4790_s24 + $0x338] sm:$0xff] %v668_v21  ;;  %v253_v14 = vmul.f32 0.99, %v125_v46 }
 0x250   :  { %v637_v20 = vadd.f32 %v509_v16, %v253_v14 }
 0x255   :  { %v126_v61 = vld [vmem:[%s4788_s23 + $0x248] sm:$0xff] }
 0x256   :  { %951 = vst [vmem:[%s4790_s24 + $0x2c0] sm:$0xff] %v653_v50  ;;  %v254_v43 = vmul.f32 0.99, %v126_v61  ;;  %v413_v61 = vld [vmem:[%s4789_s26 + $0x340] sm:$0xff]  ;;  %v414_v50 = vld [vmem:[%s4789_s26 + $0x348] sm:$0xff] }
 0x257   :  { %v541_v59 = vmul.f32 0.01, %v413_v61  ;;  %v542_v14 = vmul.f32 0.01, %v414_v50 }
 0x258   :  { %v638_v62 = vadd.f32 %v510_v32, %v254_v43  ;;  %v400_v43 = vld [vmem:[%s4789_s26 + $0x2d8] sm:$0xff] }
 0x25a   :  { %v3740_v32 = vpack.c.bf16 %v638_v62, %v637_v20 }
 0x25c   :  { %2121 = vmatpush3.bf16.msra.mxu0 %v3740_v32 }
 0x25d   :  { %v157_v21 = vld [vmem:[%s4788_s23 + $0x340] sm:$0xff] }
 0x25e   :  { %952 = vst [vmem:[%s4790_s24 + $0x2c8] sm:$0xff] %v654_v60  ;;  %v285_v46 = vmul.f32 0.99, %v157_v21 }
 0x260   :  { %v669_v61 = vadd.f32 %v541_v59, %v285_v46  ;;  %v528_v46 = vmul.f32 0.01, %v400_v43 }
 0x265   :  { %v158_v34 = vld [vmem:[%s4788_s23 + $0x348] sm:$0xff] }
 0x266   :  { %983 = vst [vmem:[%s4790_s24 + $0x3c0] sm:$0xff] %v685_v42  ;;  %v286_v48 = vmul.f32 0.99, %v158_v34  ;;  %v399_v34 = vld [vmem:[%s4789_s26 + $0x2d0] sm:$0xff] }
 0x267   :  { %v527_v42 = vmul.f32 0.01, %v399_v34 }
 0x268   :  { %v670_v50 = vadd.f32 %v542_v14, %v286_v48  ;;  %v432_v48 = vld [vmem:[%s4789_s26 + $0x3d8] sm:$0xff] }
 0x26a   :  { %v3761_v14 = vpack.c.bf16 %v670_v50, %v669_v61 }
 0x26c   :  { %4826 = vst [vmem:[#allocation36_spill] sm:$0xff] %v3761_v14  ;;  %2143 = vmatpush3.bf16.msra.mxu1 %v3761_v14 }
 0x26d   :  { %v143_v60 = vld [vmem:[%s4788_s23 + $0x2d0] sm:$0xff] }
 0x26e   :  { %984 = vst [vmem:[%s4790_s24 + $0x3c8] sm:$0xff] %v686_v30  ;;  %v271_v21 = vmul.f32 0.99, %v143_v60 }
 0x270   :  { %v655_v34 = vadd.f32 %v527_v42, %v271_v21  ;;  %v560_v21 = vmul.f32 0.01, %v432_v48 }
 0x275   :  { %v144_v16 = vld [vmem:[%s4788_s23 + $0x2d8] sm:$0xff] }
 0x276   :  { %935 = vst [vmem:[%s4790_s24 + $0x240] sm:$0xff] %v637_v20  ;;  %v272_v36 = vmul.f32 0.99, %v144_v16  ;;  %v431_v16 = vld [vmem:[%s4789_s26 + $0x3d0] sm:$0xff] }
 0x277   :  { %v559_v20 = vmul.f32 0.01, %v431_v16 }
 0x278   :  { %v656_v43 = vadd.f32 %v528_v46, %v272_v36  ;;  %v384_v36 = vld [vmem:[%s4789_s26 + $0x258] sm:$0xff] }
 0x27a   :  { %v3782_v46 = vpack.c.bf16 %v656_v43, %v655_v34 }
 0x27c   :  { %2122 = vmatprep.subr.bf16.mxu0 %v3782_v46 }
 0x27d   :  { %v175_v30 = vld [vmem:[%s4788_s23 + $0x3d0] sm:$0xff] }
 0x27e   :  { %936 = vst [vmem:[%s4790_s24 + $0x248] sm:$0xff] %v638_v62  ;;  %v303_v60 = vmul.f32 0.99, %v175_v30 }
 0x280   :  { %v687_v16 = vadd.f32 %v559_v20, %v303_v60  ;;  %v512_v60 = vmul.f32 0.01, %v384_v36 }
 0x285   :  { %v176_v59 = vld [vmem:[%s4788_s23 + $0x3d8] sm:$0xff] }
 0x286   :  { %967 = vst [vmem:[%s4790_s24 + $0x340] sm:$0xff] %v669_v61  ;;  %v304_v54 = vmul.f32 0.99, %v176_v59  ;;  %v383_v59 = vld [vmem:[%s4789_s26 + $0x250] sm:$0xff] }
 0x287   :  { %v511_v61 = vmul.f32 0.01, %v383_v59 }
 0x288   :  { %v688_v48 = vadd.f32 %v560_v21, %v304_v54  ;;  %v416_v54 = vld [vmem:[%s4789_s26 + $0x358] sm:$0xff] }
 0x28a   :  { %v3803_v21 = vpack.c.bf16 %v688_v48, %v687_v16 }
 0x28c   :  { %4827 = vst [vmem:[#allocation37_spill] sm:$0xff] %v3803_v21  ;;  %2144 = vmatprep.subr.bf16.mxu1 %v3803_v21 }
 0x28d   :  { %v127_v62 = vld [vmem:[%s4788_s23 + $0x250] sm:$0xff] }
 0x28e   :  { %968 = vst [vmem:[%s4790_s24 + $0x348] sm:$0xff] %v670_v50  ;;  %v255_v30 = vmul.f32 0.99, %v127_v62 }
 0x290   :  { %v639_v59 = vadd.f32 %v511_v61, %v255_v30  ;;  %v544_v30 = vmul.f32 0.01, %v416_v54 }
 0x295   :  { %v128_v42 = vld [vmem:[%s4788_s23 + $0x258] sm:$0xff] }
 0x296   :  { %953 = vst [vmem:[%s4790_s24 + $0x2d0] sm:$0xff] %v655_v34  ;;  %v256_v40 = vmul.f32 0.99, %v128_v42  ;;  %v415_v42 = vld [vmem:[%s4789_s26 + $0x350] sm:$0xff] }
 0x297   :  { %v543_v34 = vmul.f32 0.01, %v415_v42 }
 0x298   :  { %v640_v36 = vadd.f32 %v512_v60, %v256_v40  ;;  %v402_v40 = vld [vmem:[%s4789_s26 + $0x2e8] sm:$0xff] }
 0x29a   :  { %v3824_v60 = vpack.c.bf16 %v640_v36, %v639_v59 }
 0x29c   :  { %2123 = vmatpush3.bf16.msra.mxu0 %v3824_v60 }
 0x29d   :  { %v159_v50 = vld [vmem:[%s4788_s23 + $0x350] sm:$0xff] }
 0x29e   :  { %954 = vst [vmem:[%s4790_s24 + $0x2d8] sm:$0xff] %v656_v43  ;;  %v287_v62 = vmul.f32 0.99, %v159_v50 }
 0x2a0   :  { %v671_v42 = vadd.f32 %v543_v34, %v287_v62  ;;  %v530_v62 = vmul.f32 0.01, %v402_v40 }
 0x2a5   :  { %v160_v20 = vld [vmem:[%s4788_s23 + $0x358] sm:$0xff] }
 0x2a6   :  { %985 = vst [vmem:[%s4790_s24 + $0x3d0] sm:$0xff] %v687_v16  ;;  %v288_v14 = vmul.f32 0.99, %v160_v20  ;;  %v401_v20 = vld [vmem:[%s4789_s26 + $0x2e0] sm:$0xff] }
 0x2a7   :  { %v529_v16 = vmul.f32 0.01, %v401_v20 }
 0x2a8   :  { %v672_v54 = vadd.f32 %v544_v30, %v288_v14  ;;  %v434_v14 = vld [vmem:[%s4789_s26 + $0x3e8] sm:$0xff] }
 0x2aa   :  { %v3845_v30 = vpack.c.bf16 %v672_v54, %v671_v42 }
 0x2ac   :  { %4828 = vst [vmem:[#allocation38_spill] sm:$0xff] %v3845_v30  ;;  %2145 = vmatpush3.bf16.msra.mxu1 %v3845_v30 }
 0x2ad   :  { %v145_v43 = vld [vmem:[%s4788_s23 + $0x2e0] sm:$0xff] }
 0x2ae   :  { %986 = vst [vmem:[%s4790_s24 + $0x3d8] sm:$0xff] %v688_v48  ;;  %v273_v50 = vmul.f32 0.99, %v145_v43 }
 0x2b0   :  { %v657_v20 = vadd.f32 %v529_v16, %v273_v50  ;;  %v562_v50 = vmul.f32 0.01, %v434_v14 }
 0x2b5   :  { %v146_v61 = vld [vmem:[%s4788_s23 + $0x2e8] sm:$0xff] }
 0x2b6   :  { %937 = vst [vmem:[%s4790_s24 + $0x250] sm:$0xff] %v639_v59  ;;  %v274_v45 = vmul.f32 0.99, %v146_v61  ;;  %v433_v61 = vld [vmem:[%s4789_s26 + $0x3e0] sm:$0xff] }
 0x2b7   :  { %v561_v59 = vmul.f32 0.01, %v433_v61 }
 0x2b8   :  { %v658_v40 = vadd.f32 %v530_v62, %v274_v45  ;;  %v386_v45 = vld [vmem:[%s4789_s26 + $0x268] sm:$0xff] }
 0x2ba   :  { %v3866_v62 = vpack.c.bf16 %v658_v40, %v657_v20 }
 0x2bc   :  { %2124 = vmatprep.subr.bf16.mxu0 %v3866_v62 }
 0x2bd   :  { %v177_v48 = vld [vmem:[%s4788_s23 + $0x3e0] sm:$0xff] }
 0x2be   :  { %938 = vst [vmem:[%s4790_s24 + $0x258] sm:$0xff] %v640_v36  ;;  %v305_v43 = vmul.f32 0.99, %v177_v48 }
 0x2c0   :  { %v689_v61 = vadd.f32 %v561_v59, %v305_v43  ;;  %v514_v43 = vmul.f32 0.01, %v386_v45 }
 0x2c5   :  { %v178_v34 = vld [vmem:[%s4788_s23 + $0x3e8] sm:$0xff] }
 0x2c6   :  { %969 = vst [vmem:[%s4790_s24 + $0x350] sm:$0xff] %v671_v42  ;;  %v306_v21 = vmul.f32 0.99, %v178_v34  ;;  %v385_v34 = vld [vmem:[%s4789_s26 + $0x260] sm:$0xff] }
 0x2c7   :  { %v513_v42 = vmul.f32 0.01, %v385_v34 }
 0x2c8   :  { %v690_v14 = vadd.f32 %v562_v50, %v306_v21  ;;  %v418_v21 = vld [vmem:[%s4789_s26 + $0x368] sm:$0xff] }
 0x2ca   :  { %v3887_v50 = vpack.c.bf16 %v690_v14, %v689_v61 }
 0x2cc   :  { %4829 = vst [vmem:[#allocation39_spill] sm:$0xff] %v3887_v50  ;;  %2146 = vmatprep.subr.bf16.mxu1 %v3887_v50 }
 0x2cd   :  { %v129_v36 = vld [vmem:[%s4788_s23 + $0x260] sm:$0xff] }
 0x2ce   :  { %970 = vst [vmem:[%s4790_s24 + $0x358] sm:$0xff] %v672_v54  ;;  %v257_v48 = vmul.f32 0.99, %v129_v36 }
 0x2d0   :  { %v641_v34 = vadd.f32 %v513_v42, %v257_v48  ;;  %v546_v48 = vmul.f32 0.01, %v418_v21 }
 0x2d5   :  { %v130_v16 = vld [vmem:[%s4788_s23 + $0x268] sm:$0xff] }
 0x2d6   :  { %955 = vst [vmem:[%s4790_s24 + $0x2e0] sm:$0xff] %v657_v20  ;;  %v258_v55 = vmul.f32 0.99, %v130_v16  ;;  %v417_v16 = vld [vmem:[%s4789_s26 + $0x360] sm:$0xff] }
 0x2d7   :  { %v545_v20 = vmul.f32 0.01, %v417_v16 }
 0x2d8   :  { %v642_v45 = vadd.f32 %v514_v43, %v258_v55  ;;  %v404_v55 = vld [vmem:[%s4789_s26 + $0x2f8] sm:$0xff] }
 0x2da   :  { %v3908_v43 = vpack.c.bf16 %v642_v45, %v641_v34 }
 0x2dc   :  { %2125 = vmatpush3.bf16.msra.mxu0 %v3908_v43 }
 0x2dd   :  { %v161_v54 = vld [vmem:[%s4788_s23 + $0x360] sm:$0xff] }
 0x2de   :  { %956 = vst [vmem:[%s4790_s24 + $0x2e8] sm:$0xff] %v658_v40  ;;  %v289_v36 = vmul.f32 0.99, %v161_v54 }
 0x2e0   :  { %v673_v16 = vadd.f32 %v545_v20, %v289_v36  ;;  %v532_v36 = vmul.f32 0.01, %v404_v55 }
 0x2e5   :  { %v162_v59 = vld [vmem:[%s4788_s23 + $0x368] sm:$0xff] }
 0x2e6   :  { %987 = vst [vmem:[%s4790_s24 + $0x3e0] sm:$0xff] %v689_v61  ;;  %v290_v30 = vmul.f32 0.99, %v162_v59  ;;  %v403_v59 = vld [vmem:[%s4789_s26 + $0x2f0] sm:$0xff] }
 0x2e7   :  { %v531_v61 = vmul.f32 0.01, %v403_v59 }
 0x2e8   :  { %v674_v21 = vadd.f32 %v546_v48, %v290_v30  ;;  %v436_v30 = vld [vmem:[%s4789_s26 + $0x3f8] sm:$0xff] }
 0x2ea   :  { %v3929_v48 = vpack.c.bf16 %v674_v21, %v673_v16 }
 0x2ec   :  { %4830 = vst [vmem:[#allocation40_spill] sm:$0xff] %v3929_v48  ;;  %2147 = vmatpush3.bf16.msra.mxu1 %v3929_v48 }
 0x2ed   :  { %v147_v40 = vld [vmem:[%s4788_s23 + $0x2f0] sm:$0xff] }
 0x2ee   :  { %988 = vst [vmem:[%s4790_s24 + $0x3e8] sm:$0xff] %v690_v14  ;;  %v275_v54 = vmul.f32 0.99, %v147_v40 }
 0x2f0   :  { %v659_v59 = vadd.f32 %v531_v61, %v275_v54  ;;  %v564_v54 = vmul.f32 0.01, %v436_v30 }
 0x2f5   :  { %v148_v42 = vld [vmem:[%s4788_s23 + $0x2f8] sm:$0xff] }
 0x2f6   :  { %939 = vst [vmem:[%s4790_s24 + $0x260] sm:$0xff] %v641_v34  ;;  %v276_v5 = vmul.f32 0.99, %v148_v42  ;;  %v435_v42 = vld [vmem:[%s4789_s26 + $0x3f0] sm:$0xff] }
 0x2f7   :  { %v563_v34 = vmul.f32 0.01, %v435_v42 }
 0x2f8   :  { %v660_v55 = vadd.f32 %v532_v36, %v276_v5  ;;  %v388_v5 = vld [vmem:[%s4789_s26 + $0x278] sm:$0xff] }
 0x2fa   :  { %v3950_v36 = vpack.c.bf16 %v660_v55, %v659_v59 }
 0x2fc   :  { %2126 = vmatprep.subr.bf16.mxu0 %v3950_v36 }
 0x2fd   :  { %v179_v14 = vld [vmem:[%s4788_s23 + $0x3f0] sm:$0xff] }
 0x2fe   :  { %940 = vst [vmem:[%s4790_s24 + $0x268] sm:$0xff] %v642_v45  ;;  %v307_v40 = vmul.f32 0.99, %v179_v14 }
 0x300   :  { %v691_v42 = vadd.f32 %v563_v34, %v307_v40  ;;  %v516_v40 = vmul.f32 0.01, %v388_v5 }
 0x305   :  { %v180_v20 = vld [vmem:[%s4788_s23 + $0x3f8] sm:$0xff] }
 0x306   :  { %971 = vst [vmem:[%s4790_s24 + $0x360] sm:$0xff] %v673_v16  ;;  %v308_v50 = vmul.f32 0.99, %v180_v20  ;;  %v387_v20 = vld [vmem:[%s4789_s26 + $0x270] sm:$0xff] }
 0x307   :  { %v515_v16 = vmul.f32 0.01, %v387_v20 }
 0x308   :  { %v692_v30 = vadd.f32 %v564_v54, %v308_v50  ;;  %v420_v50 = vld [vmem:[%s4789_s26 + $0x378] sm:$0xff] }
 0x30a   :  { %v3971_v54 = vpack.c.bf16 %v692_v30, %v691_v42 }
 0x30c   :  { %4831 = vst [vmem:[#allocation41_spill] sm:$0xff] %v3971_v54  ;;  %2148 = vmatprep.subr.bf16.mxu1 %v3971_v54 }
 0x30d   :  { %v131_v45 = vld [vmem:[%s4788_s23 + $0x270] sm:$0xff] }
 0x30e   :  { %972 = vst [vmem:[%s4790_s24 + $0x368] sm:$0xff] %v674_v21  ;;  %v259_v14 = vmul.f32 0.99, %v131_v45 }
 0x310   :  { %v643_v20 = vadd.f32 %v515_v16, %v259_v14  ;;  %v548_v14 = vmul.f32 0.01, %v420_v50 }
 0x315   :  { %v132_v61 = vld [vmem:[%s4788_s23 + $0x278] sm:$0xff] }
 0x316   :  { %957 = vst [vmem:[%s4790_s24 + $0x2f0] sm:$0xff] %v659_v59  ;;  %v260_v23 = vmul.f32 0.99, %v132_v61  ;;  %v419_v61 = vld [vmem:[%s4789_s26 + $0x370] sm:$0xff]  ;;  %s4833_s26 = sld [smem:[#allocation56_spill]] }
 0x317   :  { %v547_v59 = vmul.f32 0.01, %v419_v61 }
 0x318   :  { %v644_v5 = vadd.f32 %v516_v40, %v260_v23 }
 0x31a   :  { %v3986_v23 = vpack.c.bf16 %v644_v5, %v643_v20 }
 0x31c   :  { %2127 = vmatpush3.bf16.msra.mxu0 %v3986_v23  ;;  %v694_v50 = vld [vmem:[%s4833_s26 + $0x8] sm:$0xff] }
 0x31d   :  { %v163_v21 = vld [vmem:[%s4788_s23 + $0x370] sm:$0xff] }
 0x31e   :  { %958 = vst [vmem:[%s4790_s24 + $0x2f8] sm:$0xff] %v660_v55  ;;  %v291_v45 = vmul.f32 0.99, %v163_v21  ;;  %v1122_v55 = vld [vmem:[%s4812_s16 + $0x28] sm:$0xff]  ;;  %v1124_v21 = vld [vmem:[%s4812_s16 + $0x38] sm:$0xff] }
 0x31f   :  { %v1130_v16 = vpack.c.bf16 %v1122_v55, %v1122_v55  ;;  %v1132_v27 = vpack.c.bf16 %v1124_v21, %v1124_v21 }
 0x320   :  { %v675_v61 = vadd.f32 %v547_v59, %v291_v45  ;;  %v725_v59 = vld [vmem:[%s4679_s9] sm:$0xff] }
 0x321   :  { %1245 = vmatprep.mubr.bf16.mxu0 %v1130_v16  ;;  %1285 = vmatprep.mubr.bf16.mxu1 %v1132_v27  ;;  %v693_v27 = vld [vmem:[%s4833_s26] sm:$0xff]  ;;  %v695_v16 = vld [vmem:[%s4833_s26 + $0x10] sm:$0xff]  ;;  %v741_v21 = vmul.f32 0.01, %v725_v59 }
 0x322   :  { %v709_v55 = vmul.f32 0.99, %v693_v27  ;;  %v697_v27 = vld [vmem:[%s4833_s26 + $0x20] sm:$0xff] }
 0x325   :  { %v164_v34 = vld [vmem:[%s4788_s23 + $0x378] sm:$0xff] }
 0x326   :  { %989 = vst [vmem:[%s4790_s24 + $0x3f0] sm:$0xff] %v691_v42  ;;  %v292_v48 = vmul.f32 0.99, %v164_v34  ;;  %990 = vst [vmem:[%s4790_s24 + $0x3f8] sm:$0xff] %v692_v30  ;;  %v1121_v34 = vld [vmem:[%s4812_s16 + $0x20] sm:$0xff]  ;;  %v1123_v30 = vld [vmem:[%s4812_s16 + $0x30] sm:$0xff] }
 0x327   :  { %941 = vst [vmem:[%s4790_s24 + $0x270] sm:$0xff] %v643_v20  ;;  %942 = vst [vmem:[%s4790_s24 + $0x278] sm:$0xff] %v644_v5  ;;  %v1129_v40 = vpack.c.bf16 %v1121_v34, %v1121_v34  ;;  %v4730_v20 = vmov 0.0   ;;  %v710_v5 = vmul.f32 0.99, %v694_v50  ;;  %v757_v50 = vadd.f32 %v741_v21, %v709_v55  ;;  %v699_v55 = vld [vmem:[%s4833_s26 + $0x30] sm:$0xff] }
 0x328   :  { %v676_v42 = vadd.f32 %v548_v14, %v292_v48  ;;  %973 = vst [vmem:[%s4790_s24 + $0x370] sm:$0xff] %v675_v61  ;;  %v1131_v48 = vpack.c.bf16 %v1123_v30, %v1123_v30  ;;  %2386 = vmatprep.subr.bf16.mxu0 %v4730_v20  ;;  %v726_v14 = vld [vmem:[%s4679_s9 + $0x8] sm:$0xff]  ;;  %v711_v30 = vmul.f32 0.99, %v695_v16  ;;  %v729_v16 = vld [vmem:[%s4679_s9 + $0x20] sm:$0xff] }
 0x329   :  { %1246 = vmatmul.mubr.bf16.vlgmr.msra.gmra.mrb[4].mxu0 %v1129_v40  ;;  %v742_v34 = vmul.f32 0.01, %v726_v14  ;;  %v715_v41 = vmul.f32 0.99, %v699_v55 }
 0x32a   :  { %974 = vst [vmem:[%s4790_s24 + $0x378] sm:$0xff] %v676_v42  ;;  %v3998_v45 = vpack.c.bf16 %v676_v42, %v675_v61  ;;  %v696_v61 = vld [vmem:[%s4833_s26 + $0x18] sm:$0xff]  ;;  %v727_v42 = vld [vmem:[%s4679_s9 + $0x10] sm:$0xff] }
 0x32b   :  { %v712_v40 = vmul.f32 0.99, %v696_v61  ;;  %v758_v59 = vadd.f32 %v742_v34, %v710_v5  ;;  %v743_v14 = vmul.f32 0.01, %v727_v42  ;;  %v713_v61 = vmul.f32 0.99, %v697_v27 }
 0x32c   :  { %4832 = vst [vmem:[#allocation42_spill] sm:$0xff] %v3998_v45  ;;  %2149 = vmatpush3.bf16.msra.mxu1 %v3998_v45  ;;  %v698_v45 = vld [vmem:[%s4833_s26 + $0x28] sm:$0xff]  ;;  %v745_v34 = vmul.f32 0.01, %v729_v16  ;;  %v732_v27 = vld [vmem:[%s4679_s9 + $0x38] sm:$0xff] }
 0x32d   :  { %2406 = vmatprep.subr.bf16.mxu1 %v4730_v20  ;;  %v714_v54 = vmul.f32 0.99, %v698_v45  ;;  %991 = vst [vmem:[%s4680_s17] sm:$0xff] %v757_v50  ;;  %992 = vst [vmem:[%s4680_s17 + $0x8] sm:$0xff] %v758_v59  ;;  %v4048_v5 = vpack.c.bf16 %v758_v59, %v757_v50  ;;  %v759_v21 = vadd.f32 %v743_v14, %v711_v30  ;;  %v748_v50 = vmul.f32 0.01, %v732_v27 }
 0x32e   :  { %v761_v30 = vadd.f32 %v745_v34, %v713_v61  ;;  %v4834_v14 = vmov 0.0   ;;  %v734_v61 = vld [vmem:[%s4679_s9 + $0x48] sm:$0xff] }
 0x32f   :  { %1286 = vmatmul.mubr.bf16.vlgmr.msra.gmra.mrb[4].mxu1 %v1131_v48  ;;  %v728_v48 = vld [vmem:[%s4679_s9 + $0x18] sm:$0xff]  ;;  %2387 = vmatpush3.bf16.msra.mxu0 %v4048_v5  ;;  %v762_v16 = vadd.f32 %v746_v12, %v714_v54  ;;  %v750_v27 = vmul.f32 0.01, %v734_v61 }
 0x330   :  { %v744_v20 = vmul.f32 0.01, %v728_v48  ;;  %v731_v48 = vld [vmem:[%s4679_s9 + $0x30] sm:$0xff]  ;;  %2388 = vmatprep.subr.bf16.mxu0 %v4834_v14  ;;  %2402 = vmatprep.mubr.msk.bf16.mxu0 %vm2527_vm0, %v4834_v14 }
 0x331   :  { %2422 = vmatprep.mubr.msk.bf16.mxu1 %vm2527_vm0, %v4834_v14 }
 0x332   :  { %v760_v45 = vadd.f32 %v744_v20, %v712_v40  ;;  %v747_v40 = vmul.f32 0.01, %v731_v48 }
 0x334   :  { %v700_v42 = vld [vmem:[%s4833_s26 + $0x38] sm:$0xff]  ;;  %v4066_v20 = vpack.c.bf16 %v760_v45, %v759_v21 }
 0x335   :  { %v716_v9 = vmul.f32 0.99, %v700_v42  ;;  %993 = vst [vmem:[%s4680_s17 + $0x10] sm:$0xff] %v759_v21  ;;  %994 = vst [vmem:[%s4680_s17 + $0x18] sm:$0xff] %v760_v45  ;;  %v733_v21 = vld [vmem:[%s4679_s9 + $0x40] sm:$0xff]  ;;  %v763_v45 = vadd.f32 %v747_v40, %v715_v41  ;;  %v736_v41 = vld [vmem:[%s4679_s9 + $0x58] sm:$0xff]  ;;  %v4100_v40 = vpack.c.bf16 %v762_v16, %v761_v30 }
 0x336   :  { %v749_v48 = vmul.f32 0.01, %v733_v21  ;;  %2389 = vmatpush3.bf16.msra.mxu0 %v4066_v20 }
 0x337   :  { %v764_v34 = vadd.f32 %v748_v50, %v716_v9  ;;  %v735_v9 = vld [vmem:[%s4679_s9 + $0x50] sm:$0xff]  ;;  %2390 = vmatprep.subr.bf16.mxu0 %v4834_v14 }
 0x338   :  { %v751_v61 = vmul.f32 0.01, %v735_v9 }
 0x33a   :  { %2391 = vmatpush3.bf16.msra.mxu0 %v4100_v40 }
 0x33b   :  { %2392 = vmatprep.subr.bf16.mxu0 %v4834_v14 }
 0x33c   :  { %v701_v53 = vld [vmem:[%s4833_s26 + $0x40] sm:$0xff]  ;;  %v702_v59 = vld [vmem:[%s4833_s26 + $0x48] sm:$0xff] }
 0x33d   :  { %v717_v55 = vmul.f32 0.99, %v701_v53  ;;  %v718_v42 = vmul.f32 0.99, %v702_v59  ;;  %995 = vst [vmem:[%s4680_s17 + $0x20] sm:$0xff] %v761_v30 }
 0x33f   :  { %v765_v50 = vadd.f32 %v749_v48, %v717_v55  ;;  %v766_v21 = vadd.f32 %v750_v27, %v718_v42  ;;  %v737_v48 = vld [vmem:[%s4679_s9 + $0x60] sm:$0xff] }
 0x340   :  { %v753_v9 = vmul.f32 0.01, %v737_v48 }
 0x341   :  { %v4126_v55 = vpack.c.bf16 %v766_v21, %v765_v50 }
 0x344   :  { %v703_v12 = vld [vmem:[%s4833_s26 + $0x50] sm:$0xff]  ;;  %v704_v54 = vld [vmem:[%s4833_s26 + $0x58] sm:$0xff] }
 0x345   :  { %996 = vst [vmem:[%s4680_s17 + $0x28] sm:$0xff] %v762_v16  ;;  %v719_v53 = vmul.f32 0.99, %v703_v12  ;;  %v720_v59 = vmul.f32 0.99, %v704_v54  ;;  %997 = vst [vmem:[%s4680_s17 + $0x30] sm:$0xff] %v763_v45  ;;  %v4116_v54 = vpack.c.bf16 %v764_v34, %v763_v45 }
 0x346   :  { %998 = vst [vmem:[%s4680_s17 + $0x38] sm:$0xff] %v764_v34  ;;  %v752_v12 = vmul.f32 0.01, %v736_v41  ;;  %999 = vst [vmem:[%s4680_s17 + $0x40] sm:$0xff] %v765_v50 }
 0x347   :  { %1000 = vst [vmem:[%s4680_s17 + $0x48] sm:$0xff] %v766_v21  ;;  %v767_v30 = vadd.f32 %v751_v61, %v719_v53  ;;  %2393 = vmatpush3.bf16.msra.mxu0 %v4116_v54 }
 0x348   :  { %v768_v16 = vadd.f32 %v752_v12, %v720_v59  ;;  %2394 = vmatprep.subr.bf16.mxu0 %v4834_v14  ;;  %v738_v59 = vld [vmem:[%s4679_s9 + $0x68] sm:$0xff] }
 0x349   :  { %1001 = vst [vmem:[%s4680_s17 + $0x50] sm:$0xff] %v767_v30  ;;  %v754_v41 = vmul.f32 0.01, %v738_v59 }
 0x34a   :  { %1002 = vst [vmem:[%s4680_s17 + $0x58] sm:$0xff] %v768_v16  ;;  %v4130_v42 = vpack.c.bf16 %v768_v16, %v767_v30  ;;  %v739_v30 = vld [vmem:[%s4679_s9 + $0x70] sm:$0xff] }
 0x34b   :  { %2395 = vmatpush3.bf16.msra.mxu0 %v4126_v55 }
 0x34c   :  { %2396 = vmatprep.subr.bf16.mxu0 %v4834_v14 }
 0x34f   :  { %2397 = vmatpush3.bf16.msra.mxu0 %v4130_v42 }
 0x350   :  { %2398 = vmatprep.subr.bf16.mxu0 %v4834_v14 }
 0x351   :  { %v705_v45 = vld [vmem:[%s4833_s26 + $0x60] sm:$0xff]  ;;  %v706_v34 = vld [vmem:[%s4833_s26 + $0x68] sm:$0xff]  ;;  %v707_v61 = vld [vmem:[%s4833_s26 + $0x70] sm:$0xff] }
 0x352   :  { %v721_v27 = vmul.f32 0.99, %v705_v45  ;;  %v722_v53 = vmul.f32 0.99, %v706_v34  ;;  %v708_v12 = vld [vmem:[%s4833_s26 + $0x78] sm:$0xff] }
 0x353   :  { %v723_v16 = vmul.f32 0.99, %v707_v61  ;;  %v724_v45 = vmul.f32 0.99, %v708_v12  ;;  %v740_v34 = vld [vmem:[%s4679_s9 + $0x78] sm:$0xff] }
 0x354   :  { %v769_v50 = vadd.f32 %v753_v9, %v721_v27  ;;  %v770_v21 = vadd.f32 %v754_v41, %v722_v53  ;;  %v755_v27 = vmul.f32 0.01, %v739_v30  ;;  %v756_v53 = vmul.f32 0.01, %v740_v34  ;;  %v2106_v34 = vpop.f32.mrb[0].mxu1 }
 0x356   :  { %1003 = vst [vmem:[%s4680_s17 + $0x60] sm:$0xff] %v769_v50  ;;  %1004 = vst [vmem:[%s4680_s17 + $0x68] sm:$0xff] %v770_v21  ;;  %v4165_v48 = vpack.c.bf16 %v770_v21, %v769_v50  ;;  %v771_v59 = vadd.f32 %v755_v27, %v723_v16  ;;  %v772_v9 = vadd.f32 %v756_v53, %v724_v45  ;;  %v773_v50 = vld [vmem:[%s4681_s5] sm:$0x1]  ;;  %v2084_v16 = vpop.f32.mrb[0].mxu0 }
 0x357   :  { %v775_v21 = vld [vmem:[%s4682_s10] sm:$0x1]  ;;  %v774_v61 = vmul.f32 0.99, %v773_v50  ;;  %v2085_v45 = vpop.f32.mrb[1].mxu0 }
 0x358   :  { %2399 = vmatpush3.bf16.msra.mxu0 %v4165_v48  ;;  %1005 = vst [vmem:[%s4680_s17 + $0x70] sm:$0xff] %v771_v59  ;;  %1006 = vst [vmem:[%s4680_s17 + $0x78] sm:$0xff] %v772_v9  ;;  %v4175_v41 = vpack.c.bf16 %v772_v9, %v771_v59  ;;  %v776_v12 = vmul.f32 0.01, %v775_v21  ;;  %v2086_v27 = vadd.f32 %v2085_v45, %v2084_v16  ;;  %v2087_v53 = vpop.f32.mrb[2].mxu0  ;;  %v2107_v59 = vpop.f32.mrb[1].mxu1 }
 0x359   :  { %2400 = vmatprep.subr.bf16.mxu0 %v4834_v14  ;;  %v2088_v9 = vpop.f32.mrb[3].mxu0  ;;  %v2108_v37 = vadd.f32 %v2107_v59, %v2106_v34  ;;  %v2109_v6 = vpop.f32.mrb[2].mxu1  ;;  %v817_v45 = vld [vmem:[%s4685_s12 + $0x10] sm:$0xff]  ;;  %v818_v53 = vld [vmem:[%s4685_s12 + $0x18] sm:$0xff] }
 0x35a   :  { %v4189_v30 = vadd.f32 %v776_v12, %v774_v61  ;;  %v2110_v44 = vpop.f32.mrb[3].mxu1  ;;  %v833_v9 = vmul.f32 0.01, %v817_v45  ;;  %v790_v45 = vld [vmem:[%s4684_s7 + $0x38] sm:$0xff] }
 0x35b   :  { %v1208_v13 = vadd.f32 %v2108_v37, %v2086_v27  ;;  %v785_v37 = vld [vmem:[%s4684_s7 + $0x10] sm:$0xff] }
 0x35c   :  { %2401 = vmatpush3.bf16.msra.mxu0 %v4175_v41  ;;  %4835 = vst [vmem:[#allocation43_spill] sm:$0xff] %v4189_v30  ;;  %1007 = vst [vmem:[%s4683_s18] sm:$0x1] %v4189_v30  ;;  %v801_v34 = vmul.f32 0.99, %v785_v37 }
 0x35d   :  { %2174 = vmatprep.subr.bf16.mxu0 %v2678_v25 }
 0x3fc   :  { %v2128_v50 = vpop.f32.mrb[4].mxu0 }
 0x3fd   :  { %v2129_v21 = vpop.f32.mrb[5].mxu0 }
 0x3fe   :  { %v2130_v12 = vadd.f32 %v2129_v21, %v2128_v50  ;;  %v2131_v49 = vpop.f32.mrb[6].mxu0  ;;  %v834_v50 = vmul.f32 0.01, %v818_v53  ;;  %v4244_v21 = vadd.f32 %v833_v9, %v801_v34  ;;  %v821_v34 = vld [vmem:[%s4685_s12 + $0x30] sm:$0xff]  ;;  %v806_v53 = vmul.f32 0.99, %v790_v45 }
 0x3ff   :  { %v2132_v63 = vpop.f32.mrb[7].mxu0  ;;  %v822_v9 = vld [vmem:[%s4685_s12 + $0x38] sm:$0xff]  ;;  %v824_v45 = vld [vmem:[%s4685_s12 + $0x48] sm:$0xff] }
 0x400   :  { %v1248_v39 = vadd.f32 %v2130_v12, %v1208_v13  ;;  %v787_v12 = vld [vmem:[%s4684_s7 + $0x20] sm:$0xff] }
 0x402   :  { %v2150_v61 = vpop.f32.mrb[4].mxu1 }
 0x403   :  { %v2151_v26 = vpop.f32.mrb[5].mxu1 }
 0x404   :  { %v2152_v17 = vadd.f32 %v2151_v26, %v2150_v61  ;;  %v2153_v57 = vpop.f32.mrb[6].mxu1  ;;  %v816_v26 = vld [vmem:[%s4685_s12 + $0x8] sm:$0xff] }
 0x405   :  { %v2154_v30 = vpop.f32.mrb[7].mxu1  ;;  %v784_v57 = vld [vmem:[%s4684_s7 + $0x8] sm:$0xff]  ;;  %v832_v13 = vmul.f32 0.01, %v816_v26 }
 0x406   :  { %v1288_v25 = vadd.f32 %v2152_v17, %v1248_v39  ;;  %v815_v17 = vld [vmem:[%s4685_s12] sm:$0xff]  ;;  %v800_v63 = vmul.f32 0.99, %v784_v57  ;;  %v786_v30 = vld [vmem:[%s4684_s7 + $0x18] sm:$0xff]  ;;  %v803_v57 = vmul.f32 0.99, %v787_v12 }
 0x407   :  { %v831_v49 = vmul.f32 0.01, %v815_v17  ;;  %v802_v27 = vmul.f32 0.99, %v786_v30  ;;  %v789_v30 = vld [vmem:[%s4684_s7 + $0x30] sm:$0xff] }
 0x408   :  { %v1293_v16 = vpack.c.bf16 %v1288_v25, %v1288_v25  ;;  %v783_v25 = vld [vmem:[%s4684_s7] sm:$0xff]  ;;  %v4225_v6 = vadd.f32 %v832_v13, %v800_v63  ;;  %v837_v12 = vmul.f32 0.01, %v821_v34 }
 0x409   :  { %v799_v39 = vmul.f32 0.99, %v783_v25  ;;  %v4246_v61 = vadd.f32 %v834_v50, %v802_v27  ;;  %v819_v25 = vld [vmem:[%s4685_s12 + $0x20] sm:$0xff]  ;;  %v805_v27 = vmul.f32 0.99, %v789_v30 }
 0x40a   :  { %2403 = vmatmul.mubr.bf16.vlgmr.msra.gmra.mrb[8].mxu0 %v1293_v16  ;;  %v788_v16 = vld [vmem:[%s4684_s7 + $0x28] sm:$0xff]  ;;  %v835_v26 = vmul.f32 0.01, %v819_v25 }
 0x40b   :  { %2175 = vmatpush3.bf16.msra.mxu0 %v2723_v52  ;;  %v4223_v44 = vadd.f32 %v831_v49, %v799_v39  ;;  %v804_v17 = vmul.f32 0.99, %v788_v16  ;;  %v820_v39 = vld [vmem:[%s4685_s12 + $0x28] sm:$0xff]  ;;  %v4263_v63 = vpack.c.bf16 %v4246_v61, %v4244_v21  ;;  %v838_v16 = vmul.f32 0.01, %v822_v9 }
 0x40c   :  { %2176 = vmatprep.subr.bf16.mxu0 %v2756_v3  ;;  %v836_v49 = vmul.f32 0.01, %v820_v39  ;;  %v4266_v13 = vadd.f32 %v835_v26, %v803_v57  ;;  %v853_v25 = vadd.f32 %v837_v12, %v805_v27  ;;  %v792_v39 = vld [vmem:[%s4684_s7 + $0x48] sm:$0xff]  ;;  %v823_v26 = vld [vmem:[%s4685_s12 + $0x40] sm:$0xff] }
 0x40d   :  { %v4241_v59 = vpack.c.bf16 %v4225_v6, %v4223_v44  ;;  %4837 = vst [vmem:[#allocation45_spill] sm:$0xff] %v4263_v63  ;;  %v854_v57 = vadd.f32 %v838_v16, %v806_v53  ;;  %v808_v30 = vmul.f32 0.99, %v792_v39  ;;  %v839_v27 = vmul.f32 0.01, %v823_v26  ;;  %v793_v16 = vld [vmem:[%s4684_s7 + $0x50] sm:$0xff] }
 0x40e   :  { %v4268_v37 = vadd.f32 %v836_v49, %v804_v17  ;;  %v791_v17 = vld [vmem:[%s4684_s7 + $0x40] sm:$0xff]  ;;  %v840_v53 = vmul.f32 0.01, %v824_v45  ;;  %v825_v39 = vld [vmem:[%s4685_s12 + $0x50] sm:$0xff]  ;;  %v809_v26 = vmul.f32 0.99, %v793_v16 }
 0x40f   :  { %2177 = vmatpush3.bf16.msra.mxu0 %v2804_v28  ;;  %4836 = vst [vmem:[#allocation44_spill] sm:$0xff] %v4241_v59  ;;  %2407 = vmatpush3.bf16.msra.mxu1 %v4241_v59  ;;  %v807_v49 = vmul.f32 0.99, %v791_v17  ;;  %v4301_v34 = vpack.c.bf16 %v854_v57, %v853_v25  ;;  %v794_v17 = vld [vmem:[%s4684_s7 + $0x58] sm:$0xff]  ;;  %v796_v16 = vld [vmem:[%s4684_s7 + $0x68] sm:$0xff] }
 0x410   :  { %2178 = vmatprep.subr.bf16.mxu0 %v2849_v58  ;;  %2408 = vmatprep.subr.bf16.mxu1 %v4834_v14  ;;  %v4285_v50 = vpack.c.bf16 %v4268_v37, %v4266_v13  ;;  %v856_v12 = vadd.f32 %v840_v53, %v808_v30  ;;  %v810_v45 = vmul.f32 0.99, %v794_v17  ;;  %v827_v17 = vld [vmem:[%s4685_s12 + $0x60] sm:$0xff] }
 0x411   :  { %4839 = vst [vmem:[#allocation47_spill] sm:$0xff] %v4301_v34  ;;  %v855_v9 = vadd.f32 %v839_v27, %v807_v49  ;;  %v826_v49 = vld [vmem:[%s4685_s12 + $0x58] sm:$0xff]  ;;  %v841_v27 = vmul.f32 0.01, %v825_v39 }
 0x412   :  { %4838 = vst [vmem:[#allocation46_spill] sm:$0xff] %v4285_v50  ;;  %v842_v53 = vmul.f32 0.01, %v826_v49  ;;  %v812_v49 = vmul.f32 0.99, %v796_v16 }
 0x413   :  { %2179 = vmatpush3.bf16.msra.mxu0 %v2882_v10  ;;  %2409 = vmatpush3.bf16.msra.mxu1 %v4263_v63  ;;  %v4317_v30 = vpack.c.bf16 %v856_v12, %v855_v9 }
 0x414   :  { %2180 = vmatprep.subr.bf16.mxu0 %v2930_v38  ;;  %2410 = vmatprep.subr.bf16.mxu1 %v4834_v14 }
 0x415   :  { %4840 = vst [vmem:[#allocation48_spill] sm:$0xff] %v4317_v30 }
 0x417   :  { %2181 = vmatpush3.bf16.msra.mxu0 %v2975_v7  ;;  %2411 = vmatpush3.bf16.msra.mxu1 %v4285_v50 }
 0x418   :  { %2182 = vmatprep.subr.bf16.mxu0 %v3008_v24  ;;  %2412 = vmatprep.subr.bf16.mxu1 %v4834_v14 }
 0x41b   :  { %2183 = vmatpush3.bf16.msra.mxu0 %v3056_v56  ;;  %2413 = vmatpush3.bf16.msra.mxu1 %v4301_v34 }
 0x41c   :  { %2184 = vmatprep.subr.bf16.mxu0 %v3101_v31  ;;  %2414 = vmatprep.subr.bf16.mxu1 %v4834_v14  ;;  %v797_v31 = vld [vmem:[%s4684_s7 + $0x70] sm:$0xff] }
 0x41d   :  { %v813_v56 = vmul.f32 0.99, %v797_v31 }
 0x41f   :  { %2185 = vmatpush3.bf16.msra.mxu0 %v3134_v51  ;;  %2415 = vmatpush3.bf16.msra.mxu1 %v4317_v30  ;;  %v780_v51 = vld [vmem:[%s4687_s11] sm:$0x1] }
 0x420   :  { %2186 = vmatprep.subr.bf16.mxu0 %v3182_v22  ;;  %2416 = vmatprep.subr.bf16.mxu1 %v4834_v14 }
 0x423   :  { %2187 = vmatpush3.bf16.msra.mxu0 %v3227_v2  ;;  %v778_v2 = vld [vmem:[%s4686_s6] sm:$0x1] }
 0x424   :  { %2188 = vmatprep.subr.bf16.mxu0 %v3260_v29  ;;  %v795_v29 = vld [vmem:[%s4684_s7 + $0x60] sm:$0xff]  ;;  %v779_v22 = vmul.f32 0.99, %v778_v2  ;;  %v829_v2 = vld [vmem:[%s4685_s12 + $0x70] sm:$0xff] }
 0x425   :  { %v811_v39 = vmul.f32 0.99, %v795_v29 }
 0x427   :  { %2189 = vmatpush3.bf16.msra.mxu0 %v3311_v8  ;;  %v858_v8 = vadd.f32 %v842_v53, %v810_v45 }
 0x428   :  { %2218 = vmatprep.subr.bf16.mxu0 %v3362_v1  ;;  %v857_v1 = vadd.f32 %v841_v27, %v809_v26  ;;  %v828_v26 = vld [vmem:[%s4685_s12 + $0x68] sm:$0xff]  ;;  %v843_v27 = vmul.f32 0.01, %v827_v17  ;;  %v798_v17 = vld [vmem:[%s4684_s7 + $0x78] sm:$0xff] }
 0x429   :  { %v844_v53 = vmul.f32 0.01, %v828_v26  ;;  %v781_v26 = vmul.f32 0.01, %v780_v51  ;;  %v814_v24 = vmul.f32 0.99, %v798_v17  ;;  %1009 = vst [vmem:[%s4688_s20] sm:$0xff] %v4223_v44 }
 0x42a   :  { %v4333_v45 = vpack.c.bf16 %v858_v8, %v857_v1  ;;  %v859_v29 = vadd.f32 %v843_v27, %v811_v39  ;;  %v830_v39 = vld [vmem:[%s4685_s12 + $0x78] sm:$0xff]  ;;  %1010 = vst [vmem:[%s4688_s20 + $0x8] sm:$0xff] %v4225_v6  ;;  %1011 = vst [vmem:[%s4688_s20 + $0x10] sm:$0xff] %v4244_v21  ;;  %v845_v51 = vmul.f32 0.01, %v829_v2 }
 0x42b   :  { %v860_v16 = vadd.f32 %v844_v53, %v812_v49  ;;  %1012 = vst [vmem:[%s4688_s20 + $0x18] sm:$0xff] %v4246_v61  ;;  %1013 = vst [vmem:[%s4688_s20 + $0x20] sm:$0xff] %v4266_v13  ;;  %v846_v44 = vmul.f32 0.01, %v830_v39  ;;  %v4405_v6 = vadd.f32 %v781_v26, %v779_v22  ;;  %v1429_v13 = vld [vmem:[%s4690_s1 + $0x28] sm:$0xff] }
 0x42c   :  { %4841 = vst [vmem:[#allocation49_spill] sm:$0xff] %v4333_v45  ;;  %2417 = vmatpush3.bf16.msra.mxu1 %v4333_v45  ;;  %1014 = vst [vmem:[%s4688_s20 + $0x28] sm:$0xff] %v4268_v37  ;;  %v1437_v37 = vpack.c.bf16 %v1429_v13, %v1429_v13 }
 0x42d   :  { %2418 = vmatprep.subr.bf16.mxu1 %v4834_v14  ;;  %1015 = vst [vmem:[%s4688_s20 + $0x30] sm:$0xff] %v853_v25  ;;  %1016 = vst [vmem:[%s4688_s20 + $0x38] sm:$0xff] %v854_v57  ;;  %v4403_v31 = vpack.c.bf16 %v860_v16, %v859_v29  ;;  %v862_v21 = vadd.f32 %v846_v44, %v814_v24  ;;  %v1425_v24 = vld [vmem:[%s4690_s1 + $0x8] sm:$0xff]  ;;  %v1428_v25 = vld [vmem:[%s4690_s1 + $0x20] sm:$0xff] }
 0x42e   :  { %1017 = vst [vmem:[%s4688_s20 + $0x40] sm:$0xff] %v855_v9  ;;  %1018 = vst [vmem:[%s4688_s20 + $0x48] sm:$0xff] %v856_v12  ;;  %v1436_v57 = vpack.c.bf16 %v1428_v25, %v1428_v25  ;;  %v4844_v9 = vld [vmem:[#allocation2_spill] sm:$0xff]  ;;  %v1106_v25 = vlaneseq }
 0x42f   :  { %1019 = vst [vmem:[%s4688_s20 + $0x50] sm:$0xff] %v857_v1  ;;  %1020 = vst [vmem:[%s4688_s20 + $0x58] sm:$0xff] %v858_v8  ;;  %v861_v1 = vadd.f32 %v845_v51, %v813_v56  ;;  %v1433_v56 = vpack.c.bf16 %v1425_v24, %v1425_v24  ;;  %v1424_v8 = vld [vmem:[%s4690_s1] sm:$0xff] }
 0x430   :  { %1021 = vst [vmem:[%s4688_s20 + $0x60] sm:$0xff] %v859_v29  ;;  %1022 = vst [vmem:[%s4688_s20 + $0x68] sm:$0xff] %v860_v16  ;;  %2419 = vmatpush3.bf16.msra.mxu1 %v4403_v31  ;;  %v1432_v61 = vpack.c.bf16 %v1424_v8, %v1424_v8 }
 0x431   :  { %4842 = vst [vmem:[#allocation50_spill] sm:$0xff] %v4403_v31  ;;  %1008 = vst [vmem:[%s4689_s19] sm:$0x1] %v4405_v6  ;;  %2420 = vmatprep.subr.bf16.mxu1 %v4834_v14  ;;  %v4419_v22 = vpack.c.bf16 %v862_v21, %v861_v1  ;;  %1472 = vmatprep.mubr.bf16.mxu0 %v1433_v56 }
 0x432   :  { %1023 = vst [vmem:[%s4688_s20 + $0x70] sm:$0xff] %v861_v1  ;;  %1024 = vst [vmem:[%s4688_s20 + $0x78] sm:$0xff] %v862_v21  ;;  %1473 = vmatmul.mubr.bf16.vlgmr.msra.gmra.mrb[12].mxu0 %v1432_v61 }
 0x433   :  { %4843 = vst [vmem:[#allocation51_spill] sm:$0xff] %v4419_v22  ;;  %2219 = vmatpush3.bf16.msra.mxu0 %v3404_v47  ;;  %1552 = vmatprep.mubr.bf16.mxu0 %v1437_v37 }
 0x434   :  { %2421 = vmatpush3.bf16.msra.mxu1 %v4419_v22  ;;  %2220 = vmatprep.subr.bf16.mxu0 %v3446_v33 }
 0x435   :  { %2196 = vmatprep.subr.bf16.mxu1 %v2696_v35 }
 0x437   :  { %2221 = vmatpush3.bf16.msra.mxu0 %v3488_v18 }
 0x438   :  { %2222 = vmatprep.subr.bf16.mxu0 %v3530_v11 }
 0x43b   :  { %2223 = vmatpush3.bf16.msra.mxu0 %v3572_v0 }
 0x43c   :  { %2224 = vmatprep.subr.bf16.mxu0 %v3614_v4 }
 0x43f   :  { %2225 = vmatpush3.bf16.msra.mxu0 %v3656_v15 }
 0x440   :  { %2226 = vmatprep.subr.bf16.mxu0 %v3698_v19 }
 0x443   :  { %2227 = vmatpush3.bf16.msra.mxu0 %v3740_v32 }
 0x444   :  { %2228 = vmatprep.subr.bf16.mxu0 %v3782_v46 }
 0x447   :  { %2229 = vmatpush3.bf16.msra.mxu0 %v3824_v60 }
 0x448   :  { %2230 = vmatprep.subr.bf16.mxu0 %v3866_v62 }
 0x44b   :  { %2231 = vmatpush3.bf16.msra.mxu0 %v3908_v43 }
 0x44c   :  { %2232 = vmatprep.subr.bf16.mxu0 %v3950_v36 }
 0x44f   :  { %2233 = vmatpush3.bf16.msra.mxu0 %v3986_v23 }
 0x450   :  { %2426 = vmatprep.subr.bf16.mxu0 %v4834_v14 }
 0x452   :  { %1553 = vmatmul.mubr.bf16.vlgmr.msra.gmra.mrb[16].mxu0 %v1436_v57 }
 0x453   :  { %2427 = vmatpush3.bf16.msra.mxu0 %v4048_v5  ;;  %2442 = vmatprep.mubr.msk.bf16.mxu0 %vm2527_vm0, %v4834_v14 }
 0x454   :  { %2428 = vmatprep.subr.bf16.mxu0 %v4834_v14 }
 0x457   :  { %2429 = vmatpush3.bf16.msra.mxu0 %v4066_v20 }
 0x458   :  { %2430 = vmatprep.subr.bf16.mxu0 %v4834_v14 }
 0x45b   :  { %2431 = vmatpush3.bf16.msra.mxu0 %v4100_v40 }
 0x45c   :  { %2432 = vmatprep.subr.bf16.mxu0 %v4834_v14 }
 0x45f   :  { %2433 = vmatpush3.bf16.msra.mxu0 %v4116_v54 }
 0x460   :  { %2434 = vmatprep.subr.bf16.mxu0 %v4834_v14 }
 0x463   :  { %2435 = vmatpush3.bf16.msra.mxu0 %v4126_v55 }
 0x464   :  { %2436 = vmatprep.subr.bf16.mxu0 %v4834_v14 }
 0x467   :  { %2437 = vmatpush3.bf16.msra.mxu0 %v4130_v42 }
 0x468   :  { %2438 = vmatprep.subr.bf16.mxu0 %v4834_v14 }
 0x46b   :  { %2439 = vmatpush3.bf16.msra.mxu0 %v4165_v48 }
 0x46c   :  { %2440 = vmatprep.subr.bf16.mxu0 %v4834_v14 }
 0x46f   :  { %2441 = vmatpush3.bf16.msra.mxu0 %v4175_v41 }
 0x470   :  { %2280 = vmatprep.subr.bf16.mxu0 %v4844_v9  ;;  %v1107_v9 = vshrl.u32 %v1106_v25, 7  ;;  %v4855_v25 = vld [vmem:[#allocation15_spill] sm:$0xff] }
 0x4dd   :  { %v1328_v12 = vpop.f32.mrb[8].mxu0 }
 0x4de   :  { %v1334_v49 = vrot.slane %v1328_v12, 4  ;;  %v2404_v27 = vpop.f32.mrb[9].mxu0 }
 0x4df   :  { %v1331_v53 = vpop.f32.mrb[10].mxu0  ;;  %v4845_v27 = vld [vmem:[#allocation43_spill] sm:$0xff] }
 0x4e0   :  { %v1335_v29 = vadd.f32 %v1334_v49, %v1328_v12  ;;  %v2405_v16 = vpop.f32.mrb[11].mxu0  ;;  %v1108_v49 = vsub.s32 0, %v1107_v9  ;;  %v4857_v9 = vld [vmem:[#allocation19_spill] sm:$0xff] }
 0x4e2   :  { %v1336_v17 = vrot.slane %v1335_v29, 2  ;;  %v4470_v53 = vrot.slane %v4845_v27, %v1108_v49  ;;  %v1426_v27 = vld [vmem:[%s4690_s1 + $0x10] sm:$0xff] }
 0x4e4   :  { %v1337_v2 = vadd.f32 %v1336_v17, %v1335_v29 }
 0x4e6   :  { %v1338_v26 = vrot.slane %v1337_v2, 1 }
 0x4e8   :  { %v1339_v39 = vadd.f32 %v1338_v26, %v1337_v2  ;;  %v1427_v26 = vld [vmem:[%s4690_s1 + $0x18] sm:$0xff] }
 0x4ea   :  { %v1341_v51 = vmul.f32 0.125, %v1339_v39 }
 0x4ec   :  { %v1342_v44 = vsub.f32 %v1328_v12, %v1341_v51  ;;  %v4473_v12 = vrot.slane %v4405_v6, %v1108_v49  ;;  %v1435_v51 = vpack.c.bf16 %v1427_v26, %v1427_v26  ;;  %v4849_v6 = vld [vmem:[#allocation6_spill] sm:$0xff]  ;;  %v4858_v49 = vld [vmem:[#allocation21_spill] sm:$0xff] }
 0x4ee   :  { %v1343_v1 = vmul.f32 %v1342_v44, %v1342_v44 }
 0x4f0   :  { %v1344_v21 = vrot.slane %v1343_v1, 4 }
 0x4f2   :  { %v1345_v24 = vadd.f32 %v1344_v21, %v1343_v1  ;;  %v4846_v21 = vld [vmem:[#allocation3_spill] sm:$0xff] }
 0x4f4   :  { %v1346_v56 = vrot.slane %v1345_v24, 2 }
 0x4f6   :  { %v1347_v8 = vadd.f32 %v1346_v56, %v1345_v24  ;;  %v4847_v24 = vld [vmem:[#allocation4_spill] sm:$0xff]  ;;  %v4850_v56 = vld [vmem:[#allocation7_spill] sm:$0xff] }
 0x4f8   :  { %v1348_v61 = vrot.slane %v1347_v8, 1 }
 0x4fa   :  { %v1349_v13 = vadd.f32 %v1348_v61, %v1347_v8  ;;  %v4851_v8 = vld [vmem:[#allocation8_spill] sm:$0xff]  ;;  %v4852_v61 = vld [vmem:[#allocation9_spill] sm:$0xff] }
 0x4fc   :  { %v1350_v37 = vmul.f32 0.125, %v1349_v13  ;;  %v4853_v13 = vld [vmem:[#allocation11_spill] sm:$0xff] }
 0x4fe   :  { %v1351_v57 = vadd.f32 1e-05, %v1350_v37  ;;  %v4854_v37 = vld [vmem:[#allocation13_spill] sm:$0xff] }
 0x500   :  { %2508 = vrsqrt.f32 %v1351_v57  ;;  %v4856_v57 = vld [vmem:[#allocation17_spill] sm:$0xff] }
 0x50a   :  { %v2509_v29 = vpop.eup %2508 }
 0x50b   :  { %v1353_v16 = vmul.f32 %v2509_v29, %v1342_v44  ;;  %v4848_v44 = vld [vmem:[#allocation5_spill] sm:$0xff]  ;;  %v4859_v29 = vld [vmem:[#allocation23_spill] sm:$0xff] }
 0x50d   :  { %v1354_v17 = vmul.f32 %v1353_v16, %v4470_v53  ;;  %v1431_v16 = vld [vmem:[%s4690_s1 + $0x38] sm:$0xff] }
 0x50e   :  { %v1439_v26 = vpack.c.bf16 %v1431_v16, %v1431_v16  ;;  %v4870_v16 = vld [vmem:[#allocation36_spill] sm:$0xff] }
 0x50f   :  { %v1355_v2 = vadd.f32 %v1354_v17, %v4473_v12  ;;  %v1434_v17 = vpack.c.bf16 %v1426_v27, %v1426_v27  ;;  %v4868_v27 = vld [vmem:[#allocation34_spill] sm:$0xff] }
 0x511   :  { %v1356_v39 = vmax.f32 %v1355_v2, 0.0  ;;  %v4860_v2 = vld [vmem:[#allocation25_spill] sm:$0xff] }
 0x513   :  { %v1357_v1 = vpack.c.bf16 %v1356_v39, %v1356_v39  ;;  %v4861_v39 = vld [vmem:[#allocation27_spill] sm:$0xff] }
 0x515   :  { %2423 = vmatmul.mubr.bf16.vlgmr.msra.gmra.mrb[8].mxu1 %v1357_v1  ;;  %v4863_v1 = vld [vmem:[#allocation29_spill] sm:$0xff] }
 0x516   :  { %2197 = vmatpush3.bf16.msra.mxu1 %v4846_v21  ;;  %1512 = vmatprep.mubr.bf16.mxu1 %v1435_v51  ;;  %v4862_v51 = vld [vmem:[#allocation28_spill] sm:$0xff] }
 0x517   :  { %2198 = vmatprep.subr.bf16.mxu1 %v4847_v24 }
 0x51a   :  { %2199 = vmatpush3.bf16.msra.mxu1 %v4848_v44 }
 0x51b   :  { %2200 = vmatprep.subr.bf16.mxu1 %v4849_v6 }
 0x51e   :  { %2201 = vmatpush3.bf16.msra.mxu1 %v4850_v56 }
 0x51f   :  { %2202 = vmatprep.subr.bf16.mxu1 %v4851_v8 }
 0x522   :  { %2203 = vmatpush3.bf16.msra.mxu1 %v4852_v61 }
 0x523   :  { %2204 = vmatprep.subr.bf16.mxu1 %v4853_v13 }
 0x526   :  { %2205 = vmatpush3.bf16.msra.mxu1 %v4854_v37 }
 0x527   :  { %2206 = vmatprep.subr.bf16.mxu1 %v4855_v25 }
 0x52a   :  { %2207 = vmatpush3.bf16.msra.mxu1 %v4856_v57  ;;  %v4867_v57 = vld [vmem:[#allocation33_spill] sm:$0xff] }
 0x52b   :  { %2208 = vmatprep.subr.bf16.mxu1 %v4857_v9  ;;  %v4865_v9 = vld [vmem:[#allocation31_spill] sm:$0xff] }
 0x52e   :  { %2209 = vmatpush3.bf16.msra.mxu1 %v4858_v49  ;;  %v4864_v49 = vld [vmem:[#allocation30_spill] sm:$0xff] }
 0x52f   :  { %2210 = vmatprep.subr.bf16.mxu1 %v4859_v29  ;;  %v4866_v29 = vld [vmem:[#allocation32_spill] sm:$0xff] }
 0x532   :  { %2211 = vmatpush3.bf16.msra.mxu1 %v4860_v2  ;;  %v4869_v2 = vld [vmem:[#allocation35_spill] sm:$0xff] }
 0x533   :  { %2240 = vmatprep.subr.bf16.mxu1 %v4861_v39 }
 0x535   :  { %1513 = vmatmul.mubr.bf16.vlgmr.msra.gmra.mrb[12].mxu1 %v1434_v17  ;;  %v4871_v17 = vld [vmem:[#allocation37_spill] sm:$0xff] }
 0x536   :  { %2241 = vmatpush3.bf16.msra.mxu1 %v4862_v51  ;;  %1592 = vmatprep.mubr.bf16.mxu1 %v1439_v26  ;;  %v4872_v51 = vld [vmem:[#allocation38_spill] sm:$0xff]  ;;  %v4873_v26 = vld [vmem:[#allocation39_spill] sm:$0xff] }
 0x537   :  { %2242 = vmatprep.subr.bf16.mxu1 %v4863_v1  ;;  %v4874_v1 = vld [vmem:[#allocation40_spill] sm:$0xff] }
 0x53a   :  { %2243 = vmatpush3.bf16.msra.mxu1 %v4864_v49 }
 0x53b   :  { %2244 = vmatprep.subr.bf16.mxu1 %v4865_v9  ;;  %v4875_v9 = vld [vmem:[#allocation41_spill] sm:$0xff] }
 0x53e   :  { %2245 = vmatpush3.bf16.msra.mxu1 %v4866_v29  ;;  %v1430_v29 = vld [vmem:[%s4690_s1 + $0x30] sm:$0xff] }
 0x53f   :  { %2246 = vmatprep.subr.bf16.mxu1 %v4867_v57  ;;  %v1438_v57 = vpack.c.bf16 %v1430_v29, %v1430_v29 }
 0x542   :  { %2247 = vmatpush3.bf16.msra.mxu1 %v4868_v27  ;;  %v4876_v27 = vld [vmem:[#allocation42_spill] sm:$0xff] }
 0x543   :  { %2248 = vmatprep.subr.bf16.mxu1 %v4869_v2 }
 0x546   :  { %2249 = vmatpush3.bf16.msra.mxu1 %v4870_v16 }
 0x547   :  { %2250 = vmatprep.subr.bf16.mxu1 %v4871_v17 }
 0x54a   :  { %2251 = vmatpush3.bf16.msra.mxu1 %v4872_v51 }
 0x54b   :  { %2252 = vmatprep.subr.bf16.mxu1 %v4873_v26 }
 0x54e   :  { %2253 = vmatpush3.bf16.msra.mxu1 %v4874_v1 }
 0x54f   :  { %2254 = vmatprep.subr.bf16.mxu1 %v4875_v9 }
 0x552   :  { %2255 = vmatpush3.bf16.msra.mxu1 %v4876_v27 }
 0x553   :  { %2446 = vmatprep.subr.bf16.mxu1 %v4834_v14 }
 0x555   :  { %1593 = vmatmul.mubr.bf16.vlgmr.msra.gmra.mrb[16].mxu1 %v1438_v57  ;;  %v2190_v57 = vpop.f32.mrb[12].mxu0 }
 0x556   :  { %2447 = vmatpush3.bf16.msra.mxu1 %v4241_v59  ;;  %2462 = vmatprep.mubr.msk.bf16.mxu1 %vm2527_vm0, %v4834_v14  ;;  %v2191_v29 = vpop.f32.mrb[13].mxu0 }
 0x557   :  { %2448 = vmatprep.subr.bf16.mxu1 %v4834_v14 }
 0x55a   :  { %2449 = vmatpush3.bf16.msra.mxu1 %v4263_v63  ;;  %v2192_v63 = vadd.f32 %v2191_v29, %v2190_v57 }
 0x55b   :  { %2450 = vmatprep.subr.bf16.mxu1 %v4834_v14 }
 0x55e   :  { %2451 = vmatpush3.bf16.msra.mxu1 %v4285_v50 }
 0x55f   :  { %2452 = vmatprep.subr.bf16.mxu1 %v4834_v14 }
 0x562   :  { %2453 = vmatpush3.bf16.msra.mxu1 %v4301_v34  ;;  %v2193_v34 = vpop.f32.mrb[14].mxu0 }
 0x563   :  { %2454 = vmatprep.subr.bf16.mxu1 %v4834_v14  ;;  %v2194_v50 = vpop.f32.mrb[15].mxu0 }
 0x566   :  { %2455 = vmatpush3.bf16.msra.mxu1 %v4317_v30  ;;  %v2234_v30 = vpop.f32.mrb[16].mxu0 }
 0x567   :  { %2456 = vmatprep.subr.bf16.mxu1 %v4834_v14  ;;  %v2235_v59 = vpop.f32.mrb[17].mxu0 }
 0x568   :  { %v2236_v27 = vadd.f32 %v2235_v59, %v2234_v30  ;;  %v2237_v9 = vpop.f32.mrb[18].mxu0 }
 0x56a   :  { %2457 = vmatpush3.bf16.msra.mxu1 %v4333_v45  ;;  %v2238_v45 = vpop.f32.mrb[19].mxu0 }
 0x56b   :  { %2458 = vmatprep.subr.bf16.mxu1 %v4834_v14 }
 0x56e   :  { %2459 = vmatpush3.bf16.msra.mxu1 %v4403_v31 }
 0x56f   :  { %2460 = vmatprep.subr.bf16.mxu1 %v4834_v14 }
 0x572   :  { %2461 = vmatpush3.bf16.msra.mxu1 %v4419_v22 }
 0x573   :  { %2302 = vmatprep.subr.bf16.mxu1 %v2696_v35 }
 0x5e8   :  { %v1392_v1 = vpop.f32.mrb[8].mxu1 }
 0x5e9   :  { %v1398_v26 = vrot.slane %v1392_v1, 4  ;;  %v2424_v51 = vpop.f32.mrb[9].mxu1 }
 0x5ea   :  { %v1395_v31 = vpop.f32.mrb[10].mxu1 }
 0x5eb   :  { %v1399_v17 = vadd.f32 %v1398_v26, %v1392_v1  ;;  %v2425_v16 = vpop.f32.mrb[11].mxu1 }
 0x5ed   :  { %v1400_v2 = vrot.slane %v1399_v17, 2 }
 0x5ef   :  { %v1401_v22 = vadd.f32 %v1400_v2, %v1399_v17 }
 0x5f1   :  { %v1402_v49 = vrot.slane %v1401_v22, 1 }
 0x5f3   :  { %v1403_v35 = vadd.f32 %v1402_v49, %v1401_v22 }
 0x5f5   :  { %v1404_v39 = vmul.f32 0.125, %v1403_v35 }
 0x5f7   :  { %v1405_v25 = vsub.f32 %v1392_v1, %v1404_v39 }
 0x5f9   :  { %v1406_v34 = vmul.f32 %v1405_v25, %v1405_v25 }
 0x5fb   :  { %v1407_v50 = vrot.slane %v1406_v34, 4 }
 0x5fd   :  { %v1408_v57 = vadd.f32 %v1407_v50, %v1406_v34 }
 0x5ff   :  { %v1409_v29 = vrot.slane %v1408_v57, 2 }
 0x601   :  { %v1410_v37 = vadd.f32 %v1409_v29, %v1408_v57 }
 0x603   :  { %v1411_v59 = vrot.slane %v1410_v37, 1 }
 0x605   :  { %v1412_v30 = vadd.f32 %v1411_v59, %v1410_v37 }
 0x607   :  { %v1413_v45 = vmul.f32 0.125, %v1412_v30 }
 0x608   :  { %v2212_v9 = vpop.f32.mrb[12].mxu1 }
 0x609   :  { %v1414_v13 = vadd.f32 1e-05, %v1413_v45  ;;  %v2213_v51 = vpop.f32.mrb[13].mxu1  ;;  %v1731_v45 = vld [vmem:[%s4692_s2 + $0x8] sm:$0xff] }
 0x60a   :  { %v2214_v31 = vadd.f32 %v2213_v51, %v2212_v9  ;;  %v2215_v26 = vpop.f32.mrb[14].mxu1  ;;  %v1739_v9 = vpack.c.bf16 %v1731_v45, %v1731_v45  ;;  %v1730_v51 = vld [vmem:[%s4692_s2] sm:$0xff]  ;;  %v4906_v45 = vld [vmem:[#allocation39_spill] sm:$0xff] }
 0x60b   :  { %v2216_v16 = vpop.f32.mrb[15].mxu1  ;;  %2510 = vrsqrt.f32 %v1414_v13  ;;  %v4878_v13 = vld [vmem:[#allocation12_spill] sm:$0xff] }
 0x60c   :  { %v1515_v2 = vadd.f32 %v2214_v31, %v2192_v63  ;;  %v4877_v63 = vld [vmem:[#allocation10_spill] sm:$0xff]  ;;  %v1738_v31 = vpack.c.bf16 %v1730_v51, %v1730_v51  ;;  %v1736_v51 = vld [vmem:[%s4692_s2 + $0x30] sm:$0xff] }
 0x60e   :  { %v1555_v17 = vadd.f32 %v2236_v27, %v1515_v2  ;;  %v4880_v27 = vld [vmem:[#allocation16_spill] sm:$0xff] }
 0x615   :  { %v2511_v22 = vpop.eup %2510 }
 0x616   :  { %v1416_v49 = vmul.f32 %v2511_v22, %v1405_v25  ;;  %v4879_v25 = vld [vmem:[#allocation14_spill] sm:$0xff] }
 0x618   :  { %v1417_v39 = vmul.f32 %v1416_v49, %v1416_v49 }
 0x61a   :  { %1418 = vadd.xlane.f32.xlu0 %v1417_v39  ;;  %v1733_v39 = vld [vmem:[%s4692_s2 + $0x18] sm:$0xff] }
 0x628   :  { %v2256_v1 = vpop.f32.mrb[16].mxu1 }
 0x629   :  { %v2257_v35 = vpop.f32.mrb[17].mxu1 }
 0x62a   :  { %v2258_v34 = vadd.f32 %v2257_v35, %v2256_v1  ;;  %v2259_v50 = vpop.f32.mrb[18].mxu1  ;;  %v1741_v35 = vpack.c.bf16 %v1733_v39, %v1733_v39 }
 0x62b   :  { %v2260_v57 = vpop.f32.mrb[19].mxu1  ;;  %v4886_v50 = vld [vmem:[#allocation11_spill] sm:$0xff] }
 0x62c   :  { %v1595_v37 = vadd.f32 %v2258_v34, %v1555_v17  ;;  %v4887_v57 = vld [vmem:[#allocation13_spill] sm:$0xff] }
 0x62e   :  { %v1600_v29 = vpack.c.bf16 %v1595_v37, %v1595_v37  ;;  %v4888_v37 = vld [vmem:[#allocation15_spill] sm:$0xff] }
 0x630   :  { %2443 = vmatmul.mubr.bf16.vlgmr.msra.gmra.mrb[20].mxu0 %v1600_v29  ;;  %v4890_v29 = vld [vmem:[#allocation19_spill] sm:$0xff] }
 0x631   :  { %2281 = vmatpush3.bf16.msra.mxu0 %v2723_v52  ;;  %v4881_v52 = vld [vmem:[#allocation18_spill] sm:$0xff]  ;;  %1778 = vmatprep.mubr.bf16.mxu0 %v1739_v9  ;;  %v4907_v9 = vld [vmem:[#allocation40_spill] sm:$0xff] }
 0x632   :  { %2282 = vmatprep.subr.bf16.mxu0 %v2756_v3  ;;  %v4882_v3 = vld [vmem:[#allocation20_spill] sm:$0xff] }
 0x635   :  { %2283 = vmatpush3.bf16.msra.mxu0 %v2804_v28  ;;  %v4883_v28 = vld [vmem:[#allocation22_spill] sm:$0xff] }
 0x636   :  { %2284 = vmatprep.subr.bf16.mxu0 %v2849_v58  ;;  %v4884_v58 = vld [vmem:[#allocation24_spill] sm:$0xff] }
 0x639   :  { %2285 = vmatpush3.bf16.msra.mxu0 %v2882_v10  ;;  %v4885_v10 = vld [vmem:[#allocation26_spill] sm:$0xff] }
 0x63a   :  { %2286 = vmatprep.subr.bf16.mxu0 %v2930_v38 }
 0x63d   :  { %2287 = vmatpush3.bf16.msra.mxu0 %v2975_v7 }
 0x63e   :  { %2288 = vmatprep.subr.bf16.mxu0 %v4877_v63 }
 0x641   :  { %2289 = vmatpush3.bf16.msra.mxu0 %v4878_v13  ;;  %v4894_v13 = vld [vmem:[#allocation27_spill] sm:$0xff] }
 0x642   :  { %2290 = vmatprep.subr.bf16.mxu0 %v4879_v25  ;;  %v4895_v25 = vld [vmem:[#allocation28_spill] sm:$0xff] }
 0x645   :  { %2291 = vmatpush3.bf16.msra.mxu0 %v4880_v27  ;;  %v4896_v27 = vld [vmem:[#allocation29_spill] sm:$0xff] }
 0x646   :  { %2292 = vmatprep.subr.bf16.mxu0 %v4881_v52  ;;  %v4897_v52 = vld [vmem:[#allocation30_spill] sm:$0xff] }
 0x649   :  { %2293 = vmatpush3.bf16.msra.mxu0 %v4882_v3  ;;  %v4898_v3 = vld [vmem:[#allocation31_spill] sm:$0xff] }
 0x64a   :  { %2294 = vmatprep.subr.bf16.mxu0 %v4883_v28  ;;  %v4899_v28 = vld [vmem:[#allocation32_spill] sm:$0xff] }
 0x64d   :  { %2295 = vmatpush3.bf16.msra.mxu0 %v4884_v58  ;;  %v4900_v58 = vld [vmem:[#allocation33_spill] sm:$0xff] }
 0x64e   :  { %2324 = vmatprep.subr.bf16.mxu0 %v4885_v10  ;;  %v4901_v10 = vld [vmem:[#allocation34_spill] sm:$0xff] }
 0x650   :  { %1779 = vmatmul.mubr.bf16.vlgmr.msra.gmra.mrb[24].mxu0 %v1738_v31  ;;  %v4908_v31 = vld [vmem:[#allocation41_spill] sm:$0xff] }
 0x651   :  { %2325 = vmatpush3.bf16.msra.mxu0 %v3404_v47  ;;  %v1735_v47 = vld [vmem:[%s4692_s2 + $0x28] sm:$0xff] }
 0x652   :  { %2326 = vmatprep.subr.bf16.mxu0 %v3446_v33  ;;  %v1743_v33 = vpack.c.bf16 %v1735_v47, %v1735_v47  ;;  %v1744_v47 = vpack.c.bf16 %v1736_v51, %v1736_v51 }
 0x654   :  { %1858 = vmatprep.mubr.bf16.mxu0 %v1743_v33  ;;  %v4909_v33 = vld [vmem:[#allocation42_spill] sm:$0xff] }
 0x655   :  { %2327 = vmatpush3.bf16.msra.mxu0 %v3488_v18  ;;  %v1734_v18 = vld [vmem:[%s4692_s2 + $0x20] sm:$0xff] }
 0x656   :  { %2328 = vmatprep.subr.bf16.mxu0 %v3530_v11  ;;  %v1742_v11 = vpack.c.bf16 %v1734_v18, %v1734_v18  ;;  %v4910_v18 = vld [vmem:[#allocation44_spill] sm:$0xff] }
 0x659   :  { %2329 = vmatpush3.bf16.msra.mxu0 %v3572_v0 }
 0x65a   :  { %2330 = vmatprep.subr.bf16.mxu0 %v3614_v4 }
 0x65d   :  { %2331 = vmatpush3.bf16.msra.mxu0 %v3656_v15 }
 0x65e   :  { %2332 = vmatprep.subr.bf16.mxu0 %v3698_v19 }
 0x661   :  { %2333 = vmatpush3.bf16.msra.mxu0 %v3740_v32 }
 0x662   :  { %2334 = vmatprep.subr.bf16.mxu0 %v3782_v46 }
 0x665   :  { %2335 = vmatpush3.bf16.msra.mxu0 %v3824_v60 }
 0x666   :  { %2336 = vmatprep.subr.bf16.mxu0 %v3866_v62 }
 0x669   :  { %2337 = vmatpush3.bf16.msra.mxu0 %v3908_v43 }
 0x66a   :  { %2338 = vmatprep.subr.bf16.mxu0 %v3950_v36 }
 0x66d   :  { %2339 = vmatpush3.bf16.msra.mxu0 %v3986_v23 }
 0x66e   :  { %2466 = vmatprep.subr.bf16.mxu0 %v4834_v14 }
 0x670   :  { %1859 = vmatmul.mubr.bf16.vlgmr.msra.gmra.mrb[28].mxu0 %v1742_v11  ;;  %v4911_v11 = vld [vmem:[#allocation45_spill] sm:$0xff] }
 0x671   :  { %2467 = vmatpush3.bf16.msra.mxu0 %v4048_v5  ;;  %2482 = vmatprep.mubr.msk.bf16.mxu0 %vm2527_vm0, %v4834_v14 }
 0x672   :  { %2468 = vmatprep.subr.bf16.mxu0 %v4834_v14 }
 0x675   :  { %2469 = vmatpush3.bf16.msra.mxu0 %v4066_v20 }
 0x676   :  { %2470 = vmatprep.subr.bf16.mxu0 %v4834_v14 }
 0x679   :  { %2471 = vmatpush3.bf16.msra.mxu0 %v4100_v40 }
 0x67a   :  { %2472 = vmatprep.subr.bf16.mxu0 %v4834_v14 }
 0x67d   :  { %2473 = vmatpush3.bf16.msra.mxu0 %v4116_v54 }
 0x67e   :  { %2474 = vmatprep.subr.bf16.mxu0 %v4834_v14 }
 0x681   :  { %2475 = vmatpush3.bf16.msra.mxu0 %v4126_v55 }
 0x682   :  { %2476 = vmatprep.subr.bf16.mxu0 %v4834_v14 }
 0x685   :  { %2477 = vmatpush3.bf16.msra.mxu0 %v4130_v42 }
 0x686   :  { %2478 = vmatprep.subr.bf16.mxu0 %v4834_v14 }
 0x689   :  { %2479 = vmatpush3.bf16.msra.mxu0 %v4165_v48 }
 0x68a   :  { %2480 = vmatprep.subr.bf16.mxu0 %v4834_v14 }
 0x68d   :  { %2481 = vmatpush3.bf16.msra.mxu0 %v4175_v41 }
 0x6a7   :  { %v1419_v38 = vpop.xlane.xlu0 %1418 }
 0x6a8   :  { %v1420_v7 = vmax.f32 %v1419_v38, 1e-24  ;;  %v4902_v38 = vld [vmem:[#allocation35_spill] sm:$0xff] }
 0x6aa   :  { %2512 = vrsqrt.f32 %v1420_v7  ;;  %v4903_v7 = vld [vmem:[#allocation36_spill] sm:$0xff] }
 0x6b4   :  { %v2513_v59 = vpop.eup %2512 }
 0x6b5   :  { %v1422_v30 = vmul.f32 %v2513_v59, %v1416_v49  ;;  %v4904_v59 = vld [vmem:[#allocation37_spill] sm:$0xff] }
 0x6b7   :  { %1423 = vst [vmem:[%s4691_s13] sm:$0xff] %v1422_v30  ;;  %v4905_v30 = vld [vmem:[#allocation38_spill] sm:$0xff] }
 0x703   :  { %v1635_v0 = vpop.f32.mrb[20].mxu0 }
 0x704   :  { %v1641_v4 = vrot.slane %v1635_v0, 4  ;;  %v2444_v15 = vpop.f32.mrb[21].mxu0 }
 0x705   :  { %v1638_v19 = vpop.f32.mrb[22].mxu0  ;;  %v4914_v15 = vld [vmem:[#allocation48_spill] sm:$0xff] }
 0x706   :  { %v1642_v32 = vadd.f32 %v1641_v4, %v1635_v0  ;;  %v2445_v46 = vpop.f32.mrb[23].mxu0  ;;  %v4913_v4 = vld [vmem:[#allocation47_spill] sm:$0xff]  ;;  %v4915_v19 = vld [vmem:[#allocation49_spill] sm:$0xff] }
 0x707   :  { %v4917_v46 = vld [vmem:[#allocation51_spill] sm:$0xff] }
 0x708   :  { %v1643_v60 = vrot.slane %v1642_v32, 2 }
 0x70a   :  { %v1644_v62 = vadd.f32 %v1643_v60, %v1642_v32  ;;  %v4916_v32 = vld [vmem:[#allocation50_spill] sm:$0xff] }
 0x70c   :  { %v1645_v43 = vrot.slane %v1644_v62, 1 }
 0x70e   :  { %v1646_v36 = vadd.f32 %v1645_v43, %v1644_v62 }
 0x710   :  { %v1647_v23 = vmul.f32 0.125, %v1646_v36 }
 0x712   :  { %v1648_v5 = vsub.f32 %v1635_v0, %v1647_v23  ;;  %v4912_v0 = vld [vmem:[#allocation46_spill] sm:$0xff] }
 0x714   :  { %v1649_v20 = vmul.f32 %v1648_v5, %v1648_v5 }
 0x716   :  { %v1650_v40 = vrot.slane %v1649_v20, 4 }
 0x718   :  { %v1651_v54 = vadd.f32 %v1650_v40, %v1649_v20 }
 0x71a   :  { %v1652_v55 = vrot.slane %v1651_v54, 2 }
 0x71c   :  { %v1653_v42 = vadd.f32 %v1652_v55, %v1651_v54 }
 0x71e   :  { %v1654_v48 = vrot.slane %v1653_v42, 1 }
 0x720   :  { %v1655_v26 = vadd.f32 %v1654_v48, %v1653_v42 }
 0x722   :  { %v1656_v41 = vmul.f32 0.125, %v1655_v26 }
 0x723   :  { %v2296_v60 = vpop.f32.mrb[24].mxu0 }
 0x724   :  { %v1657_v16 = vadd.f32 1e-05, %v1656_v41  ;;  %v2297_v62 = vpop.f32.mrb[25].mxu0 }
 0x725   :  { %v2299_v43 = vpop.f32.mrb[26].mxu0  ;;  %v2298_v23 = vadd.f32 %v2297_v62, %v2296_v60 }
 0x726   :  { %2514 = vrsqrt.f32 %v1657_v16  ;;  %v2300_v36 = vpop.f32.mrb[27].mxu0 }
 0x730   :  { %v2515_v2 = vpop.eup %2514 }
 0x731   :  { %v1659_v17 = vmul.f32 %v2515_v2, %v1648_v5 }
 0x733   :  { %v1660_v22 = vmul.f32 %v1659_v17, %v4470_v53 }
 0x735   :  { %v1661_v49 = vadd.f32 %v1660_v22, %v4473_v12 }
 0x737   :  { %v1662_v1 = vmax.f32 %v1661_v49, 0.0 }
 0x739   :  { %v1663_v34 = vpack.c.bf16 %v1662_v1, %v1662_v1 }
 0x73b   :  { %2463 = vmatmul.mubr.bf16.vlgmr.msra.gmra.mrb[20].mxu1 %v1663_v34 }
 0x73c   :  { %2303 = vmatpush3.bf16.msra.mxu1 %v4846_v21  ;;  %1818 = vmatprep.mubr.bf16.mxu1 %v1741_v35  ;;  %v4889_v21 = vld [vmem:[#allocation17_spill] sm:$0xff] }
 0x73d   :  { %2304 = vmatprep.subr.bf16.mxu1 %v4847_v24  ;;  %v4891_v24 = vld [vmem:[#allocation21_spill] sm:$0xff] }
 0x740   :  { %2305 = vmatpush3.bf16.msra.mxu1 %v4848_v44  ;;  %v1732_v44 = vld [vmem:[%s4692_s2 + $0x10] sm:$0xff] }
 0x741   :  { %2306 = vmatprep.subr.bf16.mxu1 %v4849_v6  ;;  %v4892_v6 = vld [vmem:[#allocation23_spill] sm:$0xff] }
 0x743   :  { %v2340_v5 = vpop.f32.mrb[28].mxu0 }
 0x744   :  { %2307 = vmatpush3.bf16.msra.mxu1 %v4850_v56  ;;  %v1737_v56 = vld [vmem:[%s4692_s2 + $0x38] sm:$0xff]  ;;  %v2341_v20 = vpop.f32.mrb[29].mxu0 }
 0x745   :  { %2308 = vmatprep.subr.bf16.mxu1 %v4851_v8  ;;  %v1740_v8 = vpack.c.bf16 %v1732_v44, %v1732_v44  ;;  %v1745_v63 = vpack.c.bf16 %v1737_v56, %v1737_v56  ;;  %v2342_v40 = vadd.f32 %v2341_v20, %v2340_v5  ;;  %v2343_v54 = vpop.f32.mrb[30].mxu0 }
 0x746   :  { %v2344_v55 = vpop.f32.mrb[31].mxu0 }
 0x748   :  { %2309 = vmatpush3.bf16.msra.mxu1 %v4852_v61  ;;  %v4893_v61 = vld [vmem:[#allocation25_spill] sm:$0xff] }
 0x749   :  { %2310 = vmatprep.subr.bf16.mxu1 %v4886_v50 }
 0x74c   :  { %2311 = vmatpush3.bf16.msra.mxu1 %v4887_v57 }
 0x74d   :  { %2312 = vmatprep.subr.bf16.mxu1 %v4888_v37 }
 0x750   :  { %2313 = vmatpush3.bf16.msra.mxu1 %v4889_v21 }
 0x751   :  { %2314 = vmatprep.subr.bf16.mxu1 %v4890_v29 }
 0x754   :  { %2315 = vmatpush3.bf16.msra.mxu1 %v4891_v24 }
 0x755   :  { %2316 = vmatprep.subr.bf16.mxu1 %v4892_v6 }
 0x758   :  { %2317 = vmatpush3.bf16.msra.mxu1 %v4893_v61 }
 0x759   :  { %2346 = vmatprep.subr.bf16.mxu1 %v4894_v13 }
 0x75b   :  { %1819 = vmatmul.mubr.bf16.vlgmr.msra.gmra.mrb[24].mxu1 %v1740_v8 }
 0x75c   :  { %2347 = vmatpush3.bf16.msra.mxu1 %v4895_v25  ;;  %1898 = vmatprep.mubr.bf16.mxu1 %v1745_v63 }
 0x75d   :  { %2348 = vmatprep.subr.bf16.mxu1 %v4896_v27 }
 0x760   :  { %2349 = vmatpush3.bf16.msra.mxu1 %v4897_v52 }
 0x761   :  { %2350 = vmatprep.subr.bf16.mxu1 %v4898_v3 }
 0x764   :  { %2351 = vmatpush3.bf16.msra.mxu1 %v4899_v28 }
 0x765   :  { %2352 = vmatprep.subr.bf16.mxu1 %v4900_v58 }
 0x768   :  { %2353 = vmatpush3.bf16.msra.mxu1 %v4901_v10 }
 0x769   :  { %2354 = vmatprep.subr.bf16.mxu1 %v4902_v38 }
 0x76c   :  { %2355 = vmatpush3.bf16.msra.mxu1 %v4903_v7 }
 0x76d   :  { %2356 = vmatprep.subr.bf16.mxu1 %v4904_v59 }
 0x770   :  { %2357 = vmatpush3.bf16.msra.mxu1 %v4905_v30 }
 0x771   :  { %2358 = vmatprep.subr.bf16.mxu1 %v4906_v45 }
 0x774   :  { %2359 = vmatpush3.bf16.msra.mxu1 %v4907_v9 }
 0x775   :  { %2360 = vmatprep.subr.bf16.mxu1 %v4908_v31 }
 0x778   :  { %2361 = vmatpush3.bf16.msra.mxu1 %v4909_v33 }
 0x779   :  { %2486 = vmatprep.subr.bf16.mxu1 %v4834_v14 }
 0x77b   :  { %1899 = vmatmul.mubr.bf16.vlgmr.msra.gmra.mrb[28].mxu1 %v1744_v47 }
 0x77c   :  { %2487 = vmatpush3.bf16.msra.mxu1 %v4910_v18  ;;  %2502 = vmatprep.mubr.msk.bf16.mxu1 %vm2527_vm0, %v4834_v14 }
 0x77d   :  { %2488 = vmatprep.subr.bf16.mxu1 %v4834_v14 }
 0x780   :  { %2489 = vmatpush3.bf16.msra.mxu1 %v4911_v11 }
 0x781   :  { %2490 = vmatprep.subr.bf16.mxu1 %v4834_v14 }
 0x784   :  { %2491 = vmatpush3.bf16.msra.mxu1 %v4912_v0 }
 0x785   :  { %2492 = vmatprep.subr.bf16.mxu1 %v4834_v14 }
 0x788   :  { %2493 = vmatpush3.bf16.msra.mxu1 %v4913_v4 }
 0x789   :  { %2494 = vmatprep.subr.bf16.mxu1 %v4834_v14 }
 0x78c   :  { %2495 = vmatpush3.bf16.msra.mxu1 %v4914_v15 }
 0x78d   :  { %2496 = vmatprep.subr.bf16.mxu1 %v4834_v14 }
 0x790   :  { %2497 = vmatpush3.bf16.msra.mxu1 %v4915_v19 }
 0x791   :  { %2498 = vmatprep.subr.bf16.mxu1 %v4834_v14 }
 0x794   :  { %2499 = vmatpush3.bf16.msra.mxu1 %v4916_v32 }
 0x795   :  { %2500 = vmatprep.subr.bf16.mxu1 %v4834_v14 }
 0x798   :  { %2501 = vmatpush3.bf16.msra.mxu1 %v4917_v46 }
 0x80e   :  { %v1698_v42 = vpop.f32.mrb[20].mxu1 }
 0x80f   :  { %v1704_v48 = vrot.slane %v1698_v42, 4  ;;  %v2464_v26 = vpop.f32.mrb[21].mxu1 }
 0x810   :  { %v1701_v41 = vpop.f32.mrb[22].mxu1 }
 0x811   :  { %v1705_v16 = vadd.f32 %v1704_v48, %v1698_v42  ;;  %v2465_v2 = vpop.f32.mrb[23].mxu1 }
 0x813   :  { %v1706_v17 = vrot.slane %v1705_v16, 2 }
 0x815   :  { %v1707_v14 = vadd.f32 %v1706_v17, %v1705_v16 }
 0x817   :  { %v1708_v22 = vrot.slane %v1707_v14, 1 }
 0x819   :  { %v1709_v49 = vadd.f32 %v1708_v22, %v1707_v14 }
 0x81b   :  { %v1710_v39 = vmul.f32 0.125, %v1709_v49 }
 0x81d   :  { %v1711_v1 = vsub.f32 %v1698_v42, %v1710_v39 }
 0x81f   :  { %v1712_v35 = vmul.f32 %v1711_v1, %v1711_v1 }
 0x821   :  { %v1713_v34 = vrot.slane %v1712_v35, 4 }
 0x823   :  { %v1714_v50 = vadd.f32 %v1713_v34, %v1712_v35 }
 0x825   :  { %v1715_v57 = vrot.slane %v1714_v50, 2 }
 0x827   :  { %v1716_v37 = vadd.f32 %v1715_v57, %v1714_v50 }
 0x829   :  { %v1717_v21 = vrot.slane %v1716_v37, 1 }
 0x82b   :  { %v1718_v29 = vadd.f32 %v1717_v21, %v1716_v37 }
 0x82d   :  { %v1719_v24 = vmul.f32 0.125, %v1718_v29 }
 0x82e   :  { %v2318_v44 = vpop.f32.mrb[24].mxu1 }
 0x82f   :  { %v1720_v6 = vadd.f32 1e-05, %v1719_v24  ;;  %v2319_v56 = vpop.f32.mrb[25].mxu1 }
 0x830   :  { %v2320_v8 = vadd.f32 %v2319_v56, %v2318_v44  ;;  %v2321_v61 = vpop.f32.mrb[26].mxu1 }
 0x831   :  { %2516 = vrsqrt.f32 %v1720_v6  ;;  %v2322_v63 = vpop.f32.mrb[27].mxu1 }
 0x832   :  { %v1821_v13 = vadd.f32 %v2320_v8, %v2298_v23 }
 0x834   :  { %v1861_v25 = vadd.f32 %v2342_v40, %v1821_v13 }
 0x83b   :  { %v2517_v27 = vpop.eup %2516 }
 0x83c   :  { %v1722_v52 = vmul.f32 %v2517_v27, %v1711_v1 }
 0x83e   :  { %v1723_v3 = vmul.f32 %v1722_v52, %v1722_v52 }
 0x840   :  { %1724 = vadd.xlane.f32.xlu0 %v1723_v3 }
 0x84e   :  { %v2362_v28 = vpop.f32.mrb[28].mxu1 }
 0x84f   :  { %v2363_v58 = vpop.f32.mrb[29].mxu1 }
 0x850   :  { %v2364_v10 = vadd.f32 %v2363_v58, %v2362_v28  ;;  %v2365_v38 = vpop.f32.mrb[30].mxu1 }
 0x851   :  { %v2366_v7 = vpop.f32.mrb[31].mxu1 }
 0x852   :  { %v1901_v59 = vadd.f32 %v2364_v10, %v1861_v25 }
 0x854   :  { %v1906_v30 = vpack.c.bf16 %v1901_v59, %v1901_v59 }
 0x856   :  { %2483 = vmatmul.mubr.bf16.vlgmr.msra.gmra.mrb[32].mxu0 %v1906_v30 }
 0x8cd   :  { %v1725_v45 = vpop.xlane.xlu0 %1724 }
 0x8ce   :  { %v1726_v9 = vmax.f32 %v1725_v45, 1e-24 }
 0x8d0   :  { %2518 = vrsqrt.f32 %v1726_v9 }
 0x8da   :  { %v2519_v51 = vpop.eup %2518 }
 0x8db   :  { %v1728_v31 = vmul.f32 %v2519_v51, %v1722_v52 }
 0x8dd   :  { %1729 = vst [vmem:[%s4693_s14] sm:$0xff] %v1728_v31 }
 0x929   :  { %v1941_v47 = vpop.f32.mrb[32].mxu0 }
 0x92a   :  { %v1947_v33 = vrot.slane %v1941_v47, 4  ;;  %v2484_v18 = vpop.f32.mrb[33].mxu0 }
 0x92b   :  { %v1944_v11 = vpop.f32.mrb[34].mxu0 }
 0x92c   :  { %v1948_v0 = vadd.f32 %v1947_v33, %v1941_v47  ;;  %v2485_v4 = vpop.f32.mrb[35].mxu0 }
 0x92e   :  { %v1949_v15 = vrot.slane %v1948_v0, 2 }
 0x930   :  { %v1950_v19 = vadd.f32 %v1949_v15, %v1948_v0 }
 0x932   :  { %v1951_v32 = vrot.slane %v1950_v19, 1 }
 0x934   :  { %v1952_v46 = vadd.f32 %v1951_v32, %v1950_v19 }
 0x936   :  { %v1953_v60 = vmul.f32 0.125, %v1952_v46 }
 0x938   :  { %v1954_v62 = vsub.f32 %v1941_v47, %v1953_v60 }
 0x93a   :  { %v1955_v43 = vmul.f32 %v1954_v62, %v1954_v62 }
 0x93c   :  { %v1956_v36 = vrot.slane %v1955_v43, 4 }
 0x93e   :  { %v1957_v23 = vadd.f32 %v1956_v36, %v1955_v43 }
 0x940   :  { %v1958_v5 = vrot.slane %v1957_v23, 2 }
 0x942   :  { %v1959_v20 = vadd.f32 %v1958_v5, %v1957_v23 }
 0x944   :  { %v1960_v40 = vrot.slane %v1959_v20, 1 }
 0x946   :  { %v1961_v54 = vadd.f32 %v1960_v40, %v1959_v20 }
 0x948   :  { %v1962_v55 = vmul.f32 0.125, %v1961_v54 }
 0x94a   :  { %v1963_v42 = vadd.f32 1e-05, %v1962_v55 }
 0x94c   :  { %2520 = vrsqrt.f32 %v1963_v42 }
 0x956   :  { %v2521_v48 = vpop.eup %2520 }
 0x957   :  { %v1965_v26 = vmul.f32 %v2521_v48, %v1954_v62 }
 0x959   :  { %v1966_v41 = vmul.f32 %v1965_v26, %v4470_v53 }
 0x95b   :  { %v1967_v16 = vadd.f32 %v1966_v41, %v4473_v12 }
 0x95d   :  { %v1968_v2 = vmax.f32 %v1967_v16, 0.0 }
 0x95f   :  { %v1969_v17 = vpack.c.bf16 %v1968_v2, %v1968_v2 }
 0x961   :  { %2503 = vmatmul.mubr.bf16.vlgmr.msra.gmra.mrb[32].mxu1 %v1969_v17 }
 0xa34   :  { %v2004_v14 = vpop.f32.mrb[32].mxu1 }
 0xa35   :  { %v2010_v22 = vrot.slane %v2004_v14, 4  ;;  %v2504_v49 = vpop.f32.mrb[33].mxu1 }
 0xa36   :  { %v2007_v39 = vpop.f32.mrb[34].mxu1 }
 0xa37   :  { %v2011_v1 = vadd.f32 %v2010_v22, %v2004_v14  ;;  %v2505_v35 = vpop.f32.mrb[35].mxu1 }
 0xa39   :  { %v2012_v34 = vrot.slane %v2011_v1, 2 }
 0xa3b   :  { %v2013_v50 = vadd.f32 %v2012_v34, %v2011_v1 }
 0xa3d   :  { %v2014_v57 = vrot.slane %v2013_v50, 1 }
 0xa3f   :  { %v2015_v37 = vadd.f32 %v2014_v57, %v2013_v50 }
 0xa41   :  { %v2016_v21 = vmul.f32 0.125, %v2015_v37 }
 0xa43   :  { %v2017_v29 = vsub.f32 %v2004_v14, %v2016_v21 }
 0xa45   :  { %v2018_v24 = vmul.f32 %v2017_v29, %v2017_v29 }
 0xa47   :  { %v2019_v44 = vrot.slane %v2018_v24, 4 }
 0xa49   :  { %v2020_v53 = vadd.f32 %v2019_v44, %v2018_v24 }
 0xa4b   :  { %v2021_v6 = vrot.slane %v2020_v53, 2 }
 0xa4d   :  { %v2022_v12 = vadd.f32 %v2021_v6, %v2020_v53 }
 0xa4f   :  { %v2023_v56 = vrot.slane %v2022_v12, 1 }
 0xa51   :  { %v2024_v8 = vadd.f32 %v2023_v56, %v2022_v12 }
 0xa53   :  { %v2025_v61 = vmul.f32 0.125, %v2024_v8 }
 0xa55   :  { %v2026_v63 = vadd.f32 1e-05, %v2025_v61 }
 0xa57   :  { %2522 = vrsqrt.f32 %v2026_v63 }
 0xa61   :  { %v2523_v13 = vpop.eup %2522 }
 0xa62   :  { %v2028_v25 = vmul.f32 %v2523_v13, %v2017_v29 }
 0xa64   :  { %v2029_v27 = vmul.f32 %v2028_v25, %v2028_v25 }
 0xa66   :  { %2030 = vadd.xlane.f32.xlu1 %v2029_v27 }
 0xaf3   :  { %v2031_v52 = vpop.xlane.xlu1 %2030 }
 0xaf4   :  { %v2032_v3 = vmax.f32 %v2031_v52, 1e-24 }
 0xaf6   :  { %2524 = vrsqrt.f32 %v2032_v3 }
 0xb00   :  { %v2525_v28 = vpop.eup %2524 }
 0xb01   :  { %v2034_v58 = vmul.f32 %v2525_v28, %v2028_v25 }
 0xb03   :  { %2035 = vst [vmem:[%s4694_s15] sm:$0xff] %v2034_v58 }

// kernel: moco_forward.3
= control target key start
LH: loop header
LB: loop body
LE: loop exit
PB: predicated region body
PF: predicated region fallthrough
CT: control target
= control target key end

     0   :  { %vm2305_vm0 = vmmov 0   ;;  %s3189_s2 = inlined_call_operand.vmem [shape: bf16[1024,128], index: 2, kind: input, shape index: {}]   ;;  %s3190_s0 = inlined_call_operand.vmem [shape: f32[8,1024], index: 0, kind: input, shape index: {}]   ;;  %s3191_s3 = inlined_call_operand.vmem [shape: bf16[128,128], index: 3, kind: input, shape index: {}]   ;;  %s3192_s6 = inlined_call_operand.vmem [shape: bf16[128,128], index: 6, kind: input, shape index: {}]   ;;  %s3193_s4 = inlined_call_operand.vmem [shape: f32[1,128], index: 4, kind: input, shape index: {}]   ;;  %s3194_s5 = inlined_call_operand.vmem [shape: f32[1,128], index: 5, kind: input, shape index: {}]   ;;  %s3195_s7 = inlined_call_operand.vmem [shape: bf16[128,128], index: 7, kind: input, shape index: {}]   ;;  %s3196_s10 = inlined_call_operand.vmem [shape: bf16[128,128], index: 10, kind: input, shape index: {}]   ;;  %s3197_s1 = inlined_call_operand.vmem [shape: f32[8,1024], index: 1, kind: input, shape index: {}]   ;;  %s3198_s8 = inlined_call_operand.vmem [shape: f32[1,128], index: 8, kind: input, shape index: {}]   ;;  %s3199_s9 = inlined_call_operand.vmem [shape: f32[1,128], index: 9, kind: input, shape index: {}]   ;;  %s3200_s11 = inlined_call_operand.vmem [shape: f32[8,128], index: 11, kind: output, shape index: {0}]   ;;  %s3201_s12 = inlined_call_operand.vmem [shape: f32[8,128], index: 12, kind: output, shape index: {1}]  }
   0x1   :  { %v2374_v0 = vld [vmem:[%s3189_s2 + $0x40] sm:$0xff]   ;;  %v2392_v4 = vld [vmem:[%s3189_s2 + $0x48] sm:$0xff]   ;;  %v2410_v8 = vld [vmem:[%s3189_s2 + $0x50] sm:$0xff]  }
   0x2   :  { %v2177_v1 = vld [vmem:[%s3189_s2 + $0xc0] sm:$0xff]   ;;  %1766 = vmatprep.subr.bf16.mxu0 %v2374_v0  ;;  %v2181_v5 = vld [vmem:[%s3189_s2 + $0xc8] sm:$0xff]   ;;  %v2185_v9 = vld [vmem:[%s3189_s2 + $0xd0] sm:$0xff]  }
   0x3   :  { %v2383_v2 = vld [vmem:[%s3189_s2] sm:$0xff]   ;;  %1788 = vmatprep.subr.bf16.mxu1 %v2177_v1  ;;  %v2401_v6 = vld [vmem:[%s3189_s2 + $0x8] sm:$0xff]   ;;  %v2419_v10 = vld [vmem:[%s3189_s2 + $0x10] sm:$0xff]  }
   0x4   :  { %v2179_v3 = vld [vmem:[%s3189_s2 + $0x80] sm:$0xff]   ;;  %1767 = vmatpush3.bf16.msra.mxu0 %v2383_v2  ;;  %v2183_v7 = vld [vmem:[%s3189_s2 + $0x88] sm:$0xff]   ;;  %v2187_v11 = vld [vmem:[%s3189_s2 + $0x90] sm:$0xff]  }
   0x5   :  { %1789 = vmatpush3.bf16.msra.mxu1 %v2179_v3  ;;  %1768 = vmatprep.subr.bf16.mxu0 %v2392_v4  ;;  %v2428_v12 = vld [vmem:[%s3189_s2 + $0x58] sm:$0xff]   ;;  %v2446_v16 = vld [vmem:[%s3189_s2 + $0x60] sm:$0xff]   ;;  %v2464_v20 = vld [vmem:[%s3189_s2 + $0x68] sm:$0xff]  }
   0x6   :  { %1790 = vmatprep.subr.bf16.mxu1 %v2181_v5  ;;  %v2189_v13 = vld [vmem:[%s3189_s2 + $0xd8] sm:$0xff]   ;;  %v2193_v17 = vld [vmem:[%s3189_s2 + $0xe0] sm:$0xff]   ;;  %v2197_v21 = vld [vmem:[%s3189_s2 + $0xe8] sm:$0xff]  }
   0x7   :  { %v2437_v14 = vld [vmem:[%s3189_s2 + $0x18] sm:$0xff]   ;;  %v2455_v18 = vld [vmem:[%s3189_s2 + $0x20] sm:$0xff]   ;;  %v2473_v22 = vld [vmem:[%s3189_s2 + $0x28] sm:$0xff]  }
   0x8   :  { %1769 = vmatpush3.bf16.msra.mxu0 %v2401_v6  ;;  %v2191_v15 = vld [vmem:[%s3189_s2 + $0x98] sm:$0xff]   ;;  %v2195_v19 = vld [vmem:[%s3189_s2 + $0xa0] sm:$0xff]   ;;  %v2199_v23 = vld [vmem:[%s3189_s2 + $0xa8] sm:$0xff]  }
   0x9   :  { %1791 = vmatpush3.bf16.msra.mxu1 %v2183_v7  ;;  %1770 = vmatprep.subr.bf16.mxu0 %v2410_v8  ;;  %v2482_v24 = vld [vmem:[%s3189_s2 + $0x70] sm:$0xff]   ;;  %v2500_v28 = vld [vmem:[%s3189_s2 + $0x78] sm:$0xff]   ;;  %v262_v32 = vld [vmem:[%s3190_s0 + $0x8] sm:$0xff] }
   0xa   :  { %1792 = vmatprep.subr.bf16.mxu1 %v2185_v9  ;;  %v2201_v25 = vld [vmem:[%s3189_s2 + $0xf0] sm:$0xff]   ;;  %v2205_v29 = vld [vmem:[%s3189_s2 + $0xf8] sm:$0xff]   ;;  %v261_v34 = vld [vmem:[%s3190_s0] sm:$0xff]  ;;  %v270_v35 = vpack.c.bf16 %v262_v32, %v262_v32  ;;  %v3214_v32 = vmov 0.0  }
   0xb   :  { %v2491_v26 = vld [vmem:[%s3189_s2 + $0x30] sm:$0xff]   ;;  %v2509_v30 = vld [vmem:[%s3189_s2 + $0x38] sm:$0xff]   ;;  %v269_v37 = vpack.c.bf16 %v261_v34, %v261_v34  ;;  %v2530_v40 = vld [vmem:[%s3189_s2 + $0x140] sm:$0xff]  }
   0xc   :  { %1771 = vmatpush3.bf16.msra.mxu0 %v2419_v10  ;;  %v2203_v27 = vld [vmem:[%s3189_s2 + $0xb0] sm:$0xff]   ;;  %v2207_v31 = vld [vmem:[%s3189_s2 + $0xb8] sm:$0xff]   ;;  %693 = vmatprep.mubr.bf16.mxu0 %v270_v35  ;;  %v2535_v41 = vld [vmem:[%s3189_s2 + $0x1c0] sm:$0xff]  }
   0xd   :  { %1793 = vmatpush3.bf16.msra.mxu1 %v2187_v11  ;;  %1772 = vmatprep.subr.bf16.mxu0 %v2428_v12  ;;  %v264_v33 = vld [vmem:[%s3190_s0 + $0x18] sm:$0xff]  ;;  %v263_v38 = vld [vmem:[%s3190_s0 + $0x10] sm:$0xff]  ;;  %3235 = vst [vmem:[#allocation2_spill] sm:$0xff] %v2535_v41  ;;  %v2540_v42 = vld [vmem:[%s3189_s2 + $0x100] sm:$0xff]  }
   0xe   :  { %1794 = vmatprep.subr.bf16.mxu1 %v2189_v13  ;;  %v272_v36 = vpack.c.bf16 %v264_v33, %v264_v33  ;;  %v271_v39 = vpack.c.bf16 %v263_v38, %v263_v38  ;;  %v2547_v43 = vld [vmem:[%s3189_s2 + $0x180] sm:$0xff]   ;;  %v2553_v44 = vld [vmem:[%s3189_s2 + $0x148] sm:$0xff]   ;;  %v2577_v48 = vld [vmem:[%s3189_s2 + $0x150] sm:$0xff]  }
   0xf   :  { %3236 = vst [vmem:[#allocation3_spill] sm:$0xff] %v2547_v43  ;;  %v2559_v45 = vld [vmem:[%s3189_s2 + $0x1c8] sm:$0xff]   ;;  %v2583_v49 = vld [vmem:[%s3189_s2 + $0x1d0] sm:$0xff]   ;;  %v2601_v52 = vld [vmem:[%s3189_s2 + $0x158] sm:$0xff]  }
  0x10   :  { %1773 = vmatpush3.bf16.msra.mxu0 %v2437_v14  ;;  %733 = vmatprep.mubr.bf16.mxu1 %v272_v36  ;;  %3237 = vst [vmem:[#allocation4_spill] sm:$0xff] %v2559_v45  ;;  %v2565_v46 = vld [vmem:[%s3189_s2 + $0x108] sm:$0xff]   ;;  %3239 = vst [vmem:[#allocation6_spill] sm:$0xff] %v2583_v49  ;;  %v2589_v50 = vld [vmem:[%s3189_s2 + $0x110] sm:$0xff]  }
  0x11   :  { %1795 = vmatpush3.bf16.msra.mxu1 %v2191_v15  ;;  %1774 = vmatprep.subr.bf16.mxu0 %v2446_v16  ;;  %v2571_v47 = vld [vmem:[%s3189_s2 + $0x188] sm:$0xff]   ;;  %v2595_v51 = vld [vmem:[%s3189_s2 + $0x190] sm:$0xff]   ;;  %v2607_v53 = vld [vmem:[%s3189_s2 + $0x1d8] sm:$0xff]  }
  0x12   :  { %1796 = vmatprep.subr.bf16.mxu1 %v2193_v17  ;;  %3238 = vst [vmem:[#allocation5_spill] sm:$0xff] %v2571_v47  ;;  %3240 = vst [vmem:[#allocation7_spill] sm:$0xff] %v2595_v51  ;;  %v2613_v54 = vld [vmem:[%s3189_s2 + $0x118] sm:$0xff]   ;;  %v2625_v56 = vld [vmem:[%s3189_s2 + $0x160] sm:$0xff]  }
  0x13   :  { %3241 = vst [vmem:[#allocation8_spill] sm:$0xff] %v2607_v53  ;;  %v2619_v55 = vld [vmem:[%s3189_s2 + $0x198] sm:$0xff]   ;;  %v2631_v57 = vld [vmem:[%s3189_s2 + $0x1e0] sm:$0xff]   ;;  %v2649_v60 = vld [vmem:[%s3189_s2 + $0x168] sm:$0xff]  }
  0x14   :  { %1775 = vmatpush3.bf16.msra.mxu0 %v2455_v18  ;;  %3242 = vst [vmem:[#allocation9_spill] sm:$0xff] %v2619_v55  ;;  %3243 = vst [vmem:[#allocation10_spill] sm:$0xff] %v2631_v57  ;;  %v2637_v58 = vld [vmem:[%s3189_s2 + $0x120] sm:$0xff]   ;;  %v2655_v61 = vld [vmem:[%s3189_s2 + $0x1e8] sm:$0xff]  }
  0x15   :  { %1797 = vmatpush3.bf16.msra.mxu1 %v2195_v19  ;;  %1776 = vmatprep.subr.bf16.mxu0 %v2464_v20  ;;  %v2643_v59 = vld [vmem:[%s3189_s2 + $0x1a0] sm:$0xff]   ;;  %3245 = vst [vmem:[#allocation12_spill] sm:$0xff] %v2655_v61  ;;  %v2661_v62 = vld [vmem:[%s3189_s2 + $0x128] sm:$0xff]   ;;  %v2673_v1 = vld [vmem:[%s3189_s2 + $0x170] sm:$0xff]  }
  0x16   :  { %1798 = vmatprep.subr.bf16.mxu1 %v2197_v21  ;;  %3244 = vst [vmem:[#allocation11_spill] sm:$0xff] %v2643_v59  ;;  %v2667_v63 = vld [vmem:[%s3189_s2 + $0x1a8] sm:$0xff]   ;;  %v2679_v3 = vld [vmem:[%s3189_s2 + $0x1f0] sm:$0xff]   ;;  %v2697_v9 = vld [vmem:[%s3189_s2 + $0x178] sm:$0xff]  }
  0x17   :  { %3246 = vst [vmem:[#allocation13_spill] sm:$0xff] %v2667_v63  ;;  %3247 = vst [vmem:[#allocation14_spill] sm:$0xff] %v2679_v3  ;;  %v2685_v5 = vld [vmem:[%s3189_s2 + $0x130] sm:$0xff]   ;;  %v2703_v11 = vld [vmem:[%s3189_s2 + $0x1f8] sm:$0xff]  }
  0x18   :  { %1777 = vmatpush3.bf16.msra.mxu0 %v2473_v22  ;;  %v2691_v7 = vld [vmem:[%s3189_s2 + $0x1b0] sm:$0xff]   ;;  %3249 = vst [vmem:[#allocation16_spill] sm:$0xff] %v2703_v11  ;;  %v2709_v13 = vld [vmem:[%s3189_s2 + $0x138] sm:$0xff]   ;;  %v266_v17 = vld [vmem:[%s3190_s0 + $0x28] sm:$0xff] }
  0x19   :  { %1799 = vmatpush3.bf16.msra.mxu1 %v2199_v23  ;;  %1778 = vmatprep.subr.bf16.mxu0 %v2482_v24  ;;  %3248 = vst [vmem:[#allocation15_spill] sm:$0xff] %v2691_v7  ;;  %v2715_v15 = vld [vmem:[%s3189_s2 + $0x1b8] sm:$0xff]   ;;  %v274_v21 = vpack.c.bf16 %v266_v17, %v266_v17  ;;  %v2735_v33 = vld [vmem:[%s3191_s3] sm:$0xff]   ;;  %v2742_v34 = vld [vmem:[%s3191_s3 + $0x8] sm:$0xff]  }
  0x1a   :  { %1800 = vmatprep.subr.bf16.mxu1 %v2201_v25  ;;  %3250 = vst [vmem:[#allocation17_spill] sm:$0xff] %v2715_v15  ;;  %v268_v19 = vld [vmem:[%s3190_s0 + $0x38] sm:$0xff]  ;;  %v265_v25 = vld [vmem:[%s3190_s0 + $0x20] sm:$0xff]  ;;  %v2748_v35 = vld [vmem:[%s3191_s3 + $0x10] sm:$0xff]  }
  0x1b   :  { %v276_v23 = vpack.c.bf16 %v268_v19, %v268_v19  ;;  %v2756_v36 = vld [vmem:[%s3191_s3 + $0x18] sm:$0xff]   ;;  %v2770_v38 = vld [vmem:[%s3191_s3 + $0x28] sm:$0xff]  }
  0x1c   :  { %1779 = vmatpush3.bf16.msra.mxu0 %v2491_v26  ;;  %v2785_v17 = vld [vmem:[%s3191_s3 + $0x38] sm:$0xff]  }
  0x1d   :  { %1801 = vmatpush3.bf16.msra.mxu1 %v2203_v27  ;;  %1780 = vmatprep.subr.bf16.mxu0 %v2500_v28  ;;  %v267_v27 = vld [vmem:[%s3190_s0 + $0x30] sm:$0xff] }
  0x1e   :  { %1802 = vmatprep.subr.bf16.mxu1 %v2205_v29  ;;  %v273_v29 = vpack.c.bf16 %v265_v25, %v265_v25 }
  0x20   :  { %1781 = vmatpush3.bf16.msra.mxu0 %v2509_v30 }
  0x21   :  { %1803 = vmatpush3.bf16.msra.mxu1 %v2207_v31  ;;  %1810 = vmatprep.subr.bf16.mxu0 %v2530_v40  ;;  %v275_v31 = vpack.c.bf16 %v267_v27, %v267_v27 }
  0x22   :  { %1832 = vmatprep.subr.bf16.mxu1 %v2535_v41 }
  0x23   :  { %694 = vmatmul.mubr.bf16.vlgmr.msra.gmra.mrb[0].mxu0 %v269_v37  ;;  %v2763_v37 = vld [vmem:[%s3191_s3 + $0x20] sm:$0xff]  }
  0x24   :  { %734 = vmatmul.mubr.bf16.vlgmr.msra.gmra.mrb[0].mxu1 %v271_v39  ;;  %1811 = vmatpush3.bf16.msra.mxu0 %v2540_v42  ;;  %v2778_v39 = vld [vmem:[%s3191_s3 + $0x30] sm:$0xff]  }
  0x25   :  { %1833 = vmatpush3.bf16.msra.mxu1 %v2547_v43  ;;  %1812 = vmatprep.subr.bf16.mxu0 %v2553_v44 }
  0x26   :  { %1834 = vmatprep.subr.bf16.mxu1 %v2559_v45  ;;  %773 = vmatprep.mubr.bf16.mxu0 %v274_v21 }
  0x27   :  { %813 = vmatprep.mubr.bf16.mxu1 %v276_v23 }
  0x28   :  { %1813 = vmatpush3.bf16.msra.mxu0 %v2565_v46 }
  0x29   :  { %1835 = vmatpush3.bf16.msra.mxu1 %v2571_v47  ;;  %1814 = vmatprep.subr.bf16.mxu0 %v2577_v48 }
  0x2a   :  { %1836 = vmatprep.subr.bf16.mxu1 %v2583_v49 }
  0x2c   :  { %1815 = vmatpush3.bf16.msra.mxu0 %v2589_v50 }
  0x2d   :  { %1837 = vmatpush3.bf16.msra.mxu1 %v2595_v51  ;;  %1816 = vmatprep.subr.bf16.mxu0 %v2601_v52 }
  0x2e   :  { %1838 = vmatprep.subr.bf16.mxu1 %v2607_v53 }
  0x30   :  { %1817 = vmatpush3.bf16.msra.mxu0 %v2613_v54 }
  0x31   :  { %1839 = vmatpush3.bf16.msra.mxu1 %v2619_v55  ;;  %1818 = vmatprep.subr.bf16.mxu0 %v2625_v56 }
  0x32   :  { %1840 = vmatprep.subr.bf16.mxu1 %v2631_v57 }
  0x34   :  { %1819 = vmatpush3.bf16.msra.mxu0 %v2637_v58 }
  0x35   :  { %1841 = vmatpush3.bf16.msra.mxu1 %v2643_v59  ;;  %1820 = vmatprep.subr.bf16.mxu0 %v2649_v60 }
  0x36   :  { %1842 = vmatprep.subr.bf16.mxu1 %v2655_v61 }
  0x38   :  { %1821 = vmatpush3.bf16.msra.mxu0 %v2661_v62 }
  0x39   :  { %1843 = vmatpush3.bf16.msra.mxu1 %v2667_v63  ;;  %1822 = vmatprep.subr.bf16.mxu0 %v2673_v1 }
  0x3a   :  { %1844 = vmatprep.subr.bf16.mxu1 %v2679_v3 }
  0x3c   :  { %1823 = vmatpush3.bf16.msra.mxu0 %v2685_v5 }
  0x3d   :  { %1845 = vmatpush3.bf16.msra.mxu1 %v2691_v7  ;;  %1824 = vmatprep.subr.bf16.mxu0 %v2697_v9 }
  0x3e   :  { %1846 = vmatprep.subr.bf16.mxu1 %v2703_v11 }
  0x40   :  { %1825 = vmatpush3.bf16.msra.mxu0 %v2709_v13 }
  0x41   :  { %1847 = vmatpush3.bf16.msra.mxu1 %v2715_v15  ;;  %2014 = vmatprep.subr.bf16.mxu0 %v3214_v32 }
  0x42   :  { %2034 = vmatprep.subr.bf16.mxu1 %v3214_v32 }
  0x43   :  { %774 = vmatmul.mubr.bf16.vlgmr.msra.gmra.mrb[4].mxu0 %v273_v29 }
  0x44   :  { %814 = vmatmul.mubr.bf16.vlgmr.msra.gmra.mrb[4].mxu1 %v275_v31  ;;  %2015 = vmatpush3.bf16.msra.mxu0 %v2735_v33 }
  0x45   :  { %2016 = vmatprep.subr.bf16.mxu0 %v3214_v32  ;;  %2030 = vmatprep.mubr.msk.bf16.mxu0 %vm2305_vm0, %v3214_v32 }
  0x46   :  { %2050 = vmatprep.mubr.msk.bf16.mxu1 %vm2305_vm0, %v3214_v32 }
  0x48   :  { %2017 = vmatpush3.bf16.msra.mxu0 %v2742_v34 }
  0x49   :  { %2018 = vmatprep.subr.bf16.mxu0 %v3214_v32 }
  0x4c   :  { %2019 = vmatpush3.bf16.msra.mxu0 %v2748_v35 }
  0x4d   :  { %2020 = vmatprep.subr.bf16.mxu0 %v3214_v32 }
  0x50   :  { %2021 = vmatpush3.bf16.msra.mxu0 %v2756_v36 }
  0x51   :  { %2022 = vmatprep.subr.bf16.mxu0 %v3214_v32 }
  0x54   :  { %2023 = vmatpush3.bf16.msra.mxu0 %v2763_v37 }
  0x55   :  { %2024 = vmatprep.subr.bf16.mxu0 %v3214_v32 }
  0x58   :  { %2025 = vmatpush3.bf16.msra.mxu0 %v2770_v38 }
  0x59   :  { %2026 = vmatprep.subr.bf16.mxu0 %v3214_v32 }
  0x5c   :  { %2027 = vmatpush3.bf16.msra.mxu0 %v2778_v39 }
  0x5d   :  { %2028 = vmatprep.subr.bf16.mxu0 %v3214_v32 }
  0x60   :  { %2029 = vmatpush3.bf16.msra.mxu0 %v2785_v17 }
  0x61   :  { %2054 = vmatprep.subr.bf16.mxu0 %v3214_v32 }
  0xf6   :  { %v1782_v19 = vpop.f32.mrb[0].mxu0 }
  0xf7   :  { %v1804_v21 = vpop.f32.mrb[0].mxu1  ;;  %v1783_v23 = vpop.f32.mrb[1].mxu0 }
  0xf8   :  { %v1805_v25 = vpop.f32.mrb[1].mxu1  ;;  %v1784_v27 = vadd.f32 %v1783_v23, %v1782_v19  ;;  %v1785_v31 = vpop.f32.mrb[2].mxu0  ;;  %v3251_v19 = vmov 0.0  }
  0xf9   :  { %v1806_v29 = vadd.f32 %v1805_v25, %v1804_v21  ;;  %v1807_v15 = vpop.f32.mrb[2].mxu1  ;;  %v1786_v11 = vpop.f32.mrb[3].mxu0 }
  0xfa   :  { %v1808_v7 = vpop.f32.mrb[3].mxu1 }
  0xfb   :  { %v736_v3 = vadd.f32 %v1806_v29, %v1784_v27  ;;  %v2798_v7 = vld [vmem:[%s3192_s6] sm:$0xff]  }
  0xfc   :  { %2035 = vmatpush3.bf16.msra.mxu1 %v2798_v7 }
  0xfd   :  { %2036 = vmatprep.subr.bf16.mxu1 %v3251_v19 }
 0x116   :  { %v1826_v63 = vpop.f32.mrb[4].mxu0 }
 0x117   :  { %v1848_v61 = vpop.f32.mrb[4].mxu1  ;;  %v1827_v59 = vpop.f32.mrb[5].mxu0 }
 0x118   :  { %v1828_v57 = vadd.f32 %v1827_v59, %v1826_v63  ;;  %v1849_v55 = vpop.f32.mrb[5].mxu1  ;;  %v1829_v53 = vpop.f32.mrb[6].mxu0 }
 0x119   :  { %v1850_v51 = vadd.f32 %v1849_v55, %v1848_v61  ;;  %v1851_v49 = vpop.f32.mrb[6].mxu1  ;;  %v1830_v32 = vpop.f32.mrb[7].mxu0  ;;  %v2846_v53 = vld [vmem:[%s3192_s6 + $0x38] sm:$0xff]  }
 0x11a   :  { %v776_v47 = vadd.f32 %v1828_v57, %v736_v3  ;;  %v1852_v45 = vpop.f32.mrb[7].mxu1  ;;  %v2805_v49 = vld [vmem:[%s3192_s6 + $0x8] sm:$0xff]   ;;  %3257 = vst [vmem:[#allocation23_spill] sm:$0xff] %v2846_v53 }
 0x11b   :  { %2037 = vmatpush3.bf16.msra.mxu1 %v2805_v49  ;;  %v2826_v45 = vld [vmem:[%s3192_s6 + $0x20] sm:$0xff]  }
 0x11c   :  { %v816_v43 = vadd.f32 %v1850_v51, %v776_v47  ;;  %2038 = vmatprep.subr.bf16.mxu1 %v3251_v19  ;;  %3254 = vst [vmem:[#allocation20_spill] sm:$0xff] %v2826_v45  ;;  %v2833_v47 = vld [vmem:[%s3192_s6 + $0x28] sm:$0xff]   ;;  %v2840_v51 = vld [vmem:[%s3192_s6 + $0x30] sm:$0xff]  }
 0x11d   :  { %3255 = vst [vmem:[#allocation21_spill] sm:$0xff] %v2833_v47  ;;  %3256 = vst [vmem:[#allocation22_spill] sm:$0xff] %v2840_v51 }
 0x11e   :  { %v821_v41 = vpack.c.bf16 %v816_v43, %v816_v43  ;;  %v2819_v43 = vld [vmem:[%s3192_s6 + $0x18] sm:$0xff]  }
 0x11f   :  { %3253 = vst [vmem:[#allocation19_spill] sm:$0xff] %v2819_v43 }
 0x120   :  { %2031 = vmatmul.mubr.bf16.vlgmr.msra.gmra.mrb[8].mxu0 %v821_v41  ;;  %v2812_v41 = vld [vmem:[%s3192_s6 + $0x10] sm:$0xff]  }
 0x121   :  { %2070 = vmatprep.mubr.msk.bf16.mxu0 %vm2305_vm0, %v3251_v19  ;;  %3252 = vst [vmem:[#allocation18_spill] sm:$0xff] %v2812_v41  ;;  %2039 = vmatpush3.bf16.msra.mxu1 %v2812_v41 }
 0x122   :  { %2040 = vmatprep.subr.bf16.mxu1 %v3251_v19 }
 0x125   :  { %2041 = vmatpush3.bf16.msra.mxu1 %v2819_v43 }
 0x126   :  { %2042 = vmatprep.subr.bf16.mxu1 %v3251_v19 }
 0x129   :  { %2043 = vmatpush3.bf16.msra.mxu1 %v2826_v45 }
 0x12a   :  { %2044 = vmatprep.subr.bf16.mxu1 %v3251_v19 }
 0x12d   :  { %2045 = vmatpush3.bf16.msra.mxu1 %v2833_v47 }
 0x12e   :  { %2046 = vmatprep.subr.bf16.mxu1 %v3251_v19 }
 0x131   :  { %2047 = vmatpush3.bf16.msra.mxu1 %v2840_v51 }
 0x132   :  { %2048 = vmatprep.subr.bf16.mxu1 %v3251_v19 }
 0x135   :  { %2049 = vmatpush3.bf16.msra.mxu1 %v2846_v53 }
 0x136   :  { %2074 = vmatprep.subr.bf16.mxu1 %v3251_v19 }
 0x1f3   :  { %v904_v55 = vpop.f32.mrb[8].mxu0 }
 0x1f4   :  { %v910_v57 = vrot.slane %v904_v55, 4  ;;  %v2032_v59 = vpop.f32.mrb[9].mxu0 }
 0x1f5   :  { %v907_v61 = vpop.f32.mrb[10].mxu0 }
 0x1f6   :  { %v911_v63 = vadd.f32 %v910_v57, %v904_v55  ;;  %v2033_v3 = vpop.f32.mrb[11].mxu0  ;;  %v2854_v57 = vld [vmem:[%s3193_s4] ss:$0 sm:$0xff] }
 0x1f7   :  { %3258 = vst [vmem:[#allocation24_spill] sm:$0xff] %v2854_v57  ;;  %v2889_v3 = vld [vmem:[%s3195_s7 + $0x18] sm:$0xff]  }
 0x1f8   :  { %v912_v11 = vrot.slane %v911_v63, 2  ;;  %3262 = vst [vmem:[#allocation28_spill] sm:$0xff] %v2889_v3 }
 0x1fa   :  { %v913_v15 = vadd.f32 %v912_v11, %v911_v63  ;;  %v2896_v11 = vld [vmem:[%s3195_s7 + $0x20] sm:$0xff]  }
 0x1fb   :  { %3263 = vst [vmem:[#allocation29_spill] sm:$0xff] %v2896_v11 }
 0x1fc   :  { %v914_v32 = vrot.slane %v913_v15, 1 }
 0x1fe   :  { %v915_v21 = vadd.f32 %v914_v32, %v913_v15  ;;  %v2903_v15 = vld [vmem:[%s3195_s7 + $0x28] sm:$0xff]   ;;  %v2910_v32 = vld [vmem:[%s3195_s7 + $0x30] sm:$0xff]  }
 0x1ff   :  { %3264 = vst [vmem:[#allocation30_spill] sm:$0xff] %v2903_v15  ;;  %3265 = vst [vmem:[#allocation31_spill] sm:$0xff] %v2910_v32 }
 0x200   :  { %v917_v23 = vmul.f32 0.125, %v915_v21  ;;  %v2917_v21 = vld [vmem:[%s3195_s7 + $0x38] sm:$0xff]  }
 0x201   :  { %3266 = vst [vmem:[#allocation32_spill] sm:$0xff] %v2917_v21 }
 0x202   :  { %v918_v25 = vsub.f32 %v904_v55, %v917_v23  ;;  %v2859_v55 = vld [vmem:[%s3194_s5] ss:$0 sm:$0xff] }
 0x203   :  { %3259 = vst [vmem:[#allocation25_spill] sm:$0xff] %v2859_v55 }
 0x204   :  { %v919_v27 = vmul.f32 %v918_v25, %v918_v25 }
 0x206   :  { %v920_v29 = vrot.slane %v919_v27, 4 }
 0x208   :  { %v921_v31 = vadd.f32 %v920_v29, %v919_v27 }
 0x20a   :  { %v922_v51 = vrot.slane %v921_v31, 2 }
 0x20c   :  { %v923_v47 = vadd.f32 %v922_v51, %v921_v31 }
 0x20e   :  { %v924_v53 = vrot.slane %v923_v47, 1 }
 0x210   :  { %v925_v45 = vadd.f32 %v924_v53, %v923_v47  ;;  %v2882_v53 = vld [vmem:[%s3195_s7 + $0x10] sm:$0xff]  }
 0x211   :  { %3261 = vst [vmem:[#allocation27_spill] sm:$0xff] %v2882_v53 }
 0x212   :  { %v926_v43 = vmul.f32 0.125, %v925_v45 }
 0x214   :  { %v927_v41 = vadd.f32 1e-05, %v926_v43  ;;  %v2875_v43 = vld [vmem:[%s3195_s7 + $0x8] sm:$0xff]  }
 0x215   :  { %3260 = vst [vmem:[#allocation26_spill] sm:$0xff] %v2875_v43 }
 0x216   :  { %2272 = vrsqrt.f32 %v927_v41  ;;  %v2868_v41 = vld [vmem:[%s3195_s7] sm:$0xff]  }
 0x217   :  { %2055 = vmatpush3.bf16.msra.mxu0 %v2868_v41 }
 0x218   :  { %2056 = vmatprep.subr.bf16.mxu0 %v3251_v19 }
 0x21b   :  { %2057 = vmatpush3.bf16.msra.mxu0 %v2875_v43 }
 0x21c   :  { %2058 = vmatprep.subr.bf16.mxu0 %v3251_v19 }
 0x21f   :  { %2059 = vmatpush3.bf16.msra.mxu0 %v2882_v53 }
 0x220   :  { %v2273_v59 = vpop.eup %2272  ;;  %2060 = vmatprep.subr.bf16.mxu0 %v3251_v19 }
 0x221   :  { %v929_v61 = vmul.f32 %v2273_v59, %v918_v25 }
 0x223   :  { %v930_v63 = vmul.f32 %v2854_v57, %v929_v61  ;;  %2061 = vmatpush3.bf16.msra.mxu0 %v2889_v3 }
 0x224   :  { %2062 = vmatprep.subr.bf16.mxu0 %v3251_v19 }
 0x225   :  { %v931_v51 = vadd.f32 %v2859_v55, %v930_v63 }
 0x227   :  { %v932_v47 = vmax.f32 %v931_v51, 0.0  ;;  %2063 = vmatpush3.bf16.msra.mxu0 %v2896_v11 }
 0x228   :  { %2064 = vmatprep.subr.bf16.mxu0 %v3251_v19 }
 0x229   :  { %v933_v45 = vpack.c.bf16 %v932_v47, %v932_v47 }
 0x22b   :  { %2051 = vmatmul.mubr.bf16.vlgmr.msra.gmra.mrb[8].mxu1 %v933_v45  ;;  %2065 = vmatpush3.bf16.msra.mxu0 %v2903_v15 }
 0x22c   :  { %2090 = vmatprep.mubr.msk.bf16.mxu1 %vm2305_vm0, %v3251_v19  ;;  %2066 = vmatprep.subr.bf16.mxu0 %v3251_v19 }
 0x22f   :  { %2067 = vmatpush3.bf16.msra.mxu0 %v2910_v32 }
 0x230   :  { %2068 = vmatprep.subr.bf16.mxu0 %v3251_v19 }
 0x233   :  { %2069 = vmatpush3.bf16.msra.mxu0 %v2917_v21 }
 0x234   :  { %1890 = vmatprep.subr.bf16.mxu0 %v2374_v0 }
 0x2fe   :  { %v1016_v23 = vpop.f32.mrb[8].mxu1 }
 0x2ff   :  { %v1022_v25 = vrot.slane %v1016_v23, 4  ;;  %v2052_v27 = vpop.f32.mrb[9].mxu1 }
 0x300   :  { %v1019_v29 = vpop.f32.mrb[10].mxu1 }
 0x301   :  { %v1023_v31 = vadd.f32 %v1022_v25, %v1016_v23  ;;  %v2053_v59 = vpop.f32.mrb[11].mxu1 }
 0x302   :  { %v2291_v59 = vld [vmem:[%s3189_s2 + $0x88] sm:$0xff]  }
 0x303   :  { %v1024_v61 = vrot.slane %v1023_v31, 2 }
 0x305   :  { %v1025_v63 = vadd.f32 %v1024_v61, %v1023_v31  ;;  %v2290_v31 = vld [vmem:[%s3189_s2 + $0xc8] sm:$0xff]   ;;  %v2292_v61 = vld [vmem:[%s3189_s2 + $0xd0] sm:$0xff]  }
 0x307   :  { %v1026_v51 = vrot.slane %v1025_v63, 1 }
 0x309   :  { %v1027_v47 = vadd.f32 %v1026_v51, %v1025_v63  ;;  %v2293_v63 = vld [vmem:[%s3189_s2 + $0x90] sm:$0xff]   ;;  %v2294_v51 = vld [vmem:[%s3189_s2 + $0xd8] sm:$0xff]  }
 0x30b   :  { %v1028_v45 = vmul.f32 0.125, %v1027_v47  ;;  %v2295_v47 = vld [vmem:[%s3189_s2 + $0x98] sm:$0xff]  }
 0x30d   :  { %v1029_v55 = vsub.f32 %v1016_v23, %v1028_v45  ;;  %v2289_v23 = vld [vmem:[%s3189_s2 + $0x80] sm:$0xff]  }
 0x30e   :  { %v2296_v45 = vld [vmem:[%s3189_s2 + $0xe0] sm:$0xff]  }
 0x30f   :  { %v1030_v57 = vmul.f32 %v1029_v55, %v1029_v55 }
 0x311   :  { %v1031_v32 = vrot.slane %v1030_v57, 4 }
 0x313   :  { %v1032_v15 = vadd.f32 %v1031_v32, %v1030_v57  ;;  %v3044_v57 = vld [vmem:[%s3198_s8] ss:$0 sm:$0xff] }
 0x315   :  { %v1033_v11 = vrot.slane %v1032_v15, 2 }
 0x317   :  { %v1034_v3 = vadd.f32 %v1033_v11, %v1032_v15  ;;  %v1251_v11 = vld [vmem:[%s3197_s1 + $0x18] sm:$0xff] }
 0x318   :  { %v1259_v32 = vpack.c.bf16 %v1251_v11, %v1251_v11 }
 0x319   :  { %v1035_v21 = vrot.slane %v1034_v3, 1 }
 0x31b   :  { %v1036_v53 = vadd.f32 %v1035_v21, %v1034_v3 }
 0x31d   :  { %v1037_v0 = vmul.f32 0.125, %v1036_v53 }
 0x31f   :  { %v1038_v43 = vadd.f32 1e-05, %v1037_v0  ;;  %v2297_v0 = vld [vmem:[%s3189_s2 + $0xa0] sm:$0xff]  }
 0x321   :  { %2274 = vrsqrt.f32 %v1038_v43  ;;  %v3049_v43 = vld [vmem:[%s3199_s9] ss:$0 sm:$0xff] }
 0x32b   :  { %v2275_v27 = vpop.eup %2274 }
 0x32c   :  { %v1040_v29 = vmul.f32 %v2275_v27, %v1029_v55  ;;  %v2298_v27 = vld [vmem:[%s3189_s2 + $0xe8] sm:$0xff]  }
 0x32e   :  { %v1041_v25 = vpack.c.bf16 %v1040_v29, %v1040_v29  ;;  %v2299_v29 = vld [vmem:[%s3189_s2 + $0xa8] sm:$0xff]  }
 0x330   :  { %2071 = vmatmul.mubr.bf16.vlgmr.msra.gmra.mrb[12].mxu0 %v1041_v25  ;;  %v2300_v25 = vld [vmem:[%s3189_s2 + $0xf0] sm:$0xff]  }
 0x331   :  { %1891 = vmatpush3.bf16.msra.mxu0 %v2383_v2  ;;  %v2940_v2 = vld [vmem:[%s3196_s10] sm:$0xff]  }
 0x332   :  { %1892 = vmatprep.subr.bf16.mxu0 %v2392_v4  ;;  %2075 = vmatpush3.bf16.msra.mxu1 %v2940_v2  ;;  %v2947_v4 = vld [vmem:[%s3196_s10 + $0x8] sm:$0xff]  }
 0x333   :  { %2076 = vmatprep.subr.bf16.mxu1 %v3251_v19 }
 0x335   :  { %1893 = vmatpush3.bf16.msra.mxu0 %v2401_v6  ;;  %v2954_v6 = vld [vmem:[%s3196_s10 + $0x10] sm:$0xff]  }
 0x336   :  { %1894 = vmatprep.subr.bf16.mxu0 %v2410_v8  ;;  %2077 = vmatpush3.bf16.msra.mxu1 %v2947_v4  ;;  %v2961_v8 = vld [vmem:[%s3196_s10 + $0x18] sm:$0xff]  }
 0x337   :  { %2078 = vmatprep.subr.bf16.mxu1 %v3251_v19 }
 0x339   :  { %1895 = vmatpush3.bf16.msra.mxu0 %v2419_v10  ;;  %v2968_v10 = vld [vmem:[%s3196_s10 + $0x20] sm:$0xff]  }
 0x33a   :  { %1896 = vmatprep.subr.bf16.mxu0 %v2428_v12  ;;  %2079 = vmatpush3.bf16.msra.mxu1 %v2954_v6  ;;  %v2975_v12 = vld [vmem:[%s3196_s10 + $0x28] sm:$0xff]  }
 0x33b   :  { %2080 = vmatprep.subr.bf16.mxu1 %v3251_v19 }
 0x33d   :  { %1897 = vmatpush3.bf16.msra.mxu0 %v2437_v14  ;;  %v2982_v14 = vld [vmem:[%s3196_s10 + $0x30] sm:$0xff]  }
 0x33e   :  { %1898 = vmatprep.subr.bf16.mxu0 %v2446_v16  ;;  %2081 = vmatpush3.bf16.msra.mxu1 %v2961_v8  ;;  %v2988_v16 = vld [vmem:[%s3196_s10 + $0x38] sm:$0xff]  }
 0x33f   :  { %2082 = vmatprep.subr.bf16.mxu1 %v3251_v19 }
 0x341   :  { %1899 = vmatpush3.bf16.msra.mxu0 %v2455_v18  ;;  %v2288_v18 = vld [vmem:[%s3189_s2 + $0xc0] sm:$0xff]  }
 0x342   :  { %1900 = vmatprep.subr.bf16.mxu0 %v2464_v20  ;;  %2083 = vmatpush3.bf16.msra.mxu1 %v2968_v10  ;;  %v1249_v20 = vld [vmem:[%s3197_s1 + $0x8] sm:$0xff] }
 0x343   :  { %2084 = vmatprep.subr.bf16.mxu1 %v3251_v19 }
 0x345   :  { %1901 = vmatpush3.bf16.msra.mxu0 %v2473_v22  ;;  %v1257_v22 = vpack.c.bf16 %v1249_v20, %v1249_v20  ;;  %v1250_v20 = vld [vmem:[%s3197_s1 + $0x10] sm:$0xff] }
 0x346   :  { %1902 = vmatprep.subr.bf16.mxu0 %v2482_v24  ;;  %2085 = vmatpush3.bf16.msra.mxu1 %v2975_v12  ;;  %v1248_v24 = vld [vmem:[%s3197_s1] sm:$0xff] }
 0x347   :  { %2086 = vmatprep.subr.bf16.mxu1 %v3251_v19  ;;  %1296 = vmatprep.mubr.bf16.mxu0 %v1257_v22  ;;  %v2302_v22 = vld [vmem:[%s3189_s2 + $0xf8] sm:$0xff]  }
 0x349   :  { %1903 = vmatpush3.bf16.msra.mxu0 %v2491_v26  ;;  %v1256_v26 = vpack.c.bf16 %v1248_v24, %v1248_v24  ;;  %v1255_v24 = vld [vmem:[%s3197_s1 + $0x38] sm:$0xff] }
 0x34a   :  { %1904 = vmatprep.subr.bf16.mxu0 %v2500_v28  ;;  %2087 = vmatpush3.bf16.msra.mxu1 %v2982_v14  ;;  %v1253_v28 = vld [vmem:[%s3197_s1 + $0x28] sm:$0xff] }
 0x34b   :  { %2088 = vmatprep.subr.bf16.mxu1 %v3251_v19 }
 0x34d   :  { %1905 = vmatpush3.bf16.msra.mxu0 %v2509_v30  ;;  %v1261_v30 = vpack.c.bf16 %v1253_v28, %v1253_v28  ;;  %v2303_v28 = vld [vmem:[%s3189_s2 + $0xb8] sm:$0xff]  }
 0x34e   :  { %1934 = vmatprep.subr.bf16.mxu0 %v2530_v40  ;;  %2089 = vmatpush3.bf16.msra.mxu1 %v2988_v16  ;;  %v1252_v40 = vld [vmem:[%s3197_s1 + $0x20] sm:$0xff] }
 0x34f   :  { %1912 = vmatprep.subr.bf16.mxu1 %v2288_v18  ;;  %v2301_v18 = vld [vmem:[%s3189_s2 + $0xb0] sm:$0xff]  }
 0x350   :  { %1297 = vmatmul.mubr.bf16.vlgmr.msra.gmra.mrb[16].mxu0 %v1256_v26  ;;  %v1258_v26 = vpack.c.bf16 %v1250_v20, %v1250_v20 }
 0x351   :  { %1935 = vmatpush3.bf16.msra.mxu0 %v2540_v42  ;;  %v1260_v42 = vpack.c.bf16 %v1252_v40, %v1252_v40  ;;  %1376 = vmatprep.mubr.bf16.mxu0 %v1261_v30  ;;  %v1263_v30 = vpack.c.bf16 %v1255_v24, %v1255_v24  ;;  %v3267_v40 = vld [vmem:[#allocation2_spill] sm:$0xff] }
 0x352   :  { %1936 = vmatprep.subr.bf16.mxu0 %v2553_v44 }
 0x355   :  { %1937 = vmatpush3.bf16.msra.mxu0 %v2565_v46 }
 0x356   :  { %1938 = vmatprep.subr.bf16.mxu0 %v2577_v48 }
 0x359   :  { %1939 = vmatpush3.bf16.msra.mxu0 %v2589_v50 }
 0x35a   :  { %1940 = vmatprep.subr.bf16.mxu0 %v2601_v52 }
 0x35d   :  { %1941 = vmatpush3.bf16.msra.mxu0 %v2613_v54 }
 0x35e   :  { %1942 = vmatprep.subr.bf16.mxu0 %v2625_v56 }
 0x361   :  { %1943 = vmatpush3.bf16.msra.mxu0 %v2637_v58 }
 0x362   :  { %1944 = vmatprep.subr.bf16.mxu0 %v2649_v60 }
 0x365   :  { %1945 = vmatpush3.bf16.msra.mxu0 %v2661_v62 }
 0x366   :  { %1946 = vmatprep.subr.bf16.mxu0 %v2673_v1 }
 0x369   :  { %1947 = vmatpush3.bf16.msra.mxu0 %v2685_v5 }
 0x36a   :  { %1948 = vmatprep.subr.bf16.mxu0 %v2697_v9 }
 0x36d   :  { %1949 = vmatpush3.bf16.msra.mxu0 %v2709_v13 }
 0x36e   :  { %2094 = vmatprep.subr.bf16.mxu0 %v3251_v19 }
 0x370   :  { %1377 = vmatmul.mubr.bf16.vlgmr.msra.gmra.mrb[20].mxu0 %v1260_v42  ;;  %v3268_v42 = vld [vmem:[#allocation3_spill] sm:$0xff] }
 0x371   :  { %2095 = vmatpush3.bf16.msra.mxu0 %v2735_v33  ;;  %2110 = vmatprep.mubr.msk.bf16.mxu0 %vm2305_vm0, %v3251_v19 }
 0x372   :  { %2096 = vmatprep.subr.bf16.mxu0 %v3251_v19 }
 0x375   :  { %2097 = vmatpush3.bf16.msra.mxu0 %v2742_v34 }
 0x376   :  { %2098 = vmatprep.subr.bf16.mxu0 %v3251_v19 }
 0x379   :  { %2099 = vmatpush3.bf16.msra.mxu0 %v2748_v35 }
 0x37a   :  { %2100 = vmatprep.subr.bf16.mxu0 %v3251_v19 }
 0x37d   :  { %2101 = vmatpush3.bf16.msra.mxu0 %v2756_v36 }
 0x37e   :  { %2102 = vmatprep.subr.bf16.mxu0 %v3251_v19 }
 0x381   :  { %2103 = vmatpush3.bf16.msra.mxu0 %v2763_v37 }
 0x382   :  { %2104 = vmatprep.subr.bf16.mxu0 %v3251_v19 }
 0x385   :  { %2105 = vmatpush3.bf16.msra.mxu0 %v2770_v38 }
 0x386   :  { %2106 = vmatprep.subr.bf16.mxu0 %v3251_v19 }
 0x389   :  { %2107 = vmatpush3.bf16.msra.mxu0 %v2778_v39 }
 0x38a   :  { %2108 = vmatprep.subr.bf16.mxu0 %v3251_v19 }
 0x38d   :  { %2109 = vmatpush3.bf16.msra.mxu0 %v2785_v17 }
 0x38e   :  { %2134 = vmatprep.subr.bf16.mxu0 %v3251_v19 }
 0x403   :  { %v1124_v44 = vpop.f32.mrb[12].mxu0 }
 0x404   :  { %v1130_v46 = vrot.slane %v1124_v44, 4  ;;  %v2072_v48 = vpop.f32.mrb[13].mxu0 }
 0x405   :  { %v1127_v50 = vpop.f32.mrb[14].mxu0  ;;  %v3271_v48 = vld [vmem:[#allocation6_spill] sm:$0xff] }
 0x406   :  { %v1131_v52 = vadd.f32 %v1130_v46, %v1124_v44  ;;  %v2073_v54 = vpop.f32.mrb[15].mxu0  ;;  %v3270_v46 = vld [vmem:[#allocation5_spill] sm:$0xff]  ;;  %v3272_v50 = vld [vmem:[#allocation7_spill] sm:$0xff] }
 0x407   :  { %v3274_v54 = vld [vmem:[#allocation9_spill] sm:$0xff] }
 0x408   :  { %v1132_v56 = vrot.slane %v1131_v52, 2 }
 0x40a   :  { %v1133_v58 = vadd.f32 %v1132_v56, %v1131_v52  ;;  %v3273_v52 = vld [vmem:[#allocation8_spill] sm:$0xff]  ;;  %v3275_v56 = vld [vmem:[#allocation10_spill] sm:$0xff] }
 0x40c   :  { %v1134_v60 = vrot.slane %v1133_v58, 1 }
 0x40e   :  { %v1135_v62 = vadd.f32 %v1134_v60, %v1133_v58  ;;  %v3276_v58 = vld [vmem:[#allocation11_spill] sm:$0xff]  ;;  %v3277_v60 = vld [vmem:[#allocation12_spill] sm:$0xff] }
 0x410   :  { %v1136_v1 = vmul.f32 0.125, %v1135_v62  ;;  %v3278_v62 = vld [vmem:[#allocation13_spill] sm:$0xff] }
 0x412   :  { %v1137_v5 = vsub.f32 %v1124_v44, %v1136_v1  ;;  %v3269_v44 = vld [vmem:[#allocation4_spill] sm:$0xff]  ;;  %v3279_v1 = vld [vmem:[#allocation14_spill] sm:$0xff] }
 0x414   :  { %v1138_v9 = vmul.f32 %v1137_v5, %v1137_v5 }
 0x416   :  { %v1139_v13 = vrot.slane %v1138_v9, 4 }
 0x418   :  { %v1140_v33 = vadd.f32 %v1139_v13, %v1138_v9  ;;  %v1254_v9 = vld [vmem:[%s3197_s1 + $0x30] sm:$0xff] }
 0x419   :  { %v3281_v13 = vld [vmem:[#allocation16_spill] sm:$0xff] }
 0x41a   :  { %v1141_v34 = vrot.slane %v1140_v33, 2 }
 0x41c   :  { %v1142_v35 = vadd.f32 %v1141_v34, %v1140_v33  ;;  %v1262_v33 = vpack.c.bf16 %v1254_v9, %v1254_v9  ;;  %v3282_v34 = vld [vmem:[#allocation17_spill] sm:$0xff] }
 0x41e   :  { %v1143_v36 = vrot.slane %v1142_v35, 1 }
 0x420   :  { %v1144_v37 = vadd.f32 %v1143_v36, %v1142_v35  ;;  %v3283_v35 = vld [vmem:[#allocation18_spill] sm:$0xff]  ;;  %v3284_v36 = vld [vmem:[#allocation19_spill] sm:$0xff] }
 0x422   :  { %v1145_v38 = vmul.f32 0.125, %v1144_v37  ;;  %v3285_v37 = vld [vmem:[#allocation20_spill] sm:$0xff] }
 0x424   :  { %v1146_v39 = vadd.f32 1e-05, %v1145_v38  ;;  %v1906_v38 = vpop.f32.mrb[16].mxu0 }
 0x426   :  { %2276 = vrsqrt.f32 %v1146_v39 }
 0x430   :  { %v2277_v17 = vpop.eup %2276 }
 0x431   :  { %v1148_v55 = vmul.f32 %v2277_v17, %v1137_v5  ;;  %v3280_v5 = vld [vmem:[#allocation15_spill] sm:$0xff] }
 0x433   :  { %v1149_v53 = vmul.f32 %v3044_v57, %v1148_v55 }
 0x435   :  { %v1150_v3 = vadd.f32 %v3049_v43, %v1149_v53  ;;  %v3287_v53 = vld [vmem:[#allocation22_spill] sm:$0xff] }
 0x437   :  { %v1151_v15 = vmax.f32 %v1150_v3, 0.0  ;;  %v3288_v3 = vld [vmem:[#allocation23_spill] sm:$0xff] }
 0x439   :  { %v1152_v21 = vpack.c.bf16 %v1151_v15, %v1151_v15 }
 0x43b   :  { %2091 = vmatmul.mubr.bf16.vlgmr.msra.gmra.mrb[12].mxu1 %v1152_v21 }
 0x43c   :  { %1913 = vmatpush3.bf16.msra.mxu1 %v2289_v23  ;;  %1336 = vmatprep.mubr.bf16.mxu1 %v1259_v32 }
 0x43d   :  { %1914 = vmatprep.subr.bf16.mxu1 %v2290_v31 }
 0x440   :  { %1915 = vmatpush3.bf16.msra.mxu1 %v2291_v59 }
 0x441   :  { %1916 = vmatprep.subr.bf16.mxu1 %v2292_v61 }
 0x444   :  { %1917 = vmatpush3.bf16.msra.mxu1 %v2293_v63 }
 0x445   :  { %1918 = vmatprep.subr.bf16.mxu1 %v2294_v51 }
 0x448   :  { %1919 = vmatpush3.bf16.msra.mxu1 %v2295_v47 }
 0x449   :  { %1920 = vmatprep.subr.bf16.mxu1 %v2296_v45 }
 0x44c   :  { %1921 = vmatpush3.bf16.msra.mxu1 %v2297_v0 }
 0x44d   :  { %1922 = vmatprep.subr.bf16.mxu1 %v2298_v27 }
 0x450   :  { %1923 = vmatpush3.bf16.msra.mxu1 %v2299_v29 }
 0x451   :  { %1924 = vmatprep.subr.bf16.mxu1 %v2300_v25 }
 0x454   :  { %1925 = vmatpush3.bf16.msra.mxu1 %v2301_v18 }
 0x455   :  { %1926 = vmatprep.subr.bf16.mxu1 %v2302_v22 }
 0x458   :  { %1927 = vmatpush3.bf16.msra.mxu1 %v2303_v28 }
 0x459   :  { %1956 = vmatprep.subr.bf16.mxu1 %v3267_v40 }
 0x45b   :  { %1337 = vmatmul.mubr.bf16.vlgmr.msra.gmra.mrb[16].mxu1 %v1258_v26 }
 0x45c   :  { %1957 = vmatpush3.bf16.msra.mxu1 %v3268_v42  ;;  %1416 = vmatprep.mubr.bf16.mxu1 %v1263_v30  ;;  %v3289_v42 = vld [vmem:[#allocation26_spill] sm:$0xff] }
 0x45d   :  { %1958 = vmatprep.subr.bf16.mxu1 %v3269_v44  ;;  %v3290_v44 = vld [vmem:[#allocation27_spill] sm:$0xff] }
 0x460   :  { %1959 = vmatpush3.bf16.msra.mxu1 %v3270_v46  ;;  %v3291_v46 = vld [vmem:[#allocation28_spill] sm:$0xff] }
 0x461   :  { %1960 = vmatprep.subr.bf16.mxu1 %v3271_v48  ;;  %v3292_v48 = vld [vmem:[#allocation29_spill] sm:$0xff] }
 0x464   :  { %1961 = vmatpush3.bf16.msra.mxu1 %v3272_v50  ;;  %v3294_v50 = vld [vmem:[#allocation31_spill] sm:$0xff] }
 0x465   :  { %1962 = vmatprep.subr.bf16.mxu1 %v3273_v52  ;;  %v3295_v52 = vld [vmem:[#allocation32_spill] sm:$0xff] }
 0x468   :  { %1963 = vmatpush3.bf16.msra.mxu1 %v3274_v54 }
 0x469   :  { %1964 = vmatprep.subr.bf16.mxu1 %v3275_v56 }
 0x46c   :  { %1965 = vmatpush3.bf16.msra.mxu1 %v3276_v58 }
 0x46d   :  { %1966 = vmatprep.subr.bf16.mxu1 %v3277_v60 }
 0x470   :  { %1967 = vmatpush3.bf16.msra.mxu1 %v3278_v62 }
 0x471   :  { %1968 = vmatprep.subr.bf16.mxu1 %v3279_v1 }
 0x474   :  { %1969 = vmatpush3.bf16.msra.mxu1 %v3280_v5 }
 0x475   :  { %1970 = vmatprep.subr.bf16.mxu1 %v3281_v13 }
 0x478   :  { %1971 = vmatpush3.bf16.msra.mxu1 %v3282_v34 }
 0x479   :  { %2114 = vmatprep.subr.bf16.mxu1 %v3251_v19 }
 0x47b   :  { %1417 = vmatmul.mubr.bf16.vlgmr.msra.gmra.mrb[20].mxu1 %v1262_v33 }
 0x47c   :  { %2115 = vmatpush3.bf16.msra.mxu1 %v2798_v7  ;;  %2130 = vmatprep.mubr.msk.bf16.mxu1 %vm2305_vm0, %v3251_v19  ;;  %v3286_v7 = vld [vmem:[#allocation21_spill] sm:$0xff] }
 0x47d   :  { %2116 = vmatprep.subr.bf16.mxu1 %v3251_v19 }
 0x480   :  { %2117 = vmatpush3.bf16.msra.mxu1 %v2805_v49  ;;  %v1907_v49 = vpop.f32.mrb[17].mxu0 }
 0x481   :  { %2118 = vmatprep.subr.bf16.mxu1 %v3251_v19  ;;  %v1908_v39 = vadd.f32 %v1907_v49, %v1906_v38  ;;  %v1909_v17 = vpop.f32.mrb[18].mxu0 }
 0x482   :  { %v1910_v55 = vpop.f32.mrb[19].mxu0 }
 0x483   :  { %v1950_v11 = vpop.f32.mrb[20].mxu0 }
 0x484   :  { %2119 = vmatpush3.bf16.msra.mxu1 %v3283_v35  ;;  %v1951_v15 = vpop.f32.mrb[21].mxu0 }
 0x485   :  { %2120 = vmatprep.subr.bf16.mxu1 %v3251_v19  ;;  %v1952_v32 = vadd.f32 %v1951_v15, %v1950_v11  ;;  %v1953_v21 = vpop.f32.mrb[22].mxu0 }
 0x486   :  { %v1954_v23 = vpop.f32.mrb[23].mxu0 }
 0x488   :  { %2121 = vmatpush3.bf16.msra.mxu1 %v3284_v36 }
 0x489   :  { %2122 = vmatprep.subr.bf16.mxu1 %v3251_v19 }
 0x48c   :  { %2123 = vmatpush3.bf16.msra.mxu1 %v3285_v37 }
 0x48d   :  { %2124 = vmatprep.subr.bf16.mxu1 %v3251_v19 }
 0x490   :  { %2125 = vmatpush3.bf16.msra.mxu1 %v3286_v7 }
 0x491   :  { %2126 = vmatprep.subr.bf16.mxu1 %v3251_v19 }
 0x494   :  { %2127 = vmatpush3.bf16.msra.mxu1 %v3287_v53 }
 0x495   :  { %2128 = vmatprep.subr.bf16.mxu1 %v3251_v19 }
 0x498   :  { %2129 = vmatpush3.bf16.msra.mxu1 %v3288_v3 }
 0x499   :  { %2154 = vmatprep.subr.bf16.mxu1 %v3251_v19 }
 0x50e   :  { %v1235_v31 = vpop.f32.mrb[12].mxu1 }
 0x50f   :  { %v2092_v59 = vpop.f32.mrb[13].mxu1  ;;  %v1241_v61 = vmul.f32 %v1235_v31, %v1235_v31 }
 0x510   :  { %v1238_v63 = vpop.f32.mrb[14].mxu1 }
 0x511   :  { %1242 = vadd.xlane.f32.xlu0 %v1241_v61  ;;  %v2093_v51 = vpop.f32.mrb[15].mxu1  ;;  %v3297_v61 = vld [vmem:[#allocation25_spill] sm:$0xff] }
 0x52e   :  { %v1928_v47 = vpop.f32.mrb[16].mxu1 }
 0x52f   :  { %v1929_v45 = vpop.f32.mrb[17].mxu1 }
 0x530   :  { %v1930_v0 = vadd.f32 %v1929_v45, %v1928_v47  ;;  %v1931_v27 = vpop.f32.mrb[18].mxu1 }
 0x531   :  { %v1932_v29 = vpop.f32.mrb[19].mxu1 }
 0x532   :  { %v1339_v25 = vadd.f32 %v1930_v0, %v1908_v39 }
 0x534   :  { %v1379_v18 = vadd.f32 %v1952_v32, %v1339_v25 }
 0x54e   :  { %v1972_v20 = vpop.f32.mrb[20].mxu1 }
 0x54f   :  { %v1973_v22 = vpop.f32.mrb[21].mxu1 }
 0x550   :  { %v1974_v24 = vadd.f32 %v1973_v22, %v1972_v20  ;;  %v1975_v26 = vpop.f32.mrb[22].mxu1 }
 0x551   :  { %v1976_v28 = vpop.f32.mrb[23].mxu1 }
 0x552   :  { %v1419_v30 = vadd.f32 %v1974_v24, %v1379_v18 }
 0x554   :  { %v1424_v40 = vpack.c.bf16 %v1419_v30, %v1419_v30 }
 0x556   :  { %2111 = vmatmul.mubr.bf16.vlgmr.msra.gmra.mrb[24].mxu0 %v1424_v40 }
 0x557   :  { %2135 = vmatpush3.bf16.msra.mxu0 %v2868_v41  ;;  %2150 = vmatprep.mubr.msk.bf16.mxu0 %vm2305_vm0, %v3251_v19  ;;  %v3293_v41 = vld [vmem:[#allocation30_spill] sm:$0xff] }
 0x558   :  { %2136 = vmatprep.subr.bf16.mxu0 %v3251_v19 }
 0x55b   :  { %2137 = vmatpush3.bf16.msra.mxu0 %v3289_v42 }
 0x55c   :  { %2138 = vmatprep.subr.bf16.mxu0 %v3251_v19 }
 0x55f   :  { %2139 = vmatpush3.bf16.msra.mxu0 %v3290_v44 }
 0x560   :  { %2140 = vmatprep.subr.bf16.mxu0 %v3251_v19 }
 0x563   :  { %2141 = vmatpush3.bf16.msra.mxu0 %v3291_v46 }
 0x564   :  { %2142 = vmatprep.subr.bf16.mxu0 %v3251_v19 }
 0x567   :  { %2143 = vmatpush3.bf16.msra.mxu0 %v3292_v48 }
 0x568   :  { %2144 = vmatprep.subr.bf16.mxu0 %v3251_v19 }
 0x56b   :  { %2145 = vmatpush3.bf16.msra.mxu0 %v3293_v41 }
 0x56c   :  { %2146 = vmatprep.subr.bf16.mxu0 %v3251_v19 }
 0x56f   :  { %2147 = vmatpush3.bf16.msra.mxu0 %v3294_v50 }
 0x570   :  { %2148 = vmatprep.subr.bf16.mxu0 %v3251_v19 }
 0x573   :  { %2149 = vmatpush3.bf16.msra.mxu0 %v3295_v52 }
 0x59e   :  { %v1243_v54 = vpop.xlane.xlu0 %1242 }
 0x59f   :  { %v1244_v56 = vmax.f32 %v1243_v54, 1e-24 }
 0x5a1   :  { %2278 = vrsqrt.f32 %v1244_v56 }
 0x5ab   :  { %v2279_v58 = vpop.eup %2278 }
 0x5ac   :  { %v1246_v60 = vmul.f32 %v2279_v58, %v1235_v31  ;;  %v3296_v31 = vld [vmem:[#allocation24_spill] sm:$0xff] }
 0x5ae   :  { %1247 = vst [vmem:[%s3200_s11] sm:$0xff] %v1246_v60 }
 0x629   :  { %v1459_v62 = vpop.f32.mrb[24].mxu0 }
 0x62a   :  { %v1465_v1 = vrot.slane %v1459_v62, 4  ;;  %v2112_v5 = vpop.f32.mrb[25].mxu0 }
 0x62b   :  { %v1462_v9 = vpop.f32.mrb[26].mxu0 }
 0x62c   :  { %v1466_v13 = vadd.f32 %v1465_v1, %v1459_v62  ;;  %v2113_v33 = vpop.f32.mrb[27].mxu0 }
 0x62e   :  { %v1467_v34 = vrot.slane %v1466_v13, 2 }
 0x630   :  { %v1468_v35 = vadd.f32 %v1467_v34, %v1466_v13 }
 0x632   :  { %v1469_v36 = vrot.slane %v1468_v35, 1 }
 0x634   :  { %v1470_v37 = vadd.f32 %v1469_v36, %v1468_v35 }
 0x636   :  { %v1471_v7 = vmul.f32 0.125, %v1470_v37 }
 0x638   :  { %v1472_v38 = vsub.f32 %v1459_v62, %v1471_v7 }
 0x63a   :  { %v1473_v49 = vmul.f32 %v1472_v38, %v1472_v38 }
 0x63c   :  { %v1474_v39 = vrot.slane %v1473_v49, 4 }
 0x63e   :  { %v1475_v17 = vadd.f32 %v1474_v39, %v1473_v49 }
 0x640   :  { %v1476_v55 = vrot.slane %v1475_v17, 2 }
 0x642   :  { %v1477_v53 = vadd.f32 %v1476_v55, %v1475_v17 }
 0x644   :  { %v1478_v3 = vrot.slane %v1477_v53, 1 }
 0x646   :  { %v1479_v11 = vadd.f32 %v1478_v3, %v1477_v53 }
 0x648   :  { %v1480_v15 = vmul.f32 0.125, %v1479_v11 }
 0x64a   :  { %v1481_v32 = vadd.f32 1e-05, %v1480_v15 }
 0x64c   :  { %2280 = vrsqrt.f32 %v1481_v32 }
 0x656   :  { %v2281_v21 = vpop.eup %2280 }
 0x657   :  { %v1483_v23 = vmul.f32 %v2281_v21, %v1472_v38 }
 0x659   :  { %v1484_v59 = vmul.f32 %v3296_v31, %v1483_v23 }
 0x65b   :  { %v1485_v63 = vadd.f32 %v3297_v61, %v1484_v59 }
 0x65d   :  { %v1486_v51 = vmax.f32 %v1485_v63, 0.0 }
 0x65f   :  { %v1487_v47 = vpack.c.bf16 %v1486_v51, %v1486_v51 }
 0x661   :  { %2131 = vmatmul.mubr.bf16.vlgmr.msra.gmra.mrb[24].mxu1 %v1487_v47 }
 0x662   :  { %2155 = vmatpush3.bf16.msra.mxu1 %v2940_v2  ;;  %2170 = vmatprep.mubr.msk.bf16.mxu1 %vm2305_vm0, %v3251_v19 }
 0x663   :  { %2156 = vmatprep.subr.bf16.mxu1 %v3251_v19 }
 0x666   :  { %2157 = vmatpush3.bf16.msra.mxu1 %v2947_v4 }
 0x667   :  { %2158 = vmatprep.subr.bf16.mxu1 %v3251_v19 }
 0x66a   :  { %2159 = vmatpush3.bf16.msra.mxu1 %v2954_v6 }
 0x66b   :  { %2160 = vmatprep.subr.bf16.mxu1 %v3251_v19 }
 0x66e   :  { %2161 = vmatpush3.bf16.msra.mxu1 %v2961_v8 }
 0x66f   :  { %2162 = vmatprep.subr.bf16.mxu1 %v3251_v19 }
 0x672   :  { %2163 = vmatpush3.bf16.msra.mxu1 %v2968_v10 }
 0x673   :  { %2164 = vmatprep.subr.bf16.mxu1 %v3251_v19 }
 0x676   :  { %2165 = vmatpush3.bf16.msra.mxu1 %v2975_v12 }
 0x677   :  { %2166 = vmatprep.subr.bf16.mxu1 %v3251_v19 }
 0x67a   :  { %2167 = vmatpush3.bf16.msra.mxu1 %v2982_v14 }
 0x67b   :  { %2168 = vmatprep.subr.bf16.mxu1 %v3251_v19 }
 0x67e   :  { %2169 = vmatpush3.bf16.msra.mxu1 %v2988_v16 }
 0x734   :  { %v1522_v2 = vpop.f32.mrb[24].mxu1 }
 0x735   :  { %v1528_v4 = vrot.slane %v1522_v2, 4  ;;  %v2132_v6 = vpop.f32.mrb[25].mxu1 }
 0x736   :  { %v1525_v8 = vpop.f32.mrb[26].mxu1 }
 0x737   :  { %v1529_v45 = vadd.f32 %v1528_v4, %v1522_v2  ;;  %v2133_v0 = vpop.f32.mrb[27].mxu1 }
 0x739   :  { %v1530_v27 = vrot.slane %v1529_v45, 2 }
 0x73b   :  { %v1531_v10 = vadd.f32 %v1530_v27, %v1529_v45 }
 0x73d   :  { %v1532_v29 = vrot.slane %v1531_v10, 1 }
 0x73f   :  { %v1533_v25 = vadd.f32 %v1532_v29, %v1531_v10 }
 0x741   :  { %v1534_v18 = vmul.f32 0.125, %v1533_v25 }
 0x743   :  { %v1535_v12 = vsub.f32 %v1522_v2, %v1534_v18 }
 0x745   :  { %v1536_v20 = vmul.f32 %v1535_v12, %v1535_v12 }
 0x747   :  { %v1537_v22 = vrot.slane %v1536_v20, 4 }
 0x749   :  { %v1538_v24 = vadd.f32 %v1537_v22, %v1536_v20 }
 0x74b   :  { %v1539_v14 = vrot.slane %v1538_v24, 2 }
 0x74d   :  { %v1540_v26 = vadd.f32 %v1539_v14, %v1538_v24 }
 0x74f   :  { %v1541_v19 = vrot.slane %v1540_v26, 1 }
 0x751   :  { %v1542_v28 = vadd.f32 %v1541_v19, %v1540_v26 }
 0x753   :  { %v1543_v16 = vmul.f32 0.125, %v1542_v28 }
 0x755   :  { %v1544_v30 = vadd.f32 1e-05, %v1543_v16 }
 0x757   :  { %2282 = vrsqrt.f32 %v1544_v30 }
 0x761   :  { %v2283_v40 = vpop.eup %2282 }
 0x762   :  { %v1546_v42 = vmul.f32 %v2283_v40, %v1535_v12 }
 0x764   :  { %v1547_v44 = vpack.c.bf16 %v1546_v42, %v1546_v42 }
 0x766   :  { %2151 = vmatmul.mubr.bf16.vlgmr.msra.gmra.mrb[28].mxu0 %v1547_v44 }
 0x839   :  { %v1582_v46 = vpop.f32.mrb[28].mxu0 }
 0x83a   :  { %v1588_v48 = vrot.slane %v1582_v46, 4  ;;  %v2152_v41 = vpop.f32.mrb[29].mxu0 }
 0x83b   :  { %v1585_v50 = vpop.f32.mrb[30].mxu0 }
 0x83c   :  { %v1589_v52 = vadd.f32 %v1588_v48, %v1582_v46  ;;  %v2153_v54 = vpop.f32.mrb[31].mxu0 }
 0x83e   :  { %v1590_v56 = vrot.slane %v1589_v52, 2 }
 0x840   :  { %v1591_v58 = vadd.f32 %v1590_v56, %v1589_v52 }
 0x842   :  { %v1592_v60 = vrot.slane %v1591_v58, 1 }
 0x844   :  { %v1593_v62 = vadd.f32 %v1592_v60, %v1591_v58 }
 0x846   :  { %v1594_v1 = vmul.f32 0.125, %v1593_v62 }
 0x848   :  { %v1595_v5 = vsub.f32 %v1582_v46, %v1594_v1 }
 0x84a   :  { %v1596_v9 = vmul.f32 %v1595_v5, %v1595_v5 }
 0x84c   :  { %v1597_v13 = vrot.slane %v1596_v9, 4 }
 0x84e   :  { %v1598_v33 = vadd.f32 %v1597_v13, %v1596_v9 }
 0x850   :  { %v1599_v34 = vrot.slane %v1598_v33, 2 }
 0x852   :  { %v1600_v35 = vadd.f32 %v1599_v34, %v1598_v33 }
 0x854   :  { %v1601_v36 = vrot.slane %v1600_v35, 1 }
 0x856   :  { %v1602_v37 = vadd.f32 %v1601_v36, %v1600_v35 }
 0x858   :  { %v1603_v7 = vmul.f32 0.125, %v1602_v37 }
 0x85a   :  { %v1604_v38 = vadd.f32 1e-05, %v1603_v7 }
 0x85c   :  { %2284 = vrsqrt.f32 %v1604_v38 }
 0x866   :  { %v2285_v49 = vpop.eup %2284 }
 0x867   :  { %v1606_v39 = vmul.f32 %v2285_v49, %v1595_v5 }
 0x869   :  { %v1607_v17 = vmul.f32 %v3044_v57, %v1606_v39 }
 0x86b   :  { %v1608_v55 = vadd.f32 %v3049_v43, %v1607_v17 }
 0x86d   :  { %v1609_v53 = vmax.f32 %v1608_v55, 0.0 }
 0x86f   :  { %v1610_v3 = vpack.c.bf16 %v1609_v53, %v1609_v53 }
 0x871   :  { %2171 = vmatmul.mubr.bf16.vlgmr.msra.gmra.mrb[28].mxu1 %v1610_v3 }
 0x944   :  { %v1645_v11 = vpop.f32.mrb[28].mxu1 }
 0x945   :  { %v2172_v15 = vpop.f32.mrb[29].mxu1  ;;  %v1651_v32 = vmul.f32 %v1645_v11, %v1645_v11 }
 0x946   :  { %v1648_v21 = vpop.f32.mrb[30].mxu1 }
 0x947   :  { %1652 = vadd.xlane.f32.xlu0 %v1651_v32  ;;  %v2173_v23 = vpop.f32.mrb[31].mxu1 }
 0x9d4   :  { %v1653_v31 = vpop.xlane.xlu0 %1652 }
 0x9d5   :  { %v1654_v59 = vmax.f32 %v1653_v31, 1e-24 }
 0x9d7   :  { %2286 = vrsqrt.f32 %v1654_v59 }
 0x9e1   :  { %v2287_v61 = vpop.eup %2286 }
 0x9e2   :  { %v1656_v63 = vmul.f32 %v2287_v61, %v1645_v11 }
 0x9e4   :  { %1657 = vst [vmem:[%s3201_s12] sm:$0xff] %v1656_v63 }

</bundles_post_ra>
